<compile_context>
chip_gen: v7x
topology: tpu7x:2x2x1
jax: 0.10.0
libtpu: 0.0.40
codegen_flags: <defaults>
</compile_context>

<pallas_src>
import numpy as np

import jax
import jax.numpy as jnp
from jax.experimental import pallas as pl
from jax.experimental.pallas import tpu as pltpu

N_CLASSES = 10
CLS_PAD = 128  # lane-dense padded class dimension for the output block


# ----------------------------------------------------------------------------
# The fused Pallas kernel (one grid step == one image)
# ----------------------------------------------------------------------------
def _mnistnet_kernel(x_ref,
                     w_ib1, b_ib1, w_ib_one,
                     w_b1_1, b_b1_1, w_b1_2, b_b1_2,
                     w_pb1,
                     w_b2_1, b_b2_1, w_b2_2, b_b2_2, w_b2_one,
                     w_b3_1, b_b3_1, w_b3_2, b_b3_2,
                     w_head,
                     o_ref,
                     pad1_ref, pad2_ref):
    f32 = jnp.float32

    def conv3_bn_relu(a, w_ref, b_ref, ho):
        # 3x3 conv as three banded GEMMs over row-shifted slices.
        # BN scale is folded into the weight; bias-add + ReLU fused here.
        acc = jnp.dot(a[0:ho, :], w_ref[0], preferred_element_type=f32)
        acc = acc + jnp.dot(a[1:1 + ho, :], w_ref[1], preferred_element_type=f32)
        acc = acc + jnp.dot(a[2:2 + ho, :], w_ref[2], preferred_element_type=f32)
        return jnp.maximum(acc + b_ref[...], 0.0)

    # ------------------------------ input_block -----------------------------
    a = conv3_bn_relu(x_ref[...], w_ib1, b_ib1, 26)              # (26, 26*16)
    # TODO(synk): Dropout layers are identity (eval-mode semantics only).
    a = jnp.dot(a, w_ib_one[...], preferred_element_type=f32)    # (26, 26*8)

    # -------------------------------- block1 --------------------------------
    a = conv3_bn_relu(a, w_b1_1, b_b1_1, 24)                     # (24, 24*8)
    # vertical zero-padding for the padding=1 conv, via a small VMEM scratch
    pad1_ref[0:1, :] = jnp.zeros((1, 192), f32)
    pad1_ref[25:26, :] = jnp.zeros((1, 192), f32)
    pad1_ref[1:25, :] = a
    # output pixel layout: [even pixels | pad | odd pixels | pad] -> 512 lanes
    a = conv3_bn_relu(pad1_ref[...], w_b1_2, b_b1_2, 24)         # (24, 512)

    # -------------------- pool_block1 (fused maxpool + 1x1) -----------------
    rowmax = jnp.maximum(a[0:23, :], a[1:24, :])                 # (23, 512)
    rr = jax.lax.broadcasted_iota(jnp.int32, (12, 23), 0)
    cc = jax.lax.broadcasted_iota(jnp.int32, (12, 23), 1)
    sel = (cc == 2 * rr).astype(f32)                             # rows 0,2,...,22
    pr = jnp.dot(sel, rowmax, preferred_element_type=f32)        # (12, 512)
    a = jnp.maximum(pr[:, 0:256], pr[:, 256:512])                # (12, 256)
    a = jnp.dot(a, w_pb1[...], preferred_element_type=f32)       # (12, 12*8)

    # -------------------------------- block2 --------------------------------
    a = conv3_bn_relu(a, w_b2_1, b_b2_1, 10)                     # (10, 10*8)
    pad2_ref[0:1, :] = jnp.zeros((1, 80), f32)
    pad2_ref[11:12, :] = jnp.zeros((1, 80), f32)
    pad2_ref[1:11, :] = a
    a = conv3_bn_relu(pad2_ref[...], w_b2_2, b_b2_2, 10)         # (10, 10*14)
    a = jnp.dot(a, w_b2_one[...], preferred_element_type=f32)    # (10, 10*8)

    # -------------------------------- block3 --------------------------------
    a = conv3_bn_relu(a, w_b3_1, b_b3_1, 8)                      # (8, 8*16)
    a = conv3_bn_relu(a, w_b3_2, b_b3_2, 6)                      # (6, 6*18)

    # -------------- prediction head: GAP(6) + 1x1 + log_softmax -------------
    s = jnp.sum(a, axis=0, keepdims=True)                        # (1, 108)
    logits = jnp.dot(s, w_head[...], preferred_element_type=f32)  # (1, 128)
    col = jax.lax.broadcasted_iota(jnp.int32, logits.shape, 1)
    valid = col < N_CLASSES
    lg = jnp.where(valid, logits, jnp.full_like(logits, -1e30))
    m = jnp.max(lg, axis=-1, keepdims=True)
    sh = lg - m
    denom = jnp.sum(jnp.where(valid, jnp.exp(sh), 0.0), axis=-1, keepdims=True)
    o_ref[...] = jnp.broadcast_to(sh - jnp.log(denom), o_ref.shape)


# ----------------------------------------------------------------------------
# Forward wrapper
# ----------------------------------------------------------------------------
def _resident_spec(a):
    nd = a.ndim
    return pl.BlockSpec(a.shape, lambda b, _n=nd: (0,) * _n)


@jax.jit
def mnistnet_forward(x, packed):
    n = x.shape[0]
    x2 = x.reshape(n, 28, 28).astype(jnp.float32)     # NCHW with C=1 -> (N,H,W)
    out = pl.pallas_call(
        _mnistnet_kernel,
        out_shape=jax.ShapeDtypeStruct((n, 8, CLS_PAD), jnp.float32),
        grid=(n,),
        in_specs=[pl.BlockSpec((None, 28, 28), lambda b: (b, 0, 0))]
                 + [_resident_spec(a) for a in packed],
        out_specs=pl.BlockSpec((None, 8, CLS_PAD), lambda b: (b, 0, 0)),
        scratch_shapes=[pltpu.VMEM((26, 192), jnp.float32),   # pad=1 conv (block1)
                        pltpu.VMEM((12, 80), jnp.float32)],   # pad=1 conv (block2)
        compiler_params=pltpu.CompilerParams(
            dimension_semantics=("parallel",)),
    )(x2, *packed)
    return out[:, 0, :N_CLASSES]                      # (N, 10) log-probs


# ----------------------------------------------------------------------------
# One-time weight packing (host-side, numpy): banded / block-diagonal GEMMs
# ----------------------------------------------------------------------------
def _fold_bn(gamma, beta, mean, var, eps=1e-5):
    scale = gamma / jnp.sqrt(var + eps)
    return scale.astype(jnp.float32), (beta - mean * scale).astype(jnp.float32)


def _banded_conv3(w, w_in, pad, scale, out_pixel_block=None, n_out_blocks=None):
    """Pack a 3x3 conv (+ folded BN scale) as 3 banded GEMM weights.

    Activation layout is (rows=H, cols=W*Cin); output layout is
    (rows=Ho, cols=n_out_blocks*Cout) with output pixel xo mapped to column
    block out_pixel_block[xo] (identity by default).  Horizontal zero-padding
    is baked into the band structure; vertical padding is done in-kernel.
    """
    wnp = np.asarray(w, np.float32)
    cout, cin, kh, kw = wnp.shape
    wnp = wnp * np.asarray(scale, np.float32)[:, None, None, None]
    wo = w_in if pad == 1 else w_in - (kw - 1)
    nob = wo if n_out_blocks is None else n_out_blocks
    wb = np.zeros((kh, w_in * cin, nob * cout), np.float32)
    for xo in range(wo):
        ob = xo if out_pixel_block is None else out_pixel_block[xo]
        for dx in range(kw):
            xi = xo + dx - pad
            if 0 <= xi < w_in:
                for dy in range(kh):
                    wb[dy, xi * cin:(xi + 1) * cin,
                       ob * cout:(ob + 1) * cout] = wnp[:, :, dy, dx].T
    return jnp.asarray(wb)


def _tiled_bias(bias, n_blocks, block_mask=None):
    b = np.asarray(bias, np.float32)
    c = b.shape[0]
    v = np.zeros((1, n_blocks * c), np.float32)
    blocks = range(n_blocks) if block_mask is None else block_mask
    for blk in blocks:
        v[0, blk * c:(blk + 1) * c] = b
    return jnp.asarray(v)


def _blockdiag_1x1(w, n_pix, n_row_blocks=None):
    wnp = np.asarray(w, np.float32).reshape(w.shape[0], w.shape[1])   # (Cout, Cin)
    cout, cin = wnp.shape
    nrb = n_pix if n_row_blocks is None else n_row_blocks
    m = np.zeros((nrb * cin, n_pix * cout), np.float32)
    for p2 in range(n_pix):
        m[p2 * cin:(p2 + 1) * cin, p2 * cout:(p2 + 1) * cout] = wnp.T
    return jnp.asarray(m)


def _head_weight(w_pred, h, w):
    wnp = np.asarray(w_pred, np.float32).reshape(w_pred.shape[0], w_pred.shape[1])
    ncls, c = wnp.shape
    m = np.zeros((w * c, CLS_PAD), np.float32)
    for x in range(w):
        m[x * c:(x + 1) * c, :ncls] = wnp.T / float(h * w)   # 1/(H*W) GAP folded in
    return jnp.asarray(m)


def pack_params(p):
    """Fold BN into the conv weights and pack everything into the banded /
    block-diagonal GEMM layout used by the fused kernel (done once at init)."""
    # Even/odd output-pixel split (each half padded to a 128-lane boundary) so
    # the fused maxpool can take a max of two lane-aligned column halves.
    pool_perm = [x // 2 if x % 2 == 0 else 16 + x // 2 for x in range(24)]
    pool_bias_blocks = list(range(12)) + list(range(16, 28))

    s, b = p["bn_ib1"]
    packed = [
        _banded_conv3(p["w_ib1"], 28, 0, s), _tiled_bias(b, 26),
        _blockdiag_1x1(p["w_ib_one"], 26),
    ]
    s, b = p["bn_b1_1"]
    packed += [_banded_conv3(p["w_b1_1"], 26, 0, s), _tiled_bias(b, 24)]
    s, b = p["bn_b1_2"]
    packed += [_banded_conv3(p["w_b1_2"], 24, 1, s,
                             out_pixel_block=pool_perm, n_out_blocks=32),
               _tiled_bias(b, 32, block_mask=pool_bias_blocks)]
    packed += [_blockdiag_1x1(p["w_pb1"], 12, n_row_blocks=16)]
    s, b = p["bn_b2_1"]
    packed += [_banded_conv3(p["w_b2_1"], 12, 0, s), _tiled_bias(b, 10)]
    s, b = p["bn_b2_2"]
    packed += [_banded_conv3(p["w_b2_2"], 10, 1, s), _tiled_bias(b, 10)]
    packed += [_blockdiag_1x1(p["w_b2_one"], 10)]
    s, b = p["bn_b3_1"]
    packed += [_banded_conv3(p["w_b3_1"], 10, 0, s), _tiled_bias(b, 8)]
    s, b = p["bn_b3_2"]
    packed += [_banded_conv3(p["w_b3_2"], 8, 0, s), _tiled_bias(b, 6)]
    packed += [_head_weight(p["w_pred"], 6, 6)]
    return packed


# ----------------------------------------------------------------------------
# Synthetic (deterministic) parameters and a pure-JAX reference for checking
# ----------------------------------------------------------------------------
def init_params(key):
    keys = iter(jax.random.split(key, 40))

    def conv_w(shape):
        return (0.1 * jax.random.normal(next(keys), shape)).astype(jnp.float32)

    def bn(c):
        gamma = 1.0 + 0.05 * jax.random.normal(next(keys), (c,))
        beta = 0.05 * jax.random.normal(next(keys), (c,))
        mean = 0.05 * jax.random.normal(next(keys), (c,))
        var = 1.0 + 0.1 * jax.random.uniform(next(keys), (c,))
        return _fold_bn(gamma, beta, mean, var)

    p = {}
    p["w_ib1"] = conv_w((16, 1, 3, 3));   p["bn_ib1"] = bn(16)
    p["w_ib_one"] = conv_w((8, 16, 1, 1))
    p["w_b1_1"] = conv_w((8, 8, 3, 3));   p["bn_b1_1"] = bn(8)
    p["w_b1_2"] = conv_w((16, 8, 3, 3));  p["bn_b1_2"] = bn(16)
    p["w_pb1"] = conv_w((8, 16, 1, 1))
    p["w_b2_1"] = conv_w((8, 8, 3, 3));   p["bn_b2_1"] = bn(8)
    p["w_b2_2"] = conv_w((14, 8, 3, 3));  p["bn_b2_2"] = bn(14)
    p["w_b2_one"] = conv_w((8, 14, 1, 1))
    p["w_b3_1"] = conv_w((16, 8, 3, 3));  p["bn_b3_1"] = bn(16)
    p["w_b3_2"] = conv_w((18, 16, 3, 3)); p["bn_b3_2"] = bn(18)
    p["w_pred"] = conv_w((10, 18, 1, 1))
    return p


def ref_forward(x, p):
    """Pure-JAX reference (eval-mode MNISTNet) used to verify the kernel."""
    hi = jax.lax.Precision.HIGHEST

    def conv(x, w, pad):
        return jax.lax.conv_general_dilated(
            x, w, (1, 1), [(pad, pad), (pad, pad)],
            dimension_numbers=("NCHW", "OIHW", "NCHW"), precision=hi)

    def bnrelu(x, sb):
        s, b = sb
        return jnp.maximum(x * s[None, :, None, None] + b[None, :, None, None], 0.0)

    x = bnrelu(conv(x, p["w_ib1"], 0), p["bn_ib1"])
    x = conv(x, p["w_ib_one"], 0)
    x = bnrelu(conv(x, p["w_b1_1"], 0), p["bn_b1_1"])
    x = bnrelu(conv(x, p["w_b1_2"], 1), p["bn_b1_2"])
    x = jax.lax.reduce_window(x, -jnp.inf, jax.lax.max,
                              (1, 1, 2, 2), (1, 1, 2, 2), "VALID")
    x = conv(x, p["w_pb1"], 0)
    x = bnrelu(conv(x, p["w_b2_1"], 0), p["bn_b2_1"])
    x = bnrelu(conv(x, p["w_b2_2"], 1), p["bn_b2_2"])
    x = conv(x, p["w_b2_one"], 0)
    x = bnrelu(conv(x, p["w_b3_1"], 0), p["bn_b3_1"])
    x = bnrelu(conv(x, p["w_b3_2"], 0), p["bn_b3_2"])
    x = jnp.mean(x, axis=(2, 3), keepdims=True)
    x = conv(x, p["w_pred"], 0).reshape(x.shape[0], -1)
    return jax.nn.log_softmax(x, axis=-1)


if __name__ == "__main__":
    key = jax.random.PRNGKey(0)
    k_x, k_p = jax.random.split(key)
    # MNIST geometry is required by the architecture (28 -> ... -> 6 -> GAP(6)).
    x = jax.random.normal(k_x, (2, 1, 28, 28), dtype=jnp.float32)
    params = init_params(k_p)
    packed = pack_params(params)

    out = mnistnet_forward(x, packed)
    out = jax.block_until_ready(out)

    assert out.shape == (2, 10), out.shape
    assert bool(jnp.all(jnp.isfinite(out)))
    # log_softmax rows should exponentiate-sum to ~1
    row_sums = jnp.sum(jnp.exp(out), axis=-1)
    assert bool(jnp.all(jnp.abs(row_sums - 1.0) < 1e-4)), row_sums
    # verify against a pure-JAX reference of the same (eval-mode) network
    ref = ref_forward(x, params)
    assert bool(jnp.allclose(out, ref, atol=2e-3, rtol=2e-3)), (out, ref)
    print("KERNEL_OK")
</pallas_src>

<mosaic_0001>
module attributes {stable_mosaic.version = 11 : i64} {
  func.func @_mnistnet_kernel(%arg0: i32, %arg1: memref<1x28x28xf32, #tpu.memory_space<vmem>>, %arg2: memref<3x28x416xf32, #tpu.memory_space<vmem>>, %arg3: memref<1x416xf32, #tpu.memory_space<vmem>>, %arg4: memref<416x208xf32, #tpu.memory_space<vmem>>, %arg5: memref<3x208x192xf32, #tpu.memory_space<vmem>>, %arg6: memref<1x192xf32, #tpu.memory_space<vmem>>, %arg7: memref<3x192x512xf32, #tpu.memory_space<vmem>>, %arg8: memref<1x512xf32, #tpu.memory_space<vmem>>, %arg9: memref<256x96xf32, #tpu.memory_space<vmem>>, %arg10: memref<3x96x80xf32, #tpu.memory_space<vmem>>, %arg11: memref<1x80xf32, #tpu.memory_space<vmem>>, %arg12: memref<3x80x140xf32, #tpu.memory_space<vmem>>, %arg13: memref<1x140xf32, #tpu.memory_space<vmem>>, %arg14: memref<140x80xf32, #tpu.memory_space<vmem>>, %arg15: memref<3x80x128xf32, #tpu.memory_space<vmem>>, %arg16: memref<1x128xf32, #tpu.memory_space<vmem>>, %arg17: memref<3x128x108xf32, #tpu.memory_space<vmem>>, %arg18: memref<1x108xf32, #tpu.memory_space<vmem>>, %arg19: memref<108x128xf32, #tpu.memory_space<vmem>>, %arg20: memref<1x8x128xf32, #tpu.memory_space<vmem>>, %arg21: memref<26x192xf32, #tpu.memory_space<vmem>>, %arg22: memref<12x80xf32, #tpu.memory_space<vmem>>) attributes {dimension_semantics = [#tpu.dimension_semantics<parallel>], iteration_bounds = array<i64: 2>, scalar_prefetch = 0 : i64, scratch_operands = 2 : i64, tpu.core_type = #tpu.core_type<tc>, window_params = [{transform_indices = @transform_0, window_bounds = array<i64: 1, 28, 28>}, {pipeline_mode = #tpu.pipeline_mode<synchronous>, transform_indices = @transform_1, window_bounds = array<i64: 3, 28, 416>}, {pipeline_mode = #tpu.pipeline_mode<synchronous>, transform_indices = @transform_2, window_bounds = array<i64: 1, 416>}, {pipeline_mode = #tpu.pipeline_mode<synchronous>, transform_indices = @transform_3, window_bounds = array<i64: 416, 208>}, {pipeline_mode = #tpu.pipeline_mode<synchronous>, transform_indices = @transform_4, window_bounds = array<i64: 3, 208, 192>}, {pipeline_mode = #tpu.pipeline_mode<synchronous>, transform_indices = @transform_5, window_bounds = array<i64: 1, 192>}, {pipeline_mode = #tpu.pipeline_mode<synchronous>, transform_indices = @transform_6, window_bounds = array<i64: 3, 192, 512>}, {pipeline_mode = #tpu.pipeline_mode<synchronous>, transform_indices = @transform_7, window_bounds = array<i64: 1, 512>}, {pipeline_mode = #tpu.pipeline_mode<synchronous>, transform_indices = @transform_8, window_bounds = array<i64: 256, 96>}, {pipeline_mode = #tpu.pipeline_mode<synchronous>, transform_indices = @transform_9, window_bounds = array<i64: 3, 96, 80>}, {pipeline_mode = #tpu.pipeline_mode<synchronous>, transform_indices = @transform_10, window_bounds = array<i64: 1, 80>}, {pipeline_mode = #tpu.pipeline_mode<synchronous>, transform_indices = @transform_11, window_bounds = array<i64: 3, 80, 140>}, {pipeline_mode = #tpu.pipeline_mode<synchronous>, transform_indices = @transform_12, window_bounds = array<i64: 1, 140>}, {pipeline_mode = #tpu.pipeline_mode<synchronous>, transform_indices = @transform_13, window_bounds = array<i64: 140, 80>}, {pipeline_mode = #tpu.pipeline_mode<synchronous>, transform_indices = @transform_14, window_bounds = array<i64: 3, 80, 128>}, {pipeline_mode = #tpu.pipeline_mode<synchronous>, transform_indices = @transform_15, window_bounds = array<i64: 1, 128>}, {pipeline_mode = #tpu.pipeline_mode<synchronous>, transform_indices = @transform_16, window_bounds = array<i64: 3, 128, 108>}, {pipeline_mode = #tpu.pipeline_mode<synchronous>, transform_indices = @transform_17, window_bounds = array<i64: 1, 108>}, {pipeline_mode = #tpu.pipeline_mode<synchronous>, transform_indices = @transform_18, window_bounds = array<i64: 108, 128>}, {transform_indices = @transform_19, window_bounds = array<i64: 1, 8, 128>}]} {
    %c0 = arith.constant 0 : index
    %c0_0 = arith.constant 0 : index
    %c0_1 = arith.constant 0 : index
    %0 = vector.load %arg1[%c0, %c0_0, %c0_1] : memref<1x28x28xf32, #tpu.memory_space<vmem>>, vector<1x28x28xf32>
    %1 = vector.shape_cast %0 : vector<1x28x28xf32> to vector<28x28xf32>
    %2 = vector.extract_strided_slice %1 {offsets = [0, 0], sizes = [26, 28], strides = [1, 1]} : vector<28x28xf32> to vector<26x28xf32>
    %c0_2 = arith.constant 0 : index
    %c0_3 = arith.constant 0 : index
    %c0_4 = arith.constant 0 : index
    %3 = vector.load %arg2[%c0_2, %c0_3, %c0_4] : memref<3x28x416xf32, #tpu.memory_space<vmem>>, vector<1x28x416xf32>
    %4 = vector.shape_cast %3 : vector<1x28x416xf32> to vector<28x416xf32>
    %cst = arith.constant dense<0.000000e+00> : vector<26x416xf32>
    %5 = tpu.matmul %2, %4, %cst {dimension_numbers = #tpu.dot_dimension_numbers<[1], [0], [0], [1], [0, 0, 1, 1], [], []>} : vector<26x28xf32>, vector<28x416xf32>, vector<26x416xf32> -> vector<26x416xf32>
    %6 = vector.extract_strided_slice %1 {offsets = [1, 0], sizes = [26, 28], strides = [1, 1]} : vector<28x28xf32> to vector<26x28xf32>
    %c1 = arith.constant 1 : index
    %c0_5 = arith.constant 0 : index
    %c0_6 = arith.constant 0 : index
    %7 = vector.load %arg2[%c1, %c0_5, %c0_6] : memref<3x28x416xf32, #tpu.memory_space<vmem>>, vector<1x28x416xf32>
    %8 = vector.shape_cast %7 : vector<1x28x416xf32> to vector<28x416xf32>
    %cst_7 = arith.constant dense<0.000000e+00> : vector<26x416xf32>
    %9 = tpu.matmul %6, %8, %cst_7 {dimension_numbers = #tpu.dot_dimension_numbers<[1], [0], [0], [1], [0, 0, 1, 1], [], []>} : vector<26x28xf32>, vector<28x416xf32>, vector<26x416xf32> -> vector<26x416xf32>
    %10 = arith.addf %5, %9 : vector<26x416xf32>
    %11 = vector.extract_strided_slice %1 {offsets = [2, 0], sizes = [26, 28], strides = [1, 1]} : vector<28x28xf32> to vector<26x28xf32>
    %c2 = arith.constant 2 : index
    %c0_8 = arith.constant 0 : index
    %c0_9 = arith.constant 0 : index
    %12 = vector.load %arg2[%c2, %c0_8, %c0_9] : memref<3x28x416xf32, #tpu.memory_space<vmem>>, vector<1x28x416xf32>
    %13 = vector.shape_cast %12 : vector<1x28x416xf32> to vector<28x416xf32>
    %cst_10 = arith.constant dense<0.000000e+00> : vector<26x416xf32>
    %14 = tpu.matmul %11, %13, %cst_10 {dimension_numbers = #tpu.dot_dimension_numbers<[1], [0], [0], [1], [0, 0, 1, 1], [], []>} : vector<26x28xf32>, vector<28x416xf32>, vector<26x416xf32> -> vector<26x416xf32>
    %15 = arith.addf %10, %14 : vector<26x416xf32>
    %c0_11 = arith.constant 0 : index
    %c0_12 = arith.constant 0 : index
    %16 = vector.load %arg3[%c0_11, %c0_12] : memref<1x416xf32, #tpu.memory_space<vmem>>, vector<1x416xf32>
    %17 = vector.broadcast %16 : vector<1x416xf32> to vector<26x416xf32>
    %18 = arith.addf %15, %17 : vector<26x416xf32>
    %cst_13 = arith.constant 0.000000e+00 : f32
    %19 = vector.broadcast %cst_13 : f32 to vector<26x416xf32>
    %20 = arith.maximumf %18, %19 : vector<26x416xf32>
    %c0_14 = arith.constant 0 : index
    %c0_15 = arith.constant 0 : index
    %21 = vector.load %arg4[%c0_14, %c0_15] : memref<416x208xf32, #tpu.memory_space<vmem>>, vector<416x208xf32>
    %cst_16 = arith.constant dense<0.000000e+00> : vector<26x208xf32>
    %22 = tpu.matmul %20, %21, %cst_16 {dimension_numbers = #tpu.dot_dimension_numbers<[1], [0], [0], [1], [0, 0, 1, 1], [], []>} : vector<26x416xf32>, vector<416x208xf32>, vector<26x208xf32> -> vector<26x208xf32>
    %23 = vector.extract_strided_slice %22 {offsets = [0, 0], sizes = [24, 208], strides = [1, 1]} : vector<26x208xf32> to vector<24x208xf32>
    %c0_17 = arith.constant 0 : index
    %c0_18 = arith.constant 0 : index
    %c0_19 = arith.constant 0 : index
    %24 = vector.load %arg5[%c0_17, %c0_18, %c0_19] : memref<3x208x192xf32, #tpu.memory_space<vmem>>, vector<1x208x192xf32>
    %25 = vector.shape_cast %24 : vector<1x208x192xf32> to vector<208x192xf32>
    %cst_20 = arith.constant dense<0.000000e+00> : vector<24x192xf32>
    %26 = tpu.matmul %23, %25, %cst_20 {dimension_numbers = #tpu.dot_dimension_numbers<[1], [0], [0], [1], [0, 0, 1, 1], [], []>} : vector<24x208xf32>, vector<208x192xf32>, vector<24x192xf32> -> vector<24x192xf32>
    %27 = vector.extract_strided_slice %22 {offsets = [1, 0], sizes = [24, 208], strides = [1, 1]} : vector<26x208xf32> to vector<24x208xf32>
    %c1_21 = arith.constant 1 : index
    %c0_22 = arith.constant 0 : index
    %c0_23 = arith.constant 0 : index
    %28 = vector.load %arg5[%c1_21, %c0_22, %c0_23] : memref<3x208x192xf32, #tpu.memory_space<vmem>>, vector<1x208x192xf32>
    %29 = vector.shape_cast %28 : vector<1x208x192xf32> to vector<208x192xf32>
    %cst_24 = arith.constant dense<0.000000e+00> : vector<24x192xf32>
    %30 = tpu.matmul %27, %29, %cst_24 {dimension_numbers = #tpu.dot_dimension_numbers<[1], [0], [0], [1], [0, 0, 1, 1], [], []>} : vector<24x208xf32>, vector<208x192xf32>, vector<24x192xf32> -> vector<24x192xf32>
    %31 = arith.addf %26, %30 : vector<24x192xf32>
    %32 = vector.extract_strided_slice %22 {offsets = [2, 0], sizes = [24, 208], strides = [1, 1]} : vector<26x208xf32> to vector<24x208xf32>
    %c2_25 = arith.constant 2 : index
    %c0_26 = arith.constant 0 : index
    %c0_27 = arith.constant 0 : index
    %33 = vector.load %arg5[%c2_25, %c0_26, %c0_27] : memref<3x208x192xf32, #tpu.memory_space<vmem>>, vector<1x208x192xf32>
    %34 = vector.shape_cast %33 : vector<1x208x192xf32> to vector<208x192xf32>
    %cst_28 = arith.constant dense<0.000000e+00> : vector<24x192xf32>
    %35 = tpu.matmul %32, %34, %cst_28 {dimension_numbers = #tpu.dot_dimension_numbers<[1], [0], [0], [1], [0, 0, 1, 1], [], []>} : vector<24x208xf32>, vector<208x192xf32>, vector<24x192xf32> -> vector<24x192xf32>
    %36 = arith.addf %31, %35 : vector<24x192xf32>
    %c0_29 = arith.constant 0 : index
    %c0_30 = arith.constant 0 : index
    %37 = vector.load %arg6[%c0_29, %c0_30] : memref<1x192xf32, #tpu.memory_space<vmem>>, vector<1x192xf32>
    %38 = vector.broadcast %37 : vector<1x192xf32> to vector<24x192xf32>
    %39 = arith.addf %36, %38 : vector<24x192xf32>
    %cst_31 = arith.constant 0.000000e+00 : f32
    %40 = vector.broadcast %cst_31 : f32 to vector<24x192xf32>
    %41 = arith.maximumf %39, %40 : vector<24x192xf32>
    %cst_32 = arith.constant 0.000000e+00 : f32
    %42 = vector.broadcast %cst_32 : f32 to vector<1x192xf32>
    %c0_33 = arith.constant 0 : index
    %c0_34 = arith.constant 0 : index
    %43 = vector.load %arg21[%c0_33, %c0_34] : memref<26x192xf32, #tpu.memory_space<vmem>>, vector<1x192xf32>
    tpu.vector_store %arg21[%c0_33, %c0_34], %42 {strides = array<i32>} : memref<26x192xf32, #tpu.memory_space<vmem>>, vector<1x192xf32>,
    %cst_35 = arith.constant 0.000000e+00 : f32
    %44 = vector.broadcast %cst_35 : f32 to vector<1x192xf32>
    %c25 = arith.constant 25 : index
    %c0_36 = arith.constant 0 : index
    %45 = vector.load %arg21[%c25, %c0_36] : memref<26x192xf32, #tpu.memory_space<vmem>>, vector<1x192xf32>
    tpu.vector_store %arg21[%c25, %c0_36], %44 {strides = array<i32>} : memref<26x192xf32, #tpu.memory_space<vmem>>, vector<1x192xf32>,
    %c1_37 = arith.constant 1 : index
    %c0_38 = arith.constant 0 : index
    %46 = vector.load %arg21[%c1_37, %c0_38] : memref<26x192xf32, #tpu.memory_space<vmem>>, vector<24x192xf32>
    tpu.vector_store %arg21[%c1_37, %c0_38], %41 {strides = array<i32>} : memref<26x192xf32, #tpu.memory_space<vmem>>, vector<24x192xf32>,
    %c0_39 = arith.constant 0 : index
    %c0_40 = arith.constant 0 : index
    %47 = vector.load %arg21[%c0_39, %c0_40] : memref<26x192xf32, #tpu.memory_space<vmem>>, vector<26x192xf32>
    %48 = vector.extract_strided_slice %47 {offsets = [0, 0], sizes = [24, 192], strides = [1, 1]} : vector<26x192xf32> to vector<24x192xf32>
    %c0_41 = arith.constant 0 : index
    %c0_42 = arith.constant 0 : index
    %c0_43 = arith.constant 0 : index
    %49 = vector.load %arg7[%c0_41, %c0_42, %c0_43] : memref<3x192x512xf32, #tpu.memory_space<vmem>>, vector<1x192x512xf32>
    %50 = vector.shape_cast %49 : vector<1x192x512xf32> to vector<192x512xf32>
    %cst_44 = arith.constant dense<0.000000e+00> : vector<24x512xf32>
    %51 = tpu.matmul %48, %50, %cst_44 {dimension_numbers = #tpu.dot_dimension_numbers<[1], [0], [0], [1], [0, 0, 1, 1], [], []>} : vector<24x192xf32>, vector<192x512xf32>, vector<24x512xf32> -> vector<24x512xf32>
    %52 = vector.extract_strided_slice %47 {offsets = [1, 0], sizes = [24, 192], strides = [1, 1]} : vector<26x192xf32> to vector<24x192xf32>
    %c1_45 = arith.constant 1 : index
    %c0_46 = arith.constant 0 : index
    %c0_47 = arith.constant 0 : index
    %53 = vector.load %arg7[%c1_45, %c0_46, %c0_47] : memref<3x192x512xf32, #tpu.memory_space<vmem>>, vector<1x192x512xf32>
    %54 = vector.shape_cast %53 : vector<1x192x512xf32> to vector<192x512xf32>
    %cst_48 = arith.constant dense<0.000000e+00> : vector<24x512xf32>
    %55 = tpu.matmul %52, %54, %cst_48 {dimension_numbers = #tpu.dot_dimension_numbers<[1], [0], [0], [1], [0, 0, 1, 1], [], []>} : vector<24x192xf32>, vector<192x512xf32>, vector<24x512xf32> -> vector<24x512xf32>
    %56 = arith.addf %51, %55 : vector<24x512xf32>
    %57 = vector.extract_strided_slice %47 {offsets = [2, 0], sizes = [24, 192], strides = [1, 1]} : vector<26x192xf32> to vector<24x192xf32>
    %c2_49 = arith.constant 2 : index
    %c0_50 = arith.constant 0 : index
    %c0_51 = arith.constant 0 : index
    %58 = vector.load %arg7[%c2_49, %c0_50, %c0_51] : memref<3x192x512xf32, #tpu.memory_space<vmem>>, vector<1x192x512xf32>
    %59 = vector.shape_cast %58 : vector<1x192x512xf32> to vector<192x512xf32>
    %cst_52 = arith.constant dense<0.000000e+00> : vector<24x512xf32>
    %60 = tpu.matmul %57, %59, %cst_52 {dimension_numbers = #tpu.dot_dimension_numbers<[1], [0], [0], [1], [0, 0, 1, 1], [], []>} : vector<24x192xf32>, vector<192x512xf32>, vector<24x512xf32> -> vector<24x512xf32>
    %61 = arith.addf %56, %60 : vector<24x512xf32>
    %c0_53 = arith.constant 0 : index
    %c0_54 = arith.constant 0 : index
    %62 = vector.load %arg8[%c0_53, %c0_54] : memref<1x512xf32, #tpu.memory_space<vmem>>, vector<1x512xf32>
    %63 = vector.broadcast %62 : vector<1x512xf32> to vector<24x512xf32>
    %64 = arith.addf %61, %63 : vector<24x512xf32>
    %cst_55 = arith.constant 0.000000e+00 : f32
    %65 = vector.broadcast %cst_55 : f32 to vector<24x512xf32>
    %66 = arith.maximumf %64, %65 : vector<24x512xf32>
    %67 = vector.extract_strided_slice %66 {offsets = [0, 0], sizes = [23, 512], strides = [1, 1]} : vector<24x512xf32> to vector<23x512xf32>
    %68 = vector.extract_strided_slice %66 {offsets = [1, 0], sizes = [23, 512], strides = [1, 1]} : vector<24x512xf32> to vector<23x512xf32>
    %69 = arith.maximumf %67, %68 : vector<23x512xf32>
    %70 = tpu.iota {dimensions = array<i32: 0>} : vector<12x23xi32>
    %71 = tpu.iota {dimensions = array<i32: 1>} : vector<12x23xi32>
    %c2_i32 = arith.constant 2 : i32
    %72 = vector.broadcast %c2_i32 : i32 to vector<12x23xi32>
    %73 = arith.muli %72, %70 : vector<12x23xi32>
    %74 = arith.cmpi eq, %71, %73 : vector<12x23xi32>
    %75 = arith.extui %74 : vector<12x23xi1> to vector<12x23xi32>
    %76 = arith.sitofp %75 : vector<12x23xi32> to vector<12x23xf32>
    %cst_56 = arith.constant dense<0.000000e+00> : vector<12x512xf32>
    %77 = tpu.matmul %76, %69, %cst_56 {dimension_numbers = #tpu.dot_dimension_numbers<[1], [0], [0], [1], [0, 0, 1, 1], [], []>} : vector<12x23xf32>, vector<23x512xf32>, vector<12x512xf32> -> vector<12x512xf32>
    %78 = vector.extract_strided_slice %77 {offsets = [0, 0], sizes = [12, 256], strides = [1, 1]} : vector<12x512xf32> to vector<12x256xf32>
    %79 = vector.extract_strided_slice %77 {offsets = [0, 256], sizes = [12, 256], strides = [1, 1]} : vector<12x512xf32> to vector<12x256xf32>
    %80 = arith.maximumf %78, %79 : vector<12x256xf32>
    %c0_57 = arith.constant 0 : index
    %c0_58 = arith.constant 0 : index
    %81 = vector.load %arg9[%c0_57, %c0_58] : memref<256x96xf32, #tpu.memory_space<vmem>>, vector<256x96xf32>
    %cst_59 = arith.constant dense<0.000000e+00> : vector<12x96xf32>
    %82 = tpu.matmul %80, %81, %cst_59 {dimension_numbers = #tpu.dot_dimension_numbers<[1], [0], [0], [1], [0, 0, 1, 1], [], []>} : vector<12x256xf32>, vector<256x96xf32>, vector<12x96xf32> -> vector<12x96xf32>
    %83 = vector.extract_strided_slice %82 {offsets = [0, 0], sizes = [10, 96], strides = [1, 1]} : vector<12x96xf32> to vector<10x96xf32>
    %c0_60 = arith.constant 0 : index
    %c0_61 = arith.constant 0 : index
    %c0_62 = arith.constant 0 : index
    %84 = vector.load %arg10[%c0_60, %c0_61, %c0_62] : memref<3x96x80xf32, #tpu.memory_space<vmem>>, vector<1x96x80xf32>
    %85 = vector.shape_cast %84 : vector<1x96x80xf32> to vector<96x80xf32>
    %cst_63 = arith.constant dense<0.000000e+00> : vector<10x80xf32>
    %86 = tpu.matmul %83, %85, %cst_63 {dimension_numbers = #tpu.dot_dimension_numbers<[1], [0], [0], [1], [0, 0, 1, 1], [], []>} : vector<10x96xf32>, vector<96x80xf32>, vector<10x80xf32> -> vector<10x80xf32>
    %87 = vector.extract_strided_slice %82 {offsets = [1, 0], sizes = [10, 96], strides = [1, 1]} : vector<12x96xf32> to vector<10x96xf32>
    %c1_64 = arith.constant 1 : index
    %c0_65 = arith.constant 0 : index
    %c0_66 = arith.constant 0 : index
    %88 = vector.load %arg10[%c1_64, %c0_65, %c0_66] : memref<3x96x80xf32, #tpu.memory_space<vmem>>, vector<1x96x80xf32>
    %89 = vector.shape_cast %88 : vector<1x96x80xf32> to vector<96x80xf32>
    %cst_67 = arith.constant dense<0.000000e+00> : vector<10x80xf32>
    %90 = tpu.matmul %87, %89, %cst_67 {dimension_numbers = #tpu.dot_dimension_numbers<[1], [0], [0], [1], [0, 0, 1, 1], [], []>} : vector<10x96xf32>, vector<96x80xf32>, vector<10x80xf32> -> vector<10x80xf32>
    %91 = arith.addf %86, %90 : vector<10x80xf32>
    %92 = vector.extract_strided_slice %82 {offsets = [2, 0], sizes = [10, 96], strides = [1, 1]} : vector<12x96xf32> to vector<10x96xf32>
    %c2_68 = arith.constant 2 : index
    %c0_69 = arith.constant 0 : index
    %c0_70 = arith.constant 0 : index
    %93 = vector.load %arg10[%c2_68, %c0_69, %c0_70] : memref<3x96x80xf32, #tpu.memory_space<vmem>>, vector<1x96x80xf32>
    %94 = vector.shape_cast %93 : vector<1x96x80xf32> to vector<96x80xf32>
    %cst_71 = arith.constant dense<0.000000e+00> : vector<10x80xf32>
    %95 = tpu.matmul %92, %94, %cst_71 {dimension_numbers = #tpu.dot_dimension_numbers<[1], [0], [0], [1], [0, 0, 1, 1], [], []>} : vector<10x96xf32>, vector<96x80xf32>, vector<10x80xf32> -> vector<10x80xf32>
    %96 = arith.addf %91, %95 : vector<10x80xf32>
    %c0_72 = arith.constant 0 : index
    %c0_73 = arith.constant 0 : index
    %97 = vector.load %arg11[%c0_72, %c0_73] : memref<1x80xf32, #tpu.memory_space<vmem>>, vector<1x80xf32>
    %98 = vector.broadcast %97 : vector<1x80xf32> to vector<10x80xf32>
    %99 = arith.addf %96, %98 : vector<10x80xf32>
    %cst_74 = arith.constant 0.000000e+00 : f32
    %100 = vector.broadcast %cst_74 : f32 to vector<10x80xf32>
    %101 = arith.maximumf %99, %100 : vector<10x80xf32>
    %cst_75 = arith.constant 0.000000e+00 : f32
    %102 = vector.broadcast %cst_75 : f32 to vector<1x80xf32>
    %c0_76 = arith.constant 0 : index
    %c0_77 = arith.constant 0 : index
    %103 = vector.load %arg22[%c0_76, %c0_77] : memref<12x80xf32, #tpu.memory_space<vmem>>, vector<1x80xf32>
    tpu.vector_store %arg22[%c0_76, %c0_77], %102 {strides = array<i32>} : memref<12x80xf32, #tpu.memory_space<vmem>>, vector<1x80xf32>,
    %cst_78 = arith.constant 0.000000e+00 : f32
    %104 = vector.broadcast %cst_78 : f32 to vector<1x80xf32>
    %c11 = arith.constant 11 : index
    %c0_79 = arith.constant 0 : index
    %105 = vector.load %arg22[%c11, %c0_79] : memref<12x80xf32, #tpu.memory_space<vmem>>, vector<1x80xf32>
    tpu.vector_store %arg22[%c11, %c0_79], %104 {strides = array<i32>} : memref<12x80xf32, #tpu.memory_space<vmem>>, vector<1x80xf32>,
    %c1_80 = arith.constant 1 : index
    %c0_81 = arith.constant 0 : index
    %106 = vector.load %arg22[%c1_80, %c0_81] : memref<12x80xf32, #tpu.memory_space<vmem>>, vector<10x80xf32>
    tpu.vector_store %arg22[%c1_80, %c0_81], %101 {strides = array<i32>} : memref<12x80xf32, #tpu.memory_space<vmem>>, vector<10x80xf32>,
    %c0_82 = arith.constant 0 : index
    %c0_83 = arith.constant 0 : index
    %107 = vector.load %arg22[%c0_82, %c0_83] : memref<12x80xf32, #tpu.memory_space<vmem>>, vector<12x80xf32>
    %108 = vector.extract_strided_slice %107 {offsets = [0, 0], sizes = [10, 80], strides = [1, 1]} : vector<12x80xf32> to vector<10x80xf32>
    %c0_84 = arith.constant 0 : index
    %c0_85 = arith.constant 0 : index
    %c0_86 = arith.constant 0 : index
    %109 = vector.load %arg12[%c0_84, %c0_85, %c0_86] : memref<3x80x140xf32, #tpu.memory_space<vmem>>, vector<1x80x140xf32>
    %110 = vector.shape_cast %109 : vector<1x80x140xf32> to vector<80x140xf32>
    %cst_87 = arith.constant dense<0.000000e+00> : vector<10x140xf32>
    %111 = tpu.matmul %108, %110, %cst_87 {dimension_numbers = #tpu.dot_dimension_numbers<[1], [0], [0], [1], [0, 0, 1, 1], [], []>} : vector<10x80xf32>, vector<80x140xf32>, vector<10x140xf32> -> vector<10x140xf32>
    %112 = vector.extract_strided_slice %107 {offsets = [1, 0], sizes = [10, 80], strides = [1, 1]} : vector<12x80xf32> to vector<10x80xf32>
    %c1_88 = arith.constant 1 : index
    %c0_89 = arith.constant 0 : index
    %c0_90 = arith.constant 0 : index
    %113 = vector.load %arg12[%c1_88, %c0_89, %c0_90] : memref<3x80x140xf32, #tpu.memory_space<vmem>>, vector<1x80x140xf32>
    %114 = vector.shape_cast %113 : vector<1x80x140xf32> to vector<80x140xf32>
    %cst_91 = arith.constant dense<0.000000e+00> : vector<10x140xf32>
    %115 = tpu.matmul %112, %114, %cst_91 {dimension_numbers = #tpu.dot_dimension_numbers<[1], [0], [0], [1], [0, 0, 1, 1], [], []>} : vector<10x80xf32>, vector<80x140xf32>, vector<10x140xf32> -> vector<10x140xf32>
    %116 = arith.addf %111, %115 : vector<10x140xf32>
    %117 = vector.extract_strided_slice %107 {offsets = [2, 0], sizes = [10, 80], strides = [1, 1]} : vector<12x80xf32> to vector<10x80xf32>
    %c2_92 = arith.constant 2 : index
    %c0_93 = arith.constant 0 : index
    %c0_94 = arith.constant 0 : index
    %118 = vector.load %arg12[%c2_92, %c0_93, %c0_94] : memref<3x80x140xf32, #tpu.memory_space<vmem>>, vector<1x80x140xf32>
    %119 = vector.shape_cast %118 : vector<1x80x140xf32> to vector<80x140xf32>
    %cst_95 = arith.constant dense<0.000000e+00> : vector<10x140xf32>
    %120 = tpu.matmul %117, %119, %cst_95 {dimension_numbers = #tpu.dot_dimension_numbers<[1], [0], [0], [1], [0, 0, 1, 1], [], []>} : vector<10x80xf32>, vector<80x140xf32>, vector<10x140xf32> -> vector<10x140xf32>
    %121 = arith.addf %116, %120 : vector<10x140xf32>
    %c0_96 = arith.constant 0 : index
    %c0_97 = arith.constant 0 : index
    %122 = vector.load %arg13[%c0_96, %c0_97] : memref<1x140xf32, #tpu.memory_space<vmem>>, vector<1x140xf32>
    %123 = vector.broadcast %122 : vector<1x140xf32> to vector<10x140xf32>
    %124 = arith.addf %121, %123 : vector<10x140xf32>
    %cst_98 = arith.constant 0.000000e+00 : f32
    %125 = vector.broadcast %cst_98 : f32 to vector<10x140xf32>
    %126 = arith.maximumf %124, %125 : vector<10x140xf32>
    %c0_99 = arith.constant 0 : index
    %c0_100 = arith.constant 0 : index
    %127 = vector.load %arg14[%c0_99, %c0_100] : memref<140x80xf32, #tpu.memory_space<vmem>>, vector<140x80xf32>
    %cst_101 = arith.constant dense<0.000000e+00> : vector<10x80xf32>
    %128 = tpu.matmul %126, %127, %cst_101 {dimension_numbers = #tpu.dot_dimension_numbers<[1], [0], [0], [1], [0, 0, 1, 1], [], []>} : vector<10x140xf32>, vector<140x80xf32>, vector<10x80xf32> -> vector<10x80xf32>
    %129 = vector.extract_strided_slice %128 {offsets = [0, 0], sizes = [8, 80], strides = [1, 1]} : vector<10x80xf32> to vector<8x80xf32>
    %c0_102 = arith.constant 0 : index
    %c0_103 = arith.constant 0 : index
    %c0_104 = arith.constant 0 : index
    %130 = vector.load %arg15[%c0_102, %c0_103, %c0_104] : memref<3x80x128xf32, #tpu.memory_space<vmem>>, vector<1x80x128xf32>
    %131 = vector.shape_cast %130 : vector<1x80x128xf32> to vector<80x128xf32>
    %cst_105 = arith.constant dense<0.000000e+00> : vector<8x128xf32>
    %132 = tpu.matmul %129, %131, %cst_105 {dimension_numbers = #tpu.dot_dimension_numbers<[1], [0], [0], [1], [0, 0, 1, 1], [], []>} : vector<8x80xf32>, vector<80x128xf32>, vector<8x128xf32> -> vector<8x128xf32>
    %133 = vector.extract_strided_slice %128 {offsets = [1, 0], sizes = [8, 80], strides = [1, 1]} : vector<10x80xf32> to vector<8x80xf32>
    %c1_106 = arith.constant 1 : index
    %c0_107 = arith.constant 0 : index
    %c0_108 = arith.constant 0 : index
    %134 = vector.load %arg15[%c1_106, %c0_107, %c0_108] : memref<3x80x128xf32, #tpu.memory_space<vmem>>, vector<1x80x128xf32>
    %135 = vector.shape_cast %134 : vector<1x80x128xf32> to vector<80x128xf32>
    %cst_109 = arith.constant dense<0.000000e+00> : vector<8x128xf32>
    %136 = tpu.matmul %133, %135, %cst_109 {dimension_numbers = #tpu.dot_dimension_numbers<[1], [0], [0], [1], [0, 0, 1, 1], [], []>} : vector<8x80xf32>, vector<80x128xf32>, vector<8x128xf32> -> vector<8x128xf32>
    %137 = arith.addf %132, %136 : vector<8x128xf32>
    %138 = vector.extract_strided_slice %128 {offsets = [2, 0], sizes = [8, 80], strides = [1, 1]} : vector<10x80xf32> to vector<8x80xf32>
    %c2_110 = arith.constant 2 : index
    %c0_111 = arith.constant 0 : index
    %c0_112 = arith.constant 0 : index
    %139 = vector.load %arg15[%c2_110, %c0_111, %c0_112] : memref<3x80x128xf32, #tpu.memory_space<vmem>>, vector<1x80x128xf32>
    %140 = vector.shape_cast %139 : vector<1x80x128xf32> to vector<80x128xf32>
    %cst_113 = arith.constant dense<0.000000e+00> : vector<8x128xf32>
    %141 = tpu.matmul %138, %140, %cst_113 {dimension_numbers = #tpu.dot_dimension_numbers<[1], [0], [0], [1], [0, 0, 1, 1], [], []>} : vector<8x80xf32>, vector<80x128xf32>, vector<8x128xf32> -> vector<8x128xf32>
    %142 = arith.addf %137, %141 : vector<8x128xf32>
    %c0_114 = arith.constant 0 : index
    %c0_115 = arith.constant 0 : index
    %143 = vector.load %arg16[%c0_114, %c0_115] : memref<1x128xf32, #tpu.memory_space<vmem>>, vector<1x128xf32>
    %144 = vector.broadcast %143 : vector<1x128xf32> to vector<8x128xf32>
    %145 = arith.addf %142, %144 : vector<8x128xf32>
    %cst_116 = arith.constant 0.000000e+00 : f32
    %146 = vector.broadcast %cst_116 : f32 to vector<8x128xf32>
    %147 = arith.maximumf %145, %146 : vector<8x128xf32>
    %148 = vector.extract_strided_slice %147 {offsets = [0, 0], sizes = [6, 128], strides = [1, 1]} : vector<8x128xf32> to vector<6x128xf32>
    %c0_117 = arith.constant 0 : index
    %c0_118 = arith.constant 0 : index
    %c0_119 = arith.constant 0 : index
    %149 = vector.load %arg17[%c0_117, %c0_118, %c0_119] : memref<3x128x108xf32, #tpu.memory_space<vmem>>, vector<1x128x108xf32>
    %150 = vector.shape_cast %149 : vector<1x128x108xf32> to vector<128x108xf32>
    %cst_120 = arith.constant dense<0.000000e+00> : vector<6x108xf32>
    %151 = tpu.matmul %148, %150, %cst_120 {dimension_numbers = #tpu.dot_dimension_numbers<[1], [0], [0], [1], [0, 0, 1, 1], [], []>} : vector<6x128xf32>, vector<128x108xf32>, vector<6x108xf32> -> vector<6x108xf32>
    %152 = vector.extract_strided_slice %147 {offsets = [1, 0], sizes = [6, 128], strides = [1, 1]} : vector<8x128xf32> to vector<6x128xf32>
    %c1_121 = arith.constant 1 : index
    %c0_122 = arith.constant 0 : index
    %c0_123 = arith.constant 0 : index
    %153 = vector.load %arg17[%c1_121, %c0_122, %c0_123] : memref<3x128x108xf32, #tpu.memory_space<vmem>>, vector<1x128x108xf32>
    %154 = vector.shape_cast %153 : vector<1x128x108xf32> to vector<128x108xf32>
    %cst_124 = arith.constant dense<0.000000e+00> : vector<6x108xf32>
    %155 = tpu.matmul %152, %154, %cst_124 {dimension_numbers = #tpu.dot_dimension_numbers<[1], [0], [0], [1], [0, 0, 1, 1], [], []>} : vector<6x128xf32>, vector<128x108xf32>, vector<6x108xf32> -> vector<6x108xf32>
    %156 = arith.addf %151, %155 : vector<6x108xf32>
    %157 = vector.extract_strided_slice %147 {offsets = [2, 0], sizes = [6, 128], strides = [1, 1]} : vector<8x128xf32> to vector<6x128xf32>
    %c2_125 = arith.constant 2 : index
    %c0_126 = arith.constant 0 : index
    %c0_127 = arith.constant 0 : index
    %158 = vector.load %arg17[%c2_125, %c0_126, %c0_127] : memref<3x128x108xf32, #tpu.memory_space<vmem>>, vector<1x128x108xf32>
    %159 = vector.shape_cast %158 : vector<1x128x108xf32> to vector<128x108xf32>
    %cst_128 = arith.constant dense<0.000000e+00> : vector<6x108xf32>
    %160 = tpu.matmul %157, %159, %cst_128 {dimension_numbers = #tpu.dot_dimension_numbers<[1], [0], [0], [1], [0, 0, 1, 1], [], []>} : vector<6x128xf32>, vector<128x108xf32>, vector<6x108xf32> -> vector<6x108xf32>
    %161 = arith.addf %156, %160 : vector<6x108xf32>
    %c0_129 = arith.constant 0 : index
    %c0_130 = arith.constant 0 : index
    %162 = vector.load %arg18[%c0_129, %c0_130] : memref<1x108xf32, #tpu.memory_space<vmem>>, vector<1x108xf32>
    %163 = vector.broadcast %162 : vector<1x108xf32> to vector<6x108xf32>
    %164 = arith.addf %161, %163 : vector<6x108xf32>
    %cst_131 = arith.constant 0.000000e+00 : f32
    %165 = vector.broadcast %cst_131 : f32 to vector<6x108xf32>
    %166 = arith.maximumf %164, %165 : vector<6x108xf32>
    %cst_132 = arith.constant dense<0.000000e+00> : vector<108xf32>
    %167 = vector.multi_reduction <add>, %166, %cst_132 [0] : vector<6x108xf32> to vector<108xf32>
    %168 = vector.shape_cast %167 : vector<108xf32> to vector<1x108xf32>
    %c0_133 = arith.constant 0 : index
    %c0_134 = arith.constant 0 : index
    %169 = vector.load %arg19[%c0_133, %c0_134] : memref<108x128xf32, #tpu.memory_space<vmem>>, vector<108x128xf32>
    %cst_135 = arith.constant dense<0.000000e+00> : vector<1x128xf32>
    %170 = tpu.matmul %168, %169, %cst_135 {dimension_numbers = #tpu.dot_dimension_numbers<[1], [0], [0], [1], [0, 0, 1, 1], [], []>} : vector<1x108xf32>, vector<108x128xf32>, vector<1x128xf32> -> vector<1x128xf32>
    %171 = tpu.iota {dimensions = array<i32: 1>} : vector<1x128xi32>
    %c10_i32 = arith.constant 10 : i32
    %172 = vector.broadcast %c10_i32 : i32 to vector<1x128xi32>
    %173 = arith.cmpi slt, %171, %172 : vector<1x128xi32>
    %cst_136 = arith.constant -1.000000e+30 : f32
    %174 = vector.broadcast %cst_136 : f32 to vector<1x128xf32>
    %175 = arith.select %173, %170, %174 : vector<1x128xi1>, vector<1x128xf32>
    %cst_137 = arith.constant dense<0xFF800000> : vector<1xf32>
    %176 = vector.multi_reduction <maximumf>, %175, %cst_137 [1] : vector<1x128xf32> to vector<1xf32>
    %177 = vector.shape_cast %176 : vector<1xf32> to vector<1x1xf32>
    %178 = vector.broadcast %177 : vector<1x1xf32> to vector<1x128xf32>
    %179 = arith.subf %175, %178 : vector<1x128xf32>
    %180 = math.exp %179 : vector<1x128xf32>
    %cst_138 = arith.constant 0.000000e+00 : f32
    %181 = vector.broadcast %cst_138 : f32 to vector<1x128xf32>
    %182 = arith.select %173, %180, %181 : vector<1x128xi1>, vector<1x128xf32>
    %cst_139 = arith.constant dense<0.000000e+00> : vector<1xf32>
    %183 = vector.multi_reduction <add>, %182, %cst_139 [1] : vector<1x128xf32> to vector<1xf32>
    %184 = vector.shape_cast %183 : vector<1xf32> to vector<1x1xf32>
    %185 = math.log %184 : vector<1x1xf32>
    %186 = vector.broadcast %185 : vector<1x1xf32> to vector<1x128xf32>
    %187 = arith.subf %179, %186 : vector<1x128xf32>
    %188 = vector.shape_cast %187 : vector<1x128xf32> to vector<1x128xf32>
    %189 = vector.broadcast %188 : vector<1x128xf32> to vector<8x128xf32>
    %c0_140 = arith.constant 0 : index
    %c0_141 = arith.constant 0 : index
    %c0_142 = arith.constant 0 : index
    %190 = vector.load %arg20[%c0_140, %c0_141, %c0_142] : memref<1x8x128xf32, #tpu.memory_space<vmem>>, vector<1x8x128xf32>
    %191 = vector.shape_cast %190 : vector<1x8x128xf32> to vector<8x128xf32>
    %192 = vector.shape_cast %189 : vector<8x128xf32> to vector<1x8x128xf32>
    tpu.vector_store %arg20[%c0_140, %c0_141, %c0_142], %192 {strides = array<i32>} : memref<1x8x128xf32, #tpu.memory_space<vmem>>, vector<1x8x128xf32>,
    return
  }
  func.func @transform_0(%arg0: i32) -> (i32, i32, i32) {
    %c0_i32 = arith.constant 0 : i32
    %c0_i32_0 = arith.constant 0 : i32
    %c0_i32_1 = arith.constant 0 : i32
    return %arg0, %c0_i32, %c0_i32_0 : i32, i32, i32
  }
  func.func @transform_1(%arg0: i32) -> (i32, i32, i32) {
    %c0_i32 = arith.constant 0 : i32
    %c0_i32_0 = arith.constant 0 : i32
    %c0_i32_1 = arith.constant 0 : i32
    %c0_i32_2 = arith.constant 0 : i32
    return %c0_i32, %c0_i32_0, %c0_i32_1 : i32, i32, i32
  }
  func.func @transform_2(%arg0: i32) -> (i32, i32) {
    %c0_i32 = arith.constant 0 : i32
    %c0_i32_0 = arith.constant 0 : i32
    %c0_i32_1 = arith.constant 0 : i32
    return %c0_i32, %c0_i32_0 : i32, i32
  }
  func.func @transform_3(%arg0: i32) -> (i32, i32) {
    %c0_i32 = arith.constant 0 : i32
    %c0_i32_0 = arith.constant 0 : i32
    %c0_i32_1 = arith.constant 0 : i32
    return %c0_i32, %c0_i32_0 : i32, i32
  }
  func.func @transform_4(%arg0: i32) -> (i32, i32, i32) {
    %c0_i32 = arith.constant 0 : i32
    %c0_i32_0 = arith.constant 0 : i32
    %c0_i32_1 = arith.constant 0 : i32
    %c0_i32_2 = arith.constant 0 : i32
    return %c0_i32, %c0_i32_0, %c0_i32_1 : i32, i32, i32
  }
  func.func @transform_5(%arg0: i32) -> (i32, i32) {
    %c0_i32 = arith.constant 0 : i32
    %c0_i32_0 = arith.constant 0 : i32
    %c0_i32_1 = arith.constant 0 : i32
    return %c0_i32, %c0_i32_0 : i32, i32
  }
  func.func @transform_6(%arg0: i32) -> (i32, i32, i32) {
    %c0_i32 = arith.constant 0 : i32
    %c0_i32_0 = arith.constant 0 : i32
    %c0_i32_1 = arith.constant 0 : i32
    %c0_i32_2 = arith.constant 0 : i32
    return %c0_i32, %c0_i32_0, %c0_i32_1 : i32, i32, i32
  }
  func.func @transform_7(%arg0: i32) -> (i32, i32) {
    %c0_i32 = arith.constant 0 : i32
    %c0_i32_0 = arith.constant 0 : i32
    %c0_i32_1 = arith.constant 0 : i32
    return %c0_i32, %c0_i32_0 : i32, i32
  }
  func.func @transform_8(%arg0: i32) -> (i32, i32) {
    %c0_i32 = arith.constant 0 : i32
    %c0_i32_0 = arith.constant 0 : i32
    %c0_i32_1 = arith.constant 0 : i32
    return %c0_i32, %c0_i32_0 : i32, i32
  }
  func.func @transform_9(%arg0: i32) -> (i32, i32, i32) {
    %c0_i32 = arith.constant 0 : i32
    %c0_i32_0 = arith.constant 0 : i32
    %c0_i32_1 = arith.constant 0 : i32
    %c0_i32_2 = arith.constant 0 : i32
    return %c0_i32, %c0_i32_0, %c0_i32_1 : i32, i32, i32
  }
  func.func @transform_10(%arg0: i32) -> (i32, i32) {
    %c0_i32 = arith.constant 0 : i32
    %c0_i32_0 = arith.constant 0 : i32
    %c0_i32_1 = arith.constant 0 : i32
    return %c0_i32, %c0_i32_0 : i32, i32
  }
  func.func @transform_11(%arg0: i32) -> (i32, i32, i32) {
    %c0_i32 = arith.constant 0 : i32
    %c0_i32_0 = arith.constant 0 : i32
    %c0_i32_1 = arith.constant 0 : i32
    %c0_i32_2 = arith.constant 0 : i32
    return %c0_i32, %c0_i32_0, %c0_i32_1 : i32, i32, i32
  }
  func.func @transform_12(%arg0: i32) -> (i32, i32) {
    %c0_i32 = arith.constant 0 : i32
    %c0_i32_0 = arith.constant 0 : i32
    %c0_i32_1 = arith.constant 0 : i32
    return %c0_i32, %c0_i32_0 : i32, i32
  }
  func.func @transform_13(%arg0: i32) -> (i32, i32) {
    %c0_i32 = arith.constant 0 : i32
    %c0_i32_0 = arith.constant 0 : i32
    %c0_i32_1 = arith.constant 0 : i32
    return %c0_i32, %c0_i32_0 : i32, i32
  }
  func.func @transform_14(%arg0: i32) -> (i32, i32, i32) {
    %c0_i32 = arith.constant 0 : i32
    %c0_i32_0 = arith.constant 0 : i32
    %c0_i32_1 = arith.constant 0 : i32
    %c0_i32_2 = arith.constant 0 : i32
    return %c0_i32, %c0_i32_0, %c0_i32_1 : i32, i32, i32
  }
  func.func @transform_15(%arg0: i32) -> (i32, i32) {
    %c0_i32 = arith.constant 0 : i32
    %c0_i32_0 = arith.constant 0 : i32
    %c0_i32_1 = arith.constant 0 : i32
    return %c0_i32, %c0_i32_0 : i32, i32
  }
  func.func @transform_16(%arg0: i32) -> (i32, i32, i32) {
    %c0_i32 = arith.constant 0 : i32
    %c0_i32_0 = arith.constant 0 : i32
    %c0_i32_1 = arith.constant 0 : i32
    %c0_i32_2 = arith.constant 0 : i32
    return %c0_i32, %c0_i32_0, %c0_i32_1 : i32, i32, i32
  }
  func.func @transform_17(%arg0: i32) -> (i32, i32) {
    %c0_i32 = arith.constant 0 : i32
    %c0_i32_0 = arith.constant 0 : i32
    %c0_i32_1 = arith.constant 0 : i32
    return %c0_i32, %c0_i32_0 : i32, i32
  }
  func.func @transform_18(%arg0: i32) -> (i32, i32) {
    %c0_i32 = arith.constant 0 : i32
    %c0_i32_0 = arith.constant 0 : i32
    %c0_i32_1 = arith.constant 0 : i32
    return %c0_i32, %c0_i32_0 : i32, i32
  }
  func.func @transform_19(%arg0: i32) -> (i32, i32, i32) {
    %c0_i32 = arith.constant 0 : i32
    %c0_i32_0 = arith.constant 0 : i32
    %c0_i32_1 = arith.constant 0 : i32
    return %arg0, %c0_i32, %c0_i32_0 : i32, i32, i32
  }
}

</mosaic_0001>

<bundles_post_ra>
// kernel: mnistnet_forward.1
= control target key start
LH: loop header
LB: loop body
LE: loop exit
PB: predicated region body
PF: predicated region fallthrough
CT: control target
= control target key end

     0   :  { %s10166_s0 = inlined_call_operand.vmem [shape: f32[2,28,28], index: 0, kind: input, shape index: {}]   ;;  %s10167_s1 = inlined_call_operand.vmem [shape: f32[3,28,416], index: 1, kind: input, shape index: {}]   ;;  %s10168_s2 = inlined_call_operand.vmem [shape: f32[1,416], index: 2, kind: input, shape index: {}]   ;;  %s10169_s3 = inlined_call_operand.vmem [shape: f32[416,208], index: 3, kind: input, shape index: {}]   ;;  %s10170_s4 = inlined_call_operand.vmem [shape: f32[3,208,192], index: 4, kind: input, shape index: {}]   ;;  %s10171_s5 = inlined_call_operand.vmem [shape: f32[1,192], index: 5, kind: input, shape index: {}]   ;;  %s10172_s6 = inlined_call_operand.vmem [shape: f32[3,192,512], index: 6, kind: input, shape index: {}]   ;;  %s10173_s7 = inlined_call_operand.vmem [shape: f32[1,512], index: 7, kind: input, shape index: {}]   ;;  %s10174_s8 = inlined_call_operand.vmem [shape: f32[256,96], index: 8, kind: input, shape index: {}]   ;;  %s10175_s9 = inlined_call_operand.vmem [shape: f32[3,96,80], index: 9, kind: input, shape index: {}]   ;;  %s10176_s10 = inlined_call_operand.vmem [shape: f32[1,80], index: 10, kind: input, shape index: {}]   ;;  %s10177_s11 = inlined_call_operand.vmem [shape: f32[3,80,140], index: 11, kind: input, shape index: {}]   ;;  %s10178_s12 = inlined_call_operand.vmem [shape: f32[1,140], index: 12, kind: input, shape index: {}]   ;;  %s10179_s13 = inlined_call_operand.vmem [shape: f32[140,80], index: 13, kind: input, shape index: {}]   ;;  %s10180_s14 = inlined_call_operand.vmem [shape: f32[3,80,128], index: 14, kind: input, shape index: {}]   ;;  %s10181_s15 = inlined_call_operand.vmem [shape: f32[1,128], index: 15, kind: input, shape index: {}]   ;;  %s10182_s16 = inlined_call_operand.vmem [shape: f32[3,128,108], index: 16, kind: input, shape index: {}]   ;;  %s10183_s17 = inlined_call_operand.vmem [shape: f32[1,108], index: 17, kind: input, shape index: {}]   ;;  %s10184_s18 = inlined_call_operand.vmem [shape: f32[108,128], index: 18, kind: input, shape index: {}]   ;;  %s10185_s19 = inlined_call_operand.vmem [shape: f32[2,8,128], index: 19, kind: output, shape index: {}]  }
   0x1   :  { %10189 = sst [smem:[#allocation5_spill]] %s10166_s0  ;;  %s7087_s0 = smov 0  }
   0x2   :  { %10190 = sst [smem:[#allocation6_spill]] %s10167_s1 }
   0x3   :  { %10191 = sst [smem:[#allocation7_spill]] %s10168_s2 }
   0x4   :  { %10192 = sst [smem:[#allocation8_spill]] %s10169_s3 }
   0x5 LB: > { %10193 = sst [smem:[#allocation4_spill]] %s6981_s0  ;;  %s4904_s30 = sadd.s32 4294967295, %s6981_s0   ;;  %s6981_s0 = sphi %s7087_s0, %s29_s0  }
   0x6   : > { %p4908_p0 = scmp.ge.s32.totalorder %s6981_s0, 1  ;;  %p537_p1 = scmp.lt.s32.totalorder %s6981_s0, 3 }
   0x8   : > { %p538_p2 = pnand %p4908_p0, %p537_p1 }
   0x9   : > { %s10194_s1 = sld [smem:[#allocation6_spill]] (!%p538_p2)  ;;  %vm659_vm0 = vcmask (!%p538_p2), 1043456   ;;  %v6983_v7 = vmov (!%p538_p2), 0.0   ;;  %p592_p3 = scmp.lt.s32.totalorder (!%p538_p2), %s4904_s30, 1  ;;  %vm6984_vm1 = vmmov (!%p538_p2), 1   ;;  %vm642_vm3 = vcmask (!%p538_p2), 1046528  }
   0xa   : > { %541 = sbr.rel (%p538_p2) target bundleno = 3584 (0xe00), region = 96  ;;  %736 = vmatprep.mubr.f32.mxu0 (!%p538_p2), %v6983_v7  ;;  %825 = vmatprep.mubr.f32.mxu1 (!%p538_p2), %v6983_v7  ;;  %vm7115_vm2 = vmpackc.low (!%p538_p2), %vm659_vm0, %vm6984_vm1  ;;  %s10197_s21 = sld [smem:[#allocation5_spill]] (!%p538_p2)  ;;  %vm650_vm4 = vcmask (!%p538_p2), 228352   ;;  %vm1065_vm5 = vcmask (!%p538_p2), 1045504   ;;  %vm1445_vm6 = vcmask (!%p538_p2), 261120   ;;  %vm1766_vm7 = vcmask (!%p538_p2), 654336  }
   0xb   : > { %s10198_s3 = sld [smem:[#allocation8_spill]] (!%p538_p2)  ;;  %s10199_s26 = sld [smem:[#allocation7_spill]] (!%p538_p2)  ;;  %vm2169_vm9 = vcmask (!%p538_p2), 523265   ;;  %vm2149_vm10 = vcmask (!%p538_p2), 1040384   ;;  %vm2172_vm11 = vcmask (!%p538_p2), 523264   ;;  %vm2177_vm12 = vcmask (!%p538_p2), 516096  }
   0xc   : > { %vm3162_vm14 = vcmask (!%p538_p2), 187392   ;;  %vm3476_vm0 = vcmask (!%p538_p2), 785408   ;;  %vm3743_vm1 = vcmask (!%p538_p2), 647168  }
   0xd   : > { %3744 = vst.msk [vmem:[#allocation3] sm:$0x1] (!%p538_p2), %vm3743_vm1, %v6983_v7  ;;  %3745 = vst.msk [vmem:[#allocation3 + $0xb] sm:$0x1] (!%p538_p2), %vm3743_vm1, %v6983_v7 }
   0xf   : > { %v4913_v0 = vld [vmem:[%s10194_s1 + $0x88] sm:$0xff] (!%p538_p2)  ;;  %v4912_v2 = vld [vmem:[%s10194_s1 + $0x80] sm:$0xff] (!%p538_p2)  ;;  %v4915_v13 = vld [vmem:[%s10194_s1 + $0x98] sm:$0xff] (!%p538_p2) }
  0x10   : > { %v4917_v1 = vld [vmem:[%s10194_s1 + $0xa8] sm:$0xff] (!%p538_p2)  ;;  %v4916_v4 = vld [vmem:[%s10194_s1 + $0xa0] sm:$0xff] (!%p538_p2)  ;;  %v4919_v14 = vld [vmem:[%s10194_s1 + $0xb8] sm:$0xff] (!%p538_p2) }
  0x11   : > { %v5924_v3 = vpack.c.bf16 %v4917_v1, %v4913_v0  ;;  %v4921_v5 = vld [vmem:[%s10194_s1 + $0xc8] sm:$0xff]  ;;  %v5926_v8 = vpack.c.bf16 %v4916_v4, %v4912_v2  ;;  %v4920_v11 = vld [vmem:[%s10194_s1 + $0xc0] sm:$0xff]  ;;  %v4914_v15 = vld [vmem:[%s10194_s1 + $0x90] sm:$0xff]  ;;  %s10202_s30 = smov (!%p592_p3, %s4904_s30), 1  ;;  %v5934_v17 = vpack.c.bf16 %v4919_v14, %v4915_v13 }
  0x12   : > { %v4925_v6 = vld [vmem:[%s10194_s1 + $0xe8] sm:$0xf]  ;;  %v4924_v12 = vld [vmem:[%s10194_s1 + $0xe0] sm:$0xf]  ;;  %v4918_v18 = vld [vmem:[%s10194_s1 + $0xb0] sm:$0xff]  ;;  %s5458_s23 = sshll.u32 %s10202_s30, 5 }
  0x13   : > { %v5928_v9 = vpack.c.bf16 %v4925_v6, %v4921_v5  ;;  %5925 = vmatprep.subr.bf16.mxu0 %v5924_v3  ;;  %v5931_v16 = vpack.c.bf16 %v4924_v12, %v4920_v11  ;;  %v4923_v19 = vld [vmem:[%s10194_s1 + $0xd8] sm:$0xff]  ;;  %v5936_v21 = vpack.c.bf16 %v4918_v18, %v4914_v15  ;;  %v606_v23 = vld [vmem:[%s10194_s1 + $0x8] sm:$0xff]  ;;  %v4922_v25 = vld [vmem:[%s10194_s1 + $0xd0] sm:$0xff]  ;;  %5935 = vmatprep.subr.bf16.mxu1 %v5934_v17  ;;  %s596_s22 = scalar_lea.vmem %s10197_s21, %s5458_s23 }
  0x14   : > { %5927 = vmatpush1.bf16.msra.mxu0 %v5926_v8  ;;  %v4927_v20 = vld [vmem:[%s10194_s1 + $0xf8] sm:$0xf]  ;;  %v610_v24 = vld [vmem:[%s10194_s1 + $0x28] sm:$0xff]  ;;  %v4926_v27 = vld [vmem:[%s10194_s1 + $0xf0] sm:$0xf] }
  0x15   : > { %5930 = vmatprep.subr.msk.bf16.mxu0 %vm7115_vm2, %v5928_v9  ;;  %v5938_v22 = vpack.c.bf16 %v4927_v20, %v4923_v19  ;;  %v5944_v26 = vpack.c.bf16 %v610_v24, %v606_v23  ;;  %v605_v28 = vld [vmem:[%s10194_s1] sm:$0xff]  ;;  %5937 = vmatpush1.bf16.msra.mxu1 %v5936_v21  ;;  %v7171_v31 = vld [vmem:[%s596_s22 + $0x8] sm:$0xff]  ;;  %v5941_v32 = vpack.c.bf16 %v4926_v27, %v4922_v25  ;;  %v7173_v33 = vld [vmem:[%s596_s22 + $0x10] sm:$0xff] }
  0x16   : > { %v609_v29 = vld [vmem:[%s10194_s1 + $0x20] sm:$0xff]  ;;  %v644_v35 = vrot.slane %v7171_v31, 1  ;;  %v646_v37 = vrot.slane %v7173_v33, 1  ;;  %v7182_v38 = vld [vmem:[%s596_s22 + $0x18] sm:$0xf]  ;;  %v614_v39 = vld [vmem:[%s10194_s1 + $0x48] sm:$0xff] }
  0x17   : > { %v7169_v30 = vld [vmem:[%s596_s22] sm:$0xff]  ;;  %5940 = vmatprep.subr.msk.bf16.mxu1 %vm7115_vm2, %v5938_v22  ;;  %v5946_v36 = vpack.c.bf16 %v609_v29, %v605_v28  ;;  %v618_v40 = vld [vmem:[%s10194_s1 + $0x68] sm:$0xf]  ;;  %v608_v45 = vld [vmem:[%s10194_s1 + $0x18] sm:$0xff]  ;;  %v648_v53 = vrot.slane %v7182_v38, 1  ;;  %v1067_v27 = vrot.slane %v7171_v31, 2 }
  0x18   : > { %5933 = vmatpush1.bf16.msk.msra.mxu0 %vm7115_vm2, %v5931_v16  ;;  %v643_v34 = vrot.slane %v7169_v30, 1  ;;  %v613_v41 = vld [vmem:[%s10194_s1 + $0x40] sm:$0xff]  ;;  %v5948_v44 = vpack.c.bf16 %v618_v40, %v614_v39  ;;  %v612_v46 = vld [vmem:[%s10194_s1 + $0x38] sm:$0xff]  ;;  %v607_v47 = vld [vmem:[%s10194_s1 + $0x10] sm:$0xff]  ;;  %v647_v52 = vsel %vm642_vm3, %v644_v35, %v646_v37  ;;  %s4911_s22 = sshll.u32 %s10202_s30, 3 }
  0x19   : > { %5945 = vmatprep.subr.bf16.mxu0 %v5944_v26  ;;  %v617_v42 = vld [vmem:[%s10194_s1 + $0x60] sm:$0xf]  ;;  %5943 = vmatpush1.bf16.msk.msra.mxu1 %vm7115_vm2, %v5941_v32  ;;  %v5954_v48 = vpack.c.bf16 %v612_v46, %v608_v45  ;;  %v611_v49 = vld [vmem:[%s10194_s1 + $0x30] sm:$0xff]  ;;  %v616_v50 = vld [vmem:[%s10194_s1 + $0x58] sm:$0xff]  ;;  %v649_v0 = vsel %vm642_vm3, %v646_v37, %v648_v53  ;;  %v1066_v26 = vrot.slane %v7169_v30, 2 }
  0x1a   : > { %v645_v43 = vsel %vm642_vm3, %v643_v34, %v644_v35  ;;  %v620_v51 = vld [vmem:[%s10194_s1 + $0x78] sm:$0xf]  ;;  %v5951_v54 = vpack.c.bf16 %v617_v42, %v613_v41  ;;  %v4953_v55 = vld [vmem:[%s10194_s1 + $0x108] sm:$0xff]  ;;  %v5956_v57 = vpack.c.bf16 %v611_v49, %v607_v47  ;;  %v615_v60 = vld [vmem:[%s10194_s1 + $0x50] sm:$0xff]  ;;  %v1069_v34 = vrot.slane %v7173_v33, 2 }
  0x1b   : > { %4930 = vmatmul.mubr.msk.f32.vlgmr.msra.gmra.mrb[0].mxu0 %vm650_vm4, %v645_v43  ;;  %v4957_v56 = vld [vmem:[%s10194_s1 + $0x128] sm:$0xff]  ;;  %5955 = vmatprep.subr.bf16.mxu1 %v5954_v48  ;;  %v5958_v59 = vpack.c.bf16 %v620_v51, %v616_v50  ;;  %v619_v61 = vld [vmem:[%s10194_s1 + $0x70] sm:$0xf]  ;;  %v4955_v62 = vld [vmem:[%s10194_s1 + $0x118] sm:$0xff]  ;;  %v1068_v32 = vsel %vm1065_vm5, %v1066_v26, %v1067_v27  ;;  %v1071_v42 = vrot.slane %v7182_v38, 2 }
  0x1c   : > { %742 = vmatprep.mubr.f32.mxu0 %v6983_v7  ;;  %5947 = vmatpush1.bf16.msra.mxu0 %v5946_v36  ;;  %v5964_v58 = vpack.c.bf16 %v4957_v56, %v4953_v55  ;;  %v4959_v63 = vld [vmem:[%s10194_s1 + $0x138] sm:$0xff]  ;;  %v5961_v1 = vpack.c.bf16 %v619_v61, %v615_v60  ;;  %v4952_v3 = vld [vmem:[%s10194_s1 + $0x100] sm:$0xff]  ;;  %v4961_v5 = vld [vmem:[%s10194_s1 + $0x148] sm:$0xff]  ;;  %v1070_v41 = vsel %vm1065_vm5, %v1067_v27, %v1069_v34 }
  0x1d   : > { %5950 = vmatprep.subr.msk.bf16.mxu0 %vm7115_vm2, %v5948_v44  ;;  %4936 = vmatmul.mubr.msk.f32.vlgmr.msra.gmra.mrb[0].mxu1 %vm650_vm4, %v645_v43  ;;  %v5974_v2 = vpack.c.bf16 %v4959_v63, %v4955_v62  ;;  %v4956_v4 = vld [vmem:[%s10194_s1 + $0x120] sm:$0xff]  ;;  %v4965_v6 = vld [vmem:[%s10194_s1 + $0x168] sm:$0xf]  ;;  %v4954_v13 = vld [vmem:[%s10194_s1 + $0x110] sm:$0xff]  ;;  %v1072_v48 = vsel %vm1065_vm5, %v1069_v34, %v1071_v42 }
  0x1e   : > { %831 = vmatprep.mubr.f32.mxu1 %v6983_v7  ;;  %5957 = vmatpush1.bf16.msra.mxu1 %v5956_v57  ;;  %v5966_v8 = vpack.c.bf16 %v4956_v4, %v4952_v3  ;;  %v5968_v9 = vpack.c.bf16 %v4965_v6, %v4961_v5  ;;  %v4960_v11 = vld [vmem:[%s10194_s1 + $0x140] sm:$0xff]  ;;  %v4958_v14 = vld [vmem:[%s10194_s1 + $0x130] sm:$0xff]  ;;  %v1342_v15 = vld [vmem:[%s10198_s3 + $0x8] sm:$0xff] }
  0x1f   : > { %4931 = vmatmul.mubr.msk.f32.gmra.mrb[2].mxu0 %vm650_vm4, %v647_v52  ;;  %5960 = vmatprep.subr.msk.bf16.mxu1 %vm7115_vm2, %v5958_v59  ;;  %v4964_v12 = vld [vmem:[%s10194_s1 + $0x160] sm:$0xf]  ;;  %v1344_v16 = vld [vmem:[%s10198_s3 + $0x18] sm:$0xff]  ;;  %v5976_v20 = vpack.c.bf16 %v4958_v14, %v4954_v13  ;;  %v4962_v23 = vld [vmem:[%s10194_s1 + $0x150] sm:$0xff] }
  0x20   : > { %748 = vmatprep.mubr.f32.mxu0 %v6983_v7  ;;  %5953 = vmatpush1.bf16.msk.msra.mxu0 %vm7115_vm2, %v5951_v54  ;;  %v4963_v17 = vld [vmem:[%s10194_s1 + $0x158] sm:$0xff]  ;;  %v5971_v19 = vpack.c.bf16 %v4964_v12, %v4960_v11  ;;  %v5984_v21 = vpack.c.bf16 %v1344_v16, %v1342_v15  ;;  %v4966_v24 = vld [vmem:[%s10194_s1 + $0x170] sm:$0xf]  ;;  %v1341_v28 = vld [vmem:[%s10198_s3] sm:$0xff] }
  0x21   : > { %5965 = vmatprep.subr.bf16.mxu0 %v5964_v58  ;;  %4937 = vmatmul.mubr.msk.f32.gmra.mrb[2].mxu1 %vm650_vm4, %v647_v52  ;;  %v4967_v18 = vld [vmem:[%s10194_s1 + $0x178] sm:$0xf]  ;;  %v5981_v25 = vpack.c.bf16 %v4966_v24, %v4962_v23  ;;  %v1343_v29 = vld [vmem:[%s10198_s3 + $0x10] sm:$0xff]  ;;  %v1345_v37 = vld [vmem:[%s10198_s3 + $0x20] sm:$0xff] }
  0x22   : > { %837 = vmatprep.mubr.f32.mxu1 %v6983_v7  ;;  %5963 = vmatpush1.bf16.msk.msra.mxu1 %vm7115_vm2, %v5961_v1  ;;  %v5978_v22 = vpack.c.bf16 %v4967_v18, %v4963_v17  ;;  %v5986_v35 = vpack.c.bf16 %v1343_v29, %v1341_v28  ;;  %v1347_v39 = vld [vmem:[%s10198_s3 + $0x30] sm:$0xff]  ;;  %v1350_v40 = vld [vmem:[%s10198_s3 + $0x48] sm:$0xff]  ;;  %v1349_v45 = vld [vmem:[%s10198_s3 + $0x40] sm:$0xff] }
  0x23   : > { %4932 = vmatmul.mubr.msk.f32.gmra.mrb[4].mxu0 %vm650_vm4, %v649_v0  ;;  %5975 = vmatprep.subr.bf16.mxu1 %v5974_v2  ;;  %v5990_v43 = vpack.c.bf16 %v1347_v39, %v1345_v37  ;;  %v1351_v46 = vld [vmem:[%s10198_s3 + $0x50] sm:$0xff]  ;;  %v1354_v47 = vld [vmem:[%s10198_s3 + $0x68] sm:$0xff]  ;;  %v1353_v51 = vld [vmem:[%s10198_s3 + $0x60] sm:$0xff] }
  0x24   : > { %754 = vmatprep.mubr.f32.mxu0 %v6983_v7  ;;  %v5994_v49 = vpack.c.bf16 %v1351_v46, %v1349_v45  ;;  %v1355_v52 = vld [vmem:[%s10198_s3 + $0x70] sm:$0xff]  ;;  %v1360_v54 = vld [vmem:[%s10198_s3 + $0x98] sm:$0xff]  ;;  %v1357_v57 = vld [vmem:[%s10198_s3 + $0x80] sm:$0xff] }
  0x25   : > { %4938 = vmatmul.mubr.msk.f32.gmra.mrb[4].mxu1 %vm650_vm4, %v649_v0  ;;  %v5998_v55 = vpack.c.bf16 %v1355_v52, %v1353_v51  ;;  %v1359_v58 = vld [vmem:[%s10198_s3 + $0x90] sm:$0xff]  ;;  %v1362_v59 = vld [vmem:[%s10198_s3 + $0xa8] sm:$0xff]  ;;  %v1364_v60 = vld [vmem:[%s10198_s3 + $0xb8] sm:$0xff] }
  0x26   : > { %843 = vmatprep.mubr.f32.mxu1 %v6983_v7  ;;  %v6002_v61 = vpack.c.bf16 %v1359_v58, %v1357_v57  ;;  %v6004_v62 = vpack.c.bf16 %v1364_v60, %v1362_v59  ;;  %v1361_v63 = vld [vmem:[%s10198_s3 + $0xa0] sm:$0xff]  ;;  %v1363_v0 = vld [vmem:[%s10198_s3 + $0xb0] sm:$0xff]  ;;  %v1366_v1 = vld [vmem:[%s10198_s3 + $0xc8] sm:$0xff] }
  0x27   : > { %4933 = vmatmul.mubr.msk.f32.gmra.mrb[6].mxu0 %vm650_vm4, %v648_v53  ;;  %v1368_v2 = vld [vmem:[%s10198_s3 + $0xd8] sm:$0xff]  ;;  %v6006_v3 = vpack.c.bf16 %v1363_v0, %v1361_v63  ;;  %v1365_v5 = vld [vmem:[%s10198_s3 + $0xc0] sm:$0xff]  ;;  %v1367_v6 = vld [vmem:[%s10198_s3 + $0xd0] sm:$0xff] }
  0x28   : > { %934 = vmatprep.mubr.f32.mxu0 %v6983_v7  ;;  %v6008_v4 = vpack.c.bf16 %v1368_v2, %v1366_v1  ;;  %v6010_v11 = vpack.c.bf16 %v1367_v6, %v1365_v5  ;;  %v1369_v13 = vld [vmem:[%s10198_s3 + $0xe0] sm:$0xff]  ;;  %v1371_v14 = vld [vmem:[%s10198_s3 + $0xf0] sm:$0xff]  ;;  %v1374_v15 = vld [vmem:[%s10198_s3 + $0x108] sm:$0xff] }
  0x29   : > { %4939 = vmatmul.mubr.msk.f32.gmra.mrb[6].mxu1 %vm650_vm4, %v648_v53  ;;  %v1358_v53 = vld [vmem:[%s10198_s3 + $0x88] sm:$0xff]  ;;  %v1376_v16 = vld [vmem:[%s10198_s3 + $0x118] sm:$0xff]  ;;  %v6014_v17 = vpack.c.bf16 %v1371_v14, %v1369_v13  ;;  %v1379_v26 = vld [vmem:[%s10198_s3 + $0x130] sm:$0xff] }
  0x2a   : > { %1023 = vmatprep.mubr.f32.mxu1 %v6983_v7  ;;  %v6000_v56 = vpack.c.bf16 %v1360_v54, %v1358_v53  ;;  %v6016_v18 = vpack.c.bf16 %v1376_v16, %v1374_v15  ;;  %v1382_v27 = vld [vmem:[%s10198_s3 + $0x148] sm:$0xff]  ;;  %v1384_v28 = vld [vmem:[%s10198_s3 + $0x158] sm:$0xff]  ;;  %v1385_v39 = vld [vmem:[%s10198_s3 + $0x160] sm:$0xff] }
  0x2b   : > { %4942 = vmatmul.mubr.msk.f32.vlgmr.msra.gmra.mrb[0].mxu0 %vm650_vm4, %v7169_v30  ;;  %v1386_v34 = vld [vmem:[%s10198_s3 + $0x168] sm:$0xff]  ;;  %v1391_v45 = vld [vmem:[%s10198_s3 + $0x190] sm:$0xff]  ;;  %v1400_v52 = vld [vmem:[%s10198_s3 + $0x1d8] sm:$0xff] }
  0x2c   : > { %940 = vmatprep.mubr.f32.mxu0 %v6983_v7  ;;  %5967 = vmatpush1.bf16.msra.mxu0 %v5966_v8  ;;  %v1370_v8 = vld [vmem:[%s10198_s3 + $0xe8] sm:$0xff]  ;;  %v1404_v59 = vld [vmem:[%s10198_s3 + $0x1f8] sm:$0xff]  ;;  %v4984_v5 = vld [vmem:[%s10170_s4 + $0x1a0] sm:$0xff] }
  0x2d   : > { %5970 = vmatprep.subr.msk.bf16.mxu0 %vm7115_vm2, %v5968_v9  ;;  %4948 = vmatmul.mubr.msk.f32.vlgmr.msra.gmra.mrb[0].mxu1 %vm650_vm4, %v7169_v30  ;;  %v1346_v30 = vld [vmem:[%s10198_s3 + $0x28] sm:$0xff]  ;;  %v1372_v9 = vld [vmem:[%s10198_s3 + $0xf8] sm:$0xff]  ;;  %v4988_v14 = vld [vmem:[%s10170_s4 + $0x1c0] sm:$0xff] }
  0x2e   : > { %1029 = vmatprep.mubr.f32.mxu1 %v6983_v7  ;;  %5977 = vmatpush1.bf16.msra.mxu1 %v5976_v20  ;;  %v6012_v12 = vpack.c.bf16 %v1372_v9, %v1370_v8  ;;  %v1375_v20 = vld [vmem:[%s10198_s3 + $0x110] sm:$0xff]  ;;  %v1394_v46 = vld [vmem:[%s10198_s3 + $0x1a8] sm:$0xff]  ;;  %v1408_v1 = vld [vmem:[%s10198_s3 + $0x218] sm:$0xff] }
  0x2f   : > { %4943 = vmatmul.mubr.msk.f32.gmra.mrb[2].mxu0 %vm650_vm4, %v7171_v31  ;;  %5980 = vmatprep.subr.msk.bf16.mxu1 %vm7115_vm2, %v5978_v22  ;;  %v1380_v22 = vld [vmem:[%s10198_s3 + $0x138] sm:$0xff]  ;;  %v1398_v51 = vld [vmem:[%s10198_s3 + $0x1c8] sm:$0xff]  ;;  %v4986_v8 = vld [vmem:[%s10170_s4 + $0x1b0] sm:$0xff] }
  0x30   : > { %946 = vmatprep.mubr.f32.mxu0 %v6983_v7  ;;  %5973 = vmatpush1.bf16.msk.msra.mxu0 %vm7115_vm2, %v5971_v19  ;;  %v1373_v19 = vld [vmem:[%s10198_s3 + $0x100] sm:$0xff]  ;;  %v6040_v54 = vpack.c.bf16 %v1400_v52, %v1398_v51  ;;  %v1402_v58 = vld [vmem:[%s10198_s3 + $0x1e8] sm:$0xff]  ;;  %v4990_v15 = vld [vmem:[%s10170_s4 + $0x1d0] sm:$0xff] }
  0x31   : > { %5985 = vmatprep.subr.bf16.mxu0 %v5984_v21  ;;  %4949 = vmatmul.mubr.msk.f32.gmra.mrb[2].mxu1 %vm650_vm4, %v7171_v31  ;;  %v1348_v31 = vld [vmem:[%s10198_s3 + $0x38] sm:$0xff]  ;;  %v1378_v21 = vld [vmem:[%s10198_s3 + $0x128] sm:$0xff]  ;;  %v6018_v23 = vpack.c.bf16 %v1375_v20, %v1373_v19  ;;  %v6044_v60 = vpack.c.bf16 %v1404_v59, %v1402_v58  ;;  %v4992_v20 = vld [vmem:[%s10170_s4 + $0x1e0] sm:$0xff] }
  0x32   : > { %1035 = vmatprep.mubr.f32.mxu1 %v6983_v7  ;;  %5983 = vmatpush1.bf16.msk.msra.mxu1 %vm7115_vm2, %v5981_v25  ;;  %v5988_v36 = vpack.c.bf16 %v1348_v31, %v1346_v30  ;;  %v6020_v24 = vpack.c.bf16 %v1380_v22, %v1378_v21  ;;  %v1377_v25 = vld [vmem:[%s10198_s3 + $0x120] sm:$0xff]  ;;  %v6024_v30 = vpack.c.bf16 %v1384_v28, %v1382_v27  ;;  %v1406_v0 = vld [vmem:[%s10198_s3 + $0x208] sm:$0xff]  ;;  %v4994_v21 = vld [vmem:[%s10170_s4 + $0x1f0] sm:$0xff] }
  0x33   : > { %4944 = vmatmul.mubr.msk.f32.gmra.mrb[4].mxu0 %vm650_vm4, %v7173_v33  ;;  %v6022_v29 = vpack.c.bf16 %v1379_v26, %v1377_v25  ;;  %v1381_v31 = vld [vmem:[%s10198_s3 + $0x140] sm:$0xff]  ;;  %v6048_v2 = vpack.c.bf16 %v1408_v1, %v1406_v0  ;;  %v4989_v9 = vld [vmem:[%s10170_s4 + $0x1c8] sm:$0xff]  ;;  %v4998_v27 = vld [vmem:[%s10170_s4 + $0x210] sm:$0xff] }
  0x34   : > { %952 = vmatprep.mubr.f32.mxu0 %v6983_v7  ;;  %v4993_v16 = vld [vmem:[%s10170_s4 + $0x1e8] sm:$0xff]  ;;  %v4996_v26 = vld [vmem:[%s10170_s4 + $0x200] sm:$0xff]  ;;  %v5014_v51 = vld [vmem:[%s10170_s4 + $0x290] sm:$0xff] }
  0x35   : > { %4950 = vmatmul.mubr.msk.f32.gmra.mrb[4].mxu1 %vm650_vm4, %v7173_v33  ;;  %v1352_v33 = vld [vmem:[%s10198_s3 + $0x58] sm:$0xff]  ;;  %v4997_v22 = vld [vmem:[%s10170_s4 + $0x208] sm:$0xff] }
  0x36   : > { %1041 = vmatprep.mubr.f32.mxu1 %v6983_v7  ;;  %v5992_v44 = vpack.c.bf16 %v1352_v33, %v1350_v40  ;;  %v1387_v40 = vld [vmem:[%s10198_s3 + $0x170] sm:$0xff]  ;;  %v1390_v33 = vld [vmem:[%s10198_s3 + $0x188] sm:$0xff]  ;;  %v5023_v59 = vld [vmem:[%s10170_s4 + $0x2d8] sm:$0xff] }
  0x37   : > { %4945 = vmatmul.mubr.msk.f32.gmra.mrb[6].mxu0 %vm650_vm4, %v7182_v38  ;;  %v5001_v28 = vld [vmem:[%s10170_s4 + $0x228] sm:$0xff]  ;;  %v5027_v1 = vld [vmem:[%s10170_s4 + $0x2f8] sm:$0xff] }
  0x38   : > { %1157 = vmatprep.mubr.f32.mxu0 %v6983_v7  ;;  %v5017_v52 = vld [vmem:[%s10170_s4 + $0x2a8] sm:$0xff] }
  0x39   : > { %4951 = vmatmul.mubr.msk.f32.gmra.mrb[6].mxu1 %vm650_vm4, %v7182_v38  ;;  %v1356_v38 = vld [vmem:[%s10198_s3 + $0x78] sm:$0xff]  ;;  %v5021_v58 = vld [vmem:[%s10170_s4 + $0x2c8] sm:$0xff] }
  0x3a   : > { %1246 = vmatprep.mubr.f32.mxu1 %v6983_v7  ;;  %v5996_v50 = vpack.c.bf16 %v1356_v38, %v1354_v47  ;;  %v1396_v47 = vld [vmem:[%s10198_s3 + $0x1b8] sm:$0xff]  ;;  %v5025_v0 = vld [vmem:[%s10170_s4 + $0x2e8] sm:$0xff] }
  0x3b   : > { %4970 = vmatmul.mubr.msk.f32.vlgmr.msra.gmra.mrb[0].mxu0 %vm650_vm4, %v1068_v32 }
  0x3c   : > { %1163 = vmatprep.mubr.f32.mxu0 %v6983_v7  ;;  %5987 = vmatpush1.bf16.msra.mxu0 %v5986_v35  ;;  %v1388_v35 = vld [vmem:[%s10198_s3 + $0x178] sm:$0xff] }
  0x3d   : > { %5989 = vmatprep.subr.bf16.mxu0 %v5988_v36  ;;  %4976 = vmatmul.mubr.msk.f32.vlgmr.msra.gmra.mrb[0].mxu1 %vm650_vm4, %v1068_v32  ;;  %v1383_v32 = vld [vmem:[%s10198_s3 + $0x150] sm:$0xff]  ;;  %v6028_v37 = vpack.c.bf16 %v1388_v35, %v1386_v34  ;;  %v5005_v35 = vld [vmem:[%s10170_s4 + $0x248] sm:$0xff] }
  0x3e   : > { %1252 = vmatprep.mubr.f32.mxu1 %v6983_v7  ;;  %v6026_v36 = vpack.c.bf16 %v1383_v32, %v1381_v31  ;;  %v5000_v32 = vld [vmem:[%s10170_s4 + $0x220] sm:$0xff]  ;;  %v5002_v34 = vld [vmem:[%s10170_s4 + $0x230] sm:$0xff] }
  0x3f   : > { %4971 = vmatmul.mubr.msk.f32.gmra.mrb[2].mxu0 %vm650_vm4, %v1070_v41 }
  0x40   : > { %1169 = vmatprep.mubr.f32.mxu0 %v6983_v7  ;;  %5991 = vmatpush1.bf16.msra.mxu0 %v5990_v43 }
  0x41   : > { %5993 = vmatprep.subr.bf16.mxu0 %v5992_v44  ;;  %4977 = vmatmul.mubr.msk.f32.gmra.mrb[2].mxu1 %vm650_vm4, %v1070_v41  ;;  %v1392_v41 = vld [vmem:[%s10198_s3 + $0x198] sm:$0xff]  ;;  %v1389_v44 = vld [vmem:[%s10198_s3 + $0x180] sm:$0xff] }
  0x42   : > { %1258 = vmatprep.mubr.f32.mxu1 %v6983_v7  ;;  %v6032_v43 = vpack.c.bf16 %v1392_v41, %v1390_v33  ;;  %v6034_v38 = vpack.c.bf16 %v1391_v45, %v1389_v44  ;;  %v5006_v33 = vld [vmem:[%s10170_s4 + $0x250] sm:$0xff]  ;;  %v5009_v41 = vld [vmem:[%s10170_s4 + $0x268] sm:$0xff]  ;;  %v5008_v45 = vld [vmem:[%s10170_s4 + $0x260] sm:$0xff] }
  0x43   : > { %4972 = vmatmul.mubr.msk.f32.gmra.mrb[4].mxu0 %vm650_vm4, %v1072_v48 }
  0x44   : > { %1175 = vmatprep.mubr.f32.mxu0 %v6983_v7  ;;  %5995 = vmatpush1.bf16.msra.mxu0 %v5994_v49  ;;  %v1393_v49 = vld [vmem:[%s10198_s3 + $0x1a0] sm:$0xff] }
  0x45   : > { %5997 = vmatprep.subr.bf16.mxu0 %v5996_v50  ;;  %4978 = vmatmul.mubr.msk.f32.gmra.mrb[4].mxu1 %vm650_vm4, %v1072_v48  ;;  %v6036_v48 = vpack.c.bf16 %v1396_v47, %v1394_v46  ;;  %v1395_v50 = vld [vmem:[%s10198_s3 + $0x1b0] sm:$0xff]  ;;  %v5013_v47 = vld [vmem:[%s10170_s4 + $0x288] sm:$0xff] }
  0x46   : > { %1264 = vmatprep.mubr.f32.mxu1 %v6983_v7  ;;  %v6038_v53 = vpack.c.bf16 %v1395_v50, %v1393_v49  ;;  %v5010_v46 = vld [vmem:[%s10170_s4 + $0x270] sm:$0xff]  ;;  %v5012_v50 = vld [vmem:[%s10170_s4 + $0x280] sm:$0xff] }
  0x47   : > { %4973 = vmatmul.mubr.msk.f32.gmra.mrb[6].mxu0 %vm650_vm4, %v1071_v42 }
  0x48   : > { %5999 = vmatpush1.bf16.msra.mxu0 %v5998_v55  ;;  %v1397_v55 = vld [vmem:[%s10198_s3 + $0x1c0] sm:$0xff] }
  0x49   : > { %6001 = vmatprep.subr.bf16.mxu0 %v6000_v56  ;;  %4979 = vmatmul.mubr.msk.f32.gmra.mrb[6].mxu1 %vm650_vm4, %v1071_v42  ;;  %v6030_v42 = vpack.c.bf16 %v1387_v40, %v1385_v39  ;;  %v1399_v56 = vld [vmem:[%s10198_s3 + $0x1d0] sm:$0xff]  ;;  %v5004_v40 = vld [vmem:[%s10170_s4 + $0x240] sm:$0xff]  ;;  %vm3747_vm4 = vcmask 648192  }
  0x4a   : > { %v6042_v57 = vpack.c.bf16 %v1399_v56, %v1397_v55  ;;  %v5016_v56 = vld [vmem:[%s10170_s4 + $0x2a0] sm:$0xff] }
  0x4c   : > { %6003 = vmatpush1.bf16.msra.mxu0 %v6002_v61  ;;  %v1401_v61 = vld [vmem:[%s10198_s3 + $0x1e0] sm:$0xff] }
  0x4d   : > { %6005 = vmatprep.subr.bf16.mxu0 %v6004_v62  ;;  %v1403_v62 = vld [vmem:[%s10198_s3 + $0x1f0] sm:$0xff] }
  0x4e   : > { %v6046_v63 = vpack.c.bf16 %v1403_v62, %v1401_v61  ;;  %v6124_v61 = vpack.c.bf16 %v5023_v59, %v5021_v58  ;;  %v5020_v62 = vld [vmem:[%s10170_s4 + $0x2c0] sm:$0xff] }
  0x50   : > { %6007 = vmatpush1.bf16.msra.mxu0 %v6006_v3  ;;  %v4985_v3 = vld [vmem:[%s10170_s4 + $0x1a8] sm:$0xff] }
  0x51   : > { %6009 = vmatprep.subr.bf16.mxu0 %v6008_v4  ;;  %v4987_v4 = vld [vmem:[%s10170_s4 + $0x1b8] sm:$0xff] }
  0x52   : > { %v6088_v6 = vpack.c.bf16 %v4987_v4, %v4985_v3  ;;  %v6128_v3 = vpack.c.bf16 %v5027_v1, %v5025_v0  ;;  %v5024_v4 = vld [vmem:[%s10170_s4 + $0x2e0] sm:$0xff]  ;;  %v1419_v0 = vld [vmem:[%s10198_s3 + $0x270] sm:$0xff] }
  0x54   : > { %6011 = vmatpush1.bf16.msra.mxu0 %v6010_v11  ;;  %v4991_v11 = vld [vmem:[%s10170_s4 + $0x1d8] sm:$0xff]  ;;  %6089 = vmatprep.subr.bf16.mxu1 %v6088_v6 }
  0x55   : > { %6013 = vmatprep.subr.bf16.mxu0 %v6012_v12  ;;  %v6090_v12 = vpack.c.bf16 %v4986_v8, %v4984_v5  ;;  %v6092_v13 = vpack.c.bf16 %v4991_v11, %v4989_v9  ;;  %v5026_v5 = vld [vmem:[%s10170_s4 + $0x2f0] sm:$0xff]  ;;  %v1289_v8 = vlaneseq }
  0x56   : > { %v6130_v6 = vpack.c.bf16 %v5026_v5, %v5024_v4  ;;  %v1424_v4 = vld [vmem:[%s10198_s3 + $0x298] sm:$0xff] }
  0x57   : > { %6091 = vmatpush1.bf16.msra.mxu1 %v6090_v12  ;;  %v7682_v9 = vshrl.u32 %v1289_v8, 7  ;;  %v7690_v12 = vld [vmem:[%s10199_s26] sm:$0xf]  ;;  %vm2136_vm8 = vcmp.lt.s32.totalorder %v1289_v8, 192  ;;  %s600_s26 = scalar_lea.vmem %s10185_s19, %s4911_s22 }
  0x58   : > { %6015 = vmatpush1.bf16.msra.mxu0 %v6014_v17  ;;  %v4995_v17 = vld [vmem:[%s10170_s4 + $0x1f8] sm:$0xff]  ;;  %6093 = vmatprep.subr.bf16.mxu1 %v6092_v13  ;;  %2138 = vst.msk [vmem:[#allocation2] ss:$8 sm:$0x3] %vm2136_vm8, %v6983_v7 }
  0x59   : > { %6017 = vmatprep.subr.bf16.mxu0 %v6016_v18  ;;  %v6094_v18 = vpack.c.bf16 %v4990_v15, %v4988_v14  ;;  %v6096_v19 = vpack.c.bf16 %v4995_v17, %v4993_v16  ;;  %v7685_v11 = vsub.s32 0, %v7682_v9  ;;  %v7693_v13 = vsub.s32 1, %v7682_v9  ;;  %2141 = vst.msk [vmem:[#allocation2 + $0x31] ss:$8 sm:$0x3] %vm2136_vm8, %v6983_v7 }
  0x5a   : > { %vm6986_vm8 = vmmov 0  }
  0x5b   : > { %6095 = vmatpush1.bf16.msra.mxu1 %v6094_v18  ;;  %v1292_v14 = vrot.slane %v7690_v12, %v7685_v11  ;;  %v1296_v15 = vrot.slane %v7690_v12, %v7693_v13 }
  0x5c   : > { %6019 = vmatpush1.bf16.msra.mxu0 %v6018_v23  ;;  %v4999_v23 = vld [vmem:[%s10170_s4 + $0x218] sm:$0xff]  ;;  %6097 = vmatprep.subr.bf16.mxu1 %v6096_v19  ;;  %v1405_v19 = vld [vmem:[%s10198_s3 + $0x200] sm:$0xff] }
  0x5d   : > { %6021 = vmatprep.subr.bf16.mxu0 %v6020_v24  ;;  %v6098_v24 = vpack.c.bf16 %v4994_v21, %v4992_v20  ;;  %v6100_v25 = vpack.c.bf16 %v4999_v23, %v4997_v22  ;;  %v1407_v20 = vld [vmem:[%s10198_s3 + $0x210] sm:$0xff]  ;;  %v1410_v22 = vld [vmem:[%s10198_s3 + $0x228] sm:$0xff]  ;;  %v1412_v23 = vld [vmem:[%s10198_s3 + $0x238] sm:$0xff] }
  0x5f   : > { %6099 = vmatpush1.bf16.msra.mxu1 %v6098_v24 }
  0x60   : > { %6023 = vmatpush1.bf16.msra.mxu0 %v6022_v29  ;;  %v5003_v29 = vld [vmem:[%s10170_s4 + $0x238] sm:$0xff]  ;;  %6101 = vmatprep.subr.bf16.mxu1 %v6100_v25 }
  0x61   : > { %6025 = vmatprep.subr.bf16.mxu0 %v6024_v30  ;;  %v6102_v30 = vpack.c.bf16 %v4998_v27, %v4996_v26  ;;  %v6104_v31 = vpack.c.bf16 %v5003_v29, %v5001_v28  ;;  %v6050_v28 = vpack.c.bf16 %v1407_v20, %v1405_v19  ;;  %v1423_v19 = vld [vmem:[%s10198_s3 + $0x290] sm:$0xff] }
  0x63   : > { %6103 = vmatpush1.bf16.msra.mxu1 %v6102_v30 }
  0x64   : > { %6027 = vmatpush1.bf16.msra.mxu0 %v6026_v36  ;;  %v5007_v36 = vld [vmem:[%s10170_s4 + $0x258] sm:$0xff]  ;;  %6105 = vmatprep.subr.bf16.mxu1 %v6104_v31 }
  0x65   : > { %6029 = vmatprep.subr.bf16.mxu0 %v6028_v37  ;;  %v6106_v37 = vpack.c.bf16 %v5002_v34, %v5000_v32  ;;  %v6108_v39 = vpack.c.bf16 %v5007_v36, %v5005_v35  ;;  %v6052_v32 = vpack.c.bf16 %v1412_v23, %v1410_v22  ;;  %v1409_v34 = vld [vmem:[%s10198_s3 + $0x220] sm:$0xff]  ;;  %v1411_v35 = vld [vmem:[%s10198_s3 + $0x230] sm:$0xff]  ;;  %v1428_v22 = vld [vmem:[%s10198_s3 + $0x2b8] sm:$0xff] }
  0x67   : > { %6107 = vmatpush1.bf16.msra.mxu1 %v6106_v37  ;;  %v1303_v37 = vsub.s32 3, %v7682_v9 }
  0x68   : > { %6031 = vmatpush1.bf16.msra.mxu0 %v6030_v42  ;;  %v5011_v42 = vld [vmem:[%s10170_s4 + $0x278] sm:$0xff]  ;;  %6109 = vmatprep.subr.bf16.mxu1 %v6108_v39  ;;  %v1414_v39 = vld [vmem:[%s10198_s3 + $0x248] sm:$0xff] }
  0x69   : > { %6033 = vmatprep.subr.bf16.mxu0 %v6032_v43  ;;  %v6110_v43 = vpack.c.bf16 %v5006_v33, %v5004_v40  ;;  %v6112_v44 = vpack.c.bf16 %v5011_v42, %v5009_v41  ;;  %v1416_v40 = vld [vmem:[%s10198_s3 + $0x258] sm:$0xff] }
  0x6b   : > { %6111 = vmatpush1.bf16.msra.mxu1 %v6110_v43 }
  0x6c   : > { %6035 = vmatpush1.bf16.msra.mxu0 %v6034_v38  ;;  %v5015_v38 = vld [vmem:[%s10170_s4 + $0x298] sm:$0xff]  ;;  %6113 = vmatprep.subr.bf16.mxu1 %v6112_v44  ;;  %v6054_v44 = vpack.c.bf16 %v1411_v35, %v1409_v34  ;;  %v1431_v34 = vld [vmem:[%s10198_s3 + $0x2d0] sm:$0xff]  ;;  %v1434_v35 = vld [vmem:[%s10198_s3 + $0x2e8] sm:$0xff] }
  0x6d   : > { %6037 = vmatprep.subr.bf16.mxu0 %v6036_v48  ;;  %v6114_v48 = vpack.c.bf16 %v5010_v46, %v5008_v45  ;;  %v6116_v49 = vpack.c.bf16 %v5015_v38, %v5013_v47  ;;  %v6056_v38 = vpack.c.bf16 %v1416_v40, %v1414_v39 }
  0x6f   : > { %6115 = vmatpush1.bf16.msra.mxu1 %v6114_v48  ;;  %v1413_v48 = vld [vmem:[%s10198_s3 + $0x240] sm:$0xff] }
  0x70   : > { %6039 = vmatpush1.bf16.msra.mxu0 %v6038_v53  ;;  %v5019_v53 = vld [vmem:[%s10170_s4 + $0x2b8] sm:$0xff]  ;;  %6117 = vmatprep.subr.bf16.mxu1 %v6116_v49  ;;  %v1415_v49 = vld [vmem:[%s10198_s3 + $0x250] sm:$0xff] }
  0x71   : > { %6041 = vmatprep.subr.bf16.mxu0 %v6040_v54  ;;  %v6118_v54 = vpack.c.bf16 %v5014_v51, %v5012_v50  ;;  %v6120_v55 = vpack.c.bf16 %v5019_v53, %v5017_v52  ;;  %v7739_v50 = vrot.slane %v7690_v12, %v1303_v37  ;;  %v1418_v52 = vld [vmem:[%s10198_s3 + $0x268] sm:$0xff]  ;;  %v1420_v53 = vld [vmem:[%s10198_s3 + $0x278] sm:$0xff]  ;;  %v6058_v58 = vpack.c.bf16 %v1415_v49, %v1413_v48  ;;  %v1437_v48 = vld [vmem:[%s10198_s3 + $0x300] sm:$0xff] }
  0x72   : > { %v1439_v49 = vld [vmem:[%s10198_s3 + $0x310] sm:$0xff] }
  0x73   : > { %6119 = vmatpush1.bf16.msra.mxu1 %v6118_v54 }
  0x74   : > { %6043 = vmatpush1.bf16.msra.mxu0 %v6042_v57  ;;  %v5018_v57 = vld [vmem:[%s10170_s4 + $0x2b0] sm:$0xff]  ;;  %6121 = vmatprep.subr.bf16.mxu1 %v6120_v55 }
  0x75   : > { %6045 = vmatprep.subr.bf16.mxu0 %v6044_v60  ;;  %v6122_v60 = vpack.c.bf16 %v5018_v57, %v5016_v56 }
  0x77   : > { %6123 = vmatpush1.bf16.msra.mxu1 %v6122_v60 }
  0x78   : > { %6047 = vmatpush1.bf16.msra.mxu0 %v6046_v63  ;;  %v5022_v63 = vld [vmem:[%s10170_s4 + $0x2d0] sm:$0xff]  ;;  %6125 = vmatprep.subr.bf16.mxu1 %v6124_v61 }
  0x79   : > { %6049 = vmatprep.subr.bf16.mxu0 %v6048_v2  ;;  %v6126_v2 = vpack.c.bf16 %v5022_v63, %v5020_v62  ;;  %v6060_v62 = vpack.c.bf16 %v1420_v53, %v1418_v52  ;;  %v1417_v63 = vld [vmem:[%s10198_s3 + $0x260] sm:$0xff]  ;;  %v1444_v52 = vld [vmem:[%s10198_s3 + $0x338] sm:$0xff]  ;;  %v6082_v53 = vpack.c.bf16 %v1439_v49, %v1437_v48  ;;  %v5122_v49 = vld [vmem:[%s10172_s6 + $0x3c8] sm:$0xff] }
  0x7b   : > { %6127 = vmatpush1.bf16.msra.mxu1 %v6126_v2 }
  0x7c   : > { %6129 = vmatprep.subr.bf16.mxu1 %v6128_v3  ;;  %v1422_v3 = vld [vmem:[%s10198_s3 + $0x288] sm:$0xff] }
  0x7f   : > { %6131 = vmatpush1.bf16.msra.mxu1 %v6130_v6 }
 0x10e   : > { %v1159_v16 = vpop.f32.mrb[0].mxu0 }
 0x10f   : > { %v1309_v17 = vadd.f32 %v1292_v14, %v1159_v16  ;;  %v1161_v18 = vpop.f32.mrb[1].mxu0  ;;  %v6062_v16 = vpack.c.bf16 %v1419_v0, %v1417_v63 }
 0x110   : > { %v1310_v21 = vadd.f32 %v1296_v15, %v1161_v18  ;;  %v7711_v24 = vpop.f32.mrb[0].mxu1  ;;  %v1421_v18 = vld [vmem:[%s10198_s3 + $0x280] sm:$0xff] }
 0x111   : > { %v1250_v27 = vpop.f32.mrb[1].mxu1  ;;  %v1325_v29 = vmax.f32 %v1309_v17, 0.0  ;;  %v6066_v23 = vpack.c.bf16 %v1423_v19, %v1421_v18  ;;  %v5035_v18 = vld [vmem:[%s10170_s4 + $0x338] sm:$0xff] }
 0x112   : > { %v1326_v25 = vmax.f32 %v1310_v21, 0.0  ;;  %v1165_v26 = vpop.f32.mrb[2].mxu0  ;;  %v1312_v1 = vadd.f32 %v7739_v50, %v1250_v27  ;;  %v1426_v21 = vld [vmem:[%s10198_s3 + $0x2a8] sm:$0xff]  ;;  %v1427_v27 = vld [vmem:[%s10198_s3 + $0x2b0] sm:$0xff] }
 0x113   : > { %v1313_v30 = vadd.f32 %v1292_v14, %v1165_v26  ;;  %v1167_v31 = vpop.f32.mrb[3].mxu0  ;;  %v1425_v26 = vld [vmem:[%s10198_s3 + $0x2a0] sm:$0xff] }
 0x114   : > { %v1314_v36 = vadd.f32 %v1296_v15, %v1167_v31  ;;  %1522 = vmatprep.mubr.f32.mxu0 %v1326_v25  ;;  %v7726_v33 = vpop.f32.mrb[2].mxu1  ;;  %v1328_v20 = vmax.f32 %v1312_v1, 0.0  ;;  %v6068_v25 = vpack.c.bf16 %v1428_v22, %v1426_v21  ;;  %v5034_v21 = vld [vmem:[%s10170_s4 + $0x330] sm:$0xff] }
 0x115   : > { %1523 = vmatmul.mubr.f32.vlgmr.msra.gmra.mrb[8].mxu0 %v1325_v29  ;;  %v7728_v43 = vpop.f32.mrb[3].mxu1  ;;  %v1329_v45 = vmax.f32 %v1313_v30, 0.0  ;;  %v1432_v29 = vld [vmem:[%s10198_s3 + $0x2d8] sm:$0xff]  ;;  %v6070_v30 = vpack.c.bf16 %v1427_v27, %v1425_v26  ;;  %v5098_v27 = vld [vmem:[%s10172_s6 + $0x308] sm:$0xff] }
 0x116   : > { %v1330_v41 = vmax.f32 %v1314_v36, 0.0  ;;  %6051 = vmatpush1.bf16.msra.mxu0 %v6050_v28  ;;  %v1171_v42 = vpop.f32.mrb[4].mxu0  ;;  %v1430_v28 = vld [vmem:[%s10198_s3 + $0x2c8] sm:$0xff]  ;;  %v1436_v36 = vld [vmem:[%s10198_s3 + $0x2f8] sm:$0xff] }
 0x117   : > { %v1317_v46 = vadd.f32 %v1292_v14, %v1171_v42  ;;  %v1173_v47 = vpop.f32.mrb[5].mxu0  ;;  %6053 = vmatprep.subr.bf16.mxu0 %v6052_v32  ;;  %v6072_v31 = vpack.c.bf16 %v1432_v29, %v1430_v28  ;;  %v1429_v32 = vld [vmem:[%s10198_s3 + $0x2c0] sm:$0xff]  ;;  %v6076_v40 = vpack.c.bf16 %v1436_v36, %v1434_v35  ;;  %v1435_v42 = vld [vmem:[%s10198_s3 + $0x2f0] sm:$0xff]  ;;  %v5102_v28 = vld [vmem:[%s10172_s6 + $0x328] sm:$0xff] }
 0x118   : > { %v1318_v51 = vadd.f32 %v1296_v15, %v1173_v47  ;;  %1528 = vmatprep.mubr.f32.mxu0 %v1330_v41  ;;  %v7747_v54 = vpop.f32.mrb[4].mxu1  ;;  %v6074_v39 = vpack.c.bf16 %v1431_v34, %v1429_v32  ;;  %v1433_v41 = vld [vmem:[%s10198_s3 + $0x2e0] sm:$0xff]  ;;  %v1299_v47 = vsub.s32 2, %v7682_v9  ;;  %v5106_v32 = vld [vmem:[%s10172_s6 + $0x348] sm:$0xff] }
 0x119   : > { %1529 = vmatmul.mubr.f32.gmra.mrb[10].mxu0 %v1329_v45  ;;  %v7749_v57 = vpop.f32.mrb[5].mxu1  ;;  %v1333_v59 = vmax.f32 %v1317_v46, 0.0  ;;  %v1440_v45 = vld [vmem:[%s10198_s3 + $0x318] sm:$0xff]  ;;  %v6078_v46 = vpack.c.bf16 %v1435_v42, %v1433_v41  ;;  %v5097_v29 = vld [vmem:[%s10172_s6 + $0x300] sm:$0xff]  ;;  %v5110_v34 = vld [vmem:[%s10172_s6 + $0x368] sm:$0xff] }
 0x11a   : > { %v1334_v55 = vmax.f32 %v1318_v51, 0.0  ;;  %6055 = vmatpush1.bf16.msra.mxu0 %v6054_v44  ;;  %v1177_v56 = vpop.f32.mrb[6].mxu0  ;;  %v1438_v44 = vld [vmem:[%s10198_s3 + $0x308] sm:$0xff]  ;;  %v1320_v1 = vadd.f32 %v7739_v50, %v7749_v57  ;;  %v6248_v36 = vpack.c.bf16 %v5110_v34, %v5106_v32 }
 0x11b   : > { %v1321_v60 = vadd.f32 %v1292_v14, %v1177_v56  ;;  %v1179_v61 = vpop.f32.mrb[7].mxu0  ;;  %6057 = vmatprep.subr.bf16.mxu0 %v6056_v38  ;;  %v6080_v38 = vpack.c.bf16 %v1440_v45, %v1438_v44  ;;  %v1442_v51 = vld [vmem:[%s10198_s3 + $0x328] sm:$0xff] }
 0x11c   : > { %v1322_v2 = vadd.f32 %v1296_v15, %v1179_v61  ;;  %1534 = vmatprep.mubr.f32.mxu0 %v1334_v55  ;;  %v7764_v5 = vpop.f32.mrb[6].mxu1  ;;  %v6064_v15 = vpack.c.bf16 %v1424_v4, %v1422_v3  ;;  %v1300_v55 = vrot.slane %v7690_v12, %v1299_v47  ;;  %v6084_v56 = vpack.c.bf16 %v1444_v52, %v1442_v51  ;;  %v5114_v41 = vld [vmem:[%s10172_s6 + $0x388] sm:$0xff] }
 0x11d   : > { %1535 = vmatmul.mubr.f32.gmra.mrb[12].mxu0 %v1333_v59  ;;  %v7766_v14 = vpop.f32.mrb[7].mxu1  ;;  %v1337_v17 = vmax.f32 %v1321_v60, 0.0  ;;  %v1443_v59 = vld [vmem:[%s10198_s3 + $0x330] sm:$0xff]  ;;  %v1336_v4 = vmax.f32 %v1320_v1, 0.0  ;;  %v5118_v42 = vld [vmem:[%s10172_s6 + $0x3a8] sm:$0xff] }
 0x11e   : > { %v1338_v6 = vmax.f32 %v1322_v2, 0.0  ;;  %6059 = vmatpush1.bf16.msra.mxu0 %v6058_v58  ;;  %v1441_v58 = vld [vmem:[%s10198_s3 + $0x320] sm:$0xff]  ;;  %v1311_v61 = vadd.f32 %v1300_v55, %v7711_v24  ;;  %v1315_v63 = vadd.f32 %v1300_v55, %v7726_v33  ;;  %v1319_v3 = vadd.f32 %v1300_v55, %v7747_v54  ;;  %v5029_v54 = vld [vmem:[%s10170_s4 + $0x308] sm:$0xff] }
 0x11f   : > { %6061 = vmatprep.subr.bf16.mxu0 %v6060_v62  ;;  %v6086_v60 = vpack.c.bf16 %v1443_v59, %v1441_v58  ;;  %v1316_v62 = vadd.f32 %v7739_v50, %v7728_v43  ;;  %v1324_v24 = vadd.f32 %v7739_v50, %v7766_v14  ;;  %v1323_v33 = vadd.f32 %v1300_v55, %v7764_v5  ;;  %v5031_v50 = vld [vmem:[%s10170_s4 + $0x318] sm:$0xff]  ;;  %v5030_v5 = vld [vmem:[%s10170_s4 + $0x310] sm:$0xff]  ;;  %v5126_v51 = vld [vmem:[%s10172_s6 + $0x3e8] sm:$0xff] }
 0x120   : > { %1540 = vmatprep.mubr.f32.mxu0 %v1338_v6  ;;  %v1327_v12 = vmax.f32 %v1311_v61, 0.0  ;;  %v1331_v2 = vmax.f32 %v1315_v63, 0.0  ;;  %v1335_v43 = vmax.f32 %v1319_v3, 0.0  ;;  %v6132_v14 = vpack.c.bf16 %v5031_v50, %v5029_v54  ;;  %v5125_v55 = vld [vmem:[%s10172_s6 + $0x3e0] sm:$0xff]  ;;  %v1638_v59 = vld [vmem:[%s10170_s4 + $0x10] sm:$0xff]  ;;  %v5130_v63 = vld [vmem:[%s10172_s6 + $0x408] sm:$0xff] }
 0x121   : > { %1541 = vmatmul.mubr.f32.gmra.mrb[14].mxu0 %v1337_v17  ;;  %v1332_v0 = vmax.f32 %v1316_v62, 0.0  ;;  %v1340_v6 = vmax.f32 %v1324_v24, 0.0  ;;  %v1339_v57 = vmax.f32 %v1323_v33, 0.0  ;;  %v6252_v45 = vpack.c.bf16 %v5118_v42, %v5114_v41  ;;  %v1636_v58 = vld [vmem:[%s10170_s4] sm:$0xff]  ;;  %v1641_v62 = vld [vmem:[%s10170_s4 + $0x28] sm:$0xff] }
 0x122   : > { %6063 = vmatpush1.bf16.msra.mxu0 %v6062_v16  ;;  %4980 = vmatprep.mubr.msk.f32.mxu0 %vm1445_vm6, %v1328_v20  ;;  %v5028_v16 = vld [vmem:[%s10170_s4 + $0x300] sm:$0xff] }
 0x123   : > { %6065 = vmatprep.subr.bf16.mxu0 %v6064_v15  ;;  %v6134_v17 = vpack.c.bf16 %v5030_v5, %v5028_v16  ;;  %6133 = vmatprep.subr.bf16.mxu1 %v6132_v14  ;;  %v5033_v15 = vld [vmem:[%s10170_s4 + $0x328] sm:$0xff]  ;;  %v5032_v20 = vld [vmem:[%s10170_s4 + $0x320] sm:$0xff]  ;;  %v6142_v16 = vpack.c.bf16 %v1638_v59, %v1636_v58  ;;  %v1642_v5 = vld [vmem:[%s10170_s4 + $0x30] sm:$0xff] }
 0x124   : > { %v6136_v19 = vpack.c.bf16 %v5035_v18, %v5033_v15  ;;  %v6138_v22 = vpack.c.bf16 %v5034_v21, %v5032_v20  ;;  %v1640_v50 = vld [vmem:[%s10170_s4 + $0x20] sm:$0xff]  ;;  %v1649_v59 = vld [vmem:[%s10170_s4 + $0x68] sm:$0xff] }
 0x125   : > { %6135 = vmatpush1.bf16.msra.mxu1 %v6134_v17  ;;  %v5129_v18 = vld [vmem:[%s10172_s6 + $0x400] sm:$0xff] }
 0x126   : > { %6067 = vmatpush1.bf16.msra.mxu0 %v6066_v23  ;;  %6137 = vmatprep.subr.bf16.mxu1 %v6136_v19  ;;  %v1637_v23 = vld [vmem:[%s10170_s4 + $0x8] sm:$0xff]  ;;  %v5133_v19 = vld [vmem:[%s10172_s6 + $0x420] sm:$0xff] }
 0x127   : > { %6069 = vmatprep.subr.bf16.mxu0 %v6068_v25  ;;  %v1639_v25 = vld [vmem:[%s10170_s4 + $0x18] sm:$0xff]  ;;  %v5137_v42 = vld [vmem:[%s10172_s6 + $0x440] sm:$0xff] }
 0x128   : > { %v6140_v26 = vpack.c.bf16 %v1639_v25, %v1637_v23  ;;  %v5138_v25 = vld [vmem:[%s10172_s6 + $0x448] sm:$0xff] }
 0x129   : > { %6139 = vmatpush1.bf16.msra.mxu1 %v6138_v22 }
 0x12a   : > { %6071 = vmatpush1.bf16.msra.mxu0 %v6070_v30  ;;  %6141 = vmatprep.subr.bf16.mxu1 %v6140_v26  ;;  %v6244_v30 = vpack.c.bf16 %v5102_v28, %v5098_v27  ;;  %v5142_v26 = vld [vmem:[%s10172_s6 + $0x468] sm:$0xff] }
 0x12b   : > { %6073 = vmatprep.subr.bf16.mxu0 %v6072_v31  ;;  %v5101_v31 = vld [vmem:[%s10172_s6 + $0x320] sm:$0xff]  ;;  %v6264_v41 = vpack.c.bf16 %v5142_v26, %v5138_v25  ;;  %v1661_v25 = vld [vmem:[%s10170_s4 + $0xc8] sm:$0xff]  ;;  %v1663_v26 = vld [vmem:[%s10170_s4 + $0xd8] sm:$0xff] }
 0x12c   : > { %v6246_v35 = vpack.c.bf16 %v5101_v31, %v5097_v29  ;;  %v1647_v31 = vld [vmem:[%s10170_s4 + $0x58] sm:$0xff] }
 0x12e   : > { %6075 = vmatpush1.bf16.msra.mxu0 %v6074_v39  ;;  %v5105_v39 = vld [vmem:[%s10172_s6 + $0x340] sm:$0xff] }
 0x12f   : > { %6077 = vmatprep.subr.bf16.mxu0 %v6076_v40  ;;  %v5109_v40 = vld [vmem:[%s10172_s6 + $0x360] sm:$0xff] }
 0x130   : > { %v6250_v44 = vpack.c.bf16 %v5109_v40, %v5105_v39 }
 0x132   : > { %6079 = vmatpush1.bf16.msra.mxu0 %v6078_v46  ;;  %v5113_v46 = vld [vmem:[%s10172_s6 + $0x380] sm:$0xff] }
 0x133   : > { %6081 = vmatprep.subr.bf16.mxu0 %v6080_v38  ;;  %v5117_v38 = vld [vmem:[%s10172_s6 + $0x3a0] sm:$0xff] }
 0x136   : > { %6083 = vmatpush1.bf16.msra.mxu0 %v6082_v53  ;;  %v5121_v53 = vld [vmem:[%s10172_s6 + $0x3c0] sm:$0xff] }
 0x137   : > { %6085 = vmatprep.subr.bf16.mxu0 %v6084_v56  ;;  %v6254_v56 = vpack.c.bf16 %v5117_v38, %v5113_v46 }
 0x13a   : > { %6087 = vmatpush1.bf16.msra.mxu0 %v6086_v60  ;;  %v6256_v60 = vpack.c.bf16 %v5126_v51, %v5122_v49  ;;  %v1644_v49 = vld [vmem:[%s10170_s4 + $0x40] sm:$0xff]  ;;  %v1646_v51 = vld [vmem:[%s10170_s4 + $0x50] sm:$0xff] }
 0x13b   : > { %6245 = vmatprep.subr.bf16.mxu0 %v6244_v30  ;;  %v1645_v30 = vld [vmem:[%s10170_s4 + $0x48] sm:$0xff] }
 0x13c   : > { %v6148_v38 = vpack.c.bf16 %v1647_v31, %v1645_v30  ;;  %v1660_v30 = vld [vmem:[%s10170_s4 + $0xc0] sm:$0xff]  ;;  %v1662_v31 = vld [vmem:[%s10170_s4 + $0xd0] sm:$0xff] }
 0x13d   : > { %1612 = vmatmul.mubr.f32.vlgmr.msra.gmra.mrb[8].mxu0 %v1327_v12  ;;  %v6258_v12 = vpack.c.bf16 %v5125_v55, %v5121_v53 }
 0x13e   : > { %4981 = vmatprep.mubr.msk.f32.mxu0 %vm1445_vm6, %v1332_v0  ;;  %6247 = vmatpush1.bf16.msra.mxu0 %v6246_v35  ;;  %v5134_v0 = vld [vmem:[%s10172_s6 + $0x428] sm:$0xff]  ;;  %v6146_v35 = vpack.c.bf16 %v1642_v5, %v1640_v50  ;;  %v1654_v5 = vld [vmem:[%s10170_s4 + $0x90] sm:$0xff] }
 0x13f   : > { %6249 = vmatprep.subr.bf16.mxu0 %v6248_v36  ;;  %v6260_v15 = vpack.c.bf16 %v5134_v0, %v5130_v63  ;;  %v6262_v36 = vpack.c.bf16 %v5133_v19, %v5129_v18  ;;  %v1659_v18 = vld [vmem:[%s10170_s4 + $0xb8] sm:$0xff] }
 0x141   : > { %1618 = vmatmul.mubr.f32.gmra.mrb[10].mxu0 %v1331_v2 }
 0x142   : > { %4982 = vmatprep.mubr.msk.f32.mxu0 %vm1445_vm6, %v1336_v4  ;;  %6251 = vmatpush1.bf16.msra.mxu0 %v6250_v44  ;;  %v5141_v44 = vld [vmem:[%s10172_s6 + $0x460] sm:$0xff] }
 0x143   : > { %6253 = vmatprep.subr.bf16.mxu0 %v6252_v45  ;;  %v6266_v63 = vpack.c.bf16 %v5141_v44, %v5137_v42  ;;  %v1669_v42 = vld [vmem:[%s10170_s4 + $0x108] sm:$0xff]  ;;  %v1671_v44 = vld [vmem:[%s10170_s4 + $0x118] sm:$0xff] }
 0x145   : > { %1624 = vmatmul.mubr.f32.gmra.mrb[12].mxu0 %v1335_v43  ;;  %v1643_v43 = vld [vmem:[%s10170_s4 + $0x38] sm:$0xff] }
 0x146   : > { %4983 = vmatprep.mubr.msk.f32.mxu0 %vm1445_vm6, %v1340_v6  ;;  %6255 = vmatpush1.bf16.msra.mxu0 %v6254_v56  ;;  %v6144_v22 = vpack.c.bf16 %v1643_v43, %v1641_v62  ;;  %v1648_v43 = vld [vmem:[%s10170_s4 + $0x60] sm:$0xff]  ;;  %vm4106_vm6 = vcmask 97280  }
 0x147   : > { %6257 = vmatprep.subr.bf16.mxu0 %v6256_v60  ;;  %v1651_v60 = vld [vmem:[%s10170_s4 + $0x78] sm:$0xff] }
 0x149   : > { %1630 = vmatmul.mubr.f32.gmra.mrb[14].mxu0 %v1339_v57 }
 0x14a   : > { %6259 = vmatpush1.bf16.msra.mxu0 %v6258_v12 }
 0x14b   : > { %6261 = vmatprep.subr.bf16.mxu0 %v6260_v15  ;;  %v1657_v15 = vld [vmem:[%s10170_s4 + $0xa8] sm:$0xff] }
 0x14c   : > { %v6160_v19 = vpack.c.bf16 %v1659_v18, %v1657_v15  ;;  %v1684_v18 = vld [vmem:[%s10170_s4 + $0x180] sm:$0xff] }
 0x14e   : > { %6263 = vmatpush1.bf16.msra.mxu0 %v6262_v36 }
 0x14f   : > { %6265 = vmatprep.subr.bf16.mxu0 %v6264_v41  ;;  %v1666_v41 = vld [vmem:[%s10170_s4 + $0xf0] sm:$0xff] }
 0x152   : > { %6267 = vmatpush1.bf16.msra.mxu0 %v6266_v63 }
 0x210   : > { %v7918_v48 = vpop.f32.mrb[8].mxu0 }
 0x211   : > { %v7926_v52 = vpop.f32.mrb[9].mxu0  ;;  %v1749_v1 = vrot.slane %v7918_v48, 1  ;;  %v1998_v2 = vrot.slane %v7918_v48, 2 }
 0x212   : > { %v1752_v33 = vrot.slane %v7926_v52, 1  ;;  %v2001_v6 = vrot.slane %v7926_v52, 2 }
 0x214   : > { %v7940_v61 = vpop.f32.mrb[10].mxu0 }
 0x215   : > { %v1750_v3 = vrot.slane %v7940_v61, 1  ;;  %v1999_v4 = vrot.slane %v7940_v61, 2  ;;  %v7955_v24 = vpop.f32.mrb[11].mxu0 }
 0x216   : > { %v1753_v57 = vrot.slane %v7955_v24, 1  ;;  %v2002_v54 = vrot.slane %v7955_v24, 2 }
 0x217   : > { %v1751_v14 = vsel %vm642_vm3, %v1749_v1, %v1750_v3  ;;  %v7972_v17 = vsel %vm1065_vm5, %v1998_v2, %v1999_v4  ;;  %v6150_v1 = vpack.c.bf16 %v1646_v51, %v1644_v49  ;;  %v1670_v49 = vld [vmem:[%s10170_s4 + $0x110] sm:$0xff]  ;;  %v1673_v51 = vld [vmem:[%s10170_s4 + $0x128] sm:$0xff] }
 0x218   : > { %v7980_v20 = vpop.f32.mrb[12].mxu0  ;;  %v1754_v21 = vsel %vm642_vm3, %v1752_v33, %v1753_v57  ;;  %v7984_v23 = vsel %vm1065_vm5, %v2001_v6, %v2002_v54  ;;  %v1650_v33 = vld [vmem:[%s10170_s4 + $0x70] sm:$0xff] }
 0x219   : > { %v1755_v27 = vrot.slane %v7980_v20, 1  ;;  %v2004_v28 = vrot.slane %v7980_v20, 2  ;;  %v7994_v29 = vpop.f32.mrb[13].mxu0  ;;  %5036 = vmatprep.mubr.msk.f32.mxu1 %vm1766_vm7, %v1754_v21  ;;  %v6154_v50 = vpack.c.bf16 %v1650_v33, %v1648_v43  ;;  %v1656_v21 = vld [vmem:[%s10170_s4 + $0xa0] sm:$0xff]  ;;  %v1683_v43 = vld [vmem:[%s10170_s4 + $0x178] sm:$0xff] }
 0x21a   : > { %v1757_v32 = vrot.slane %v7994_v29, 1  ;;  %v2006_v34 = vrot.slane %v7994_v29, 2  ;;  %1838 = vmatmul.mubr.f32.vlgmr.msra.gmra.mrb[8].mxu1 %v1751_v14 }
 0x21b   : > { %6143 = vmatpush1.bf16.msra.mxu1 %v6142_v16  ;;  %v1756_v39 = vsel %vm642_vm3, %v1750_v3, %v1755_v27  ;;  %v8007_v40 = vsel %vm1065_vm5, %v1999_v4, %v2004_v28  ;;  %v6152_v4 = vpack.c.bf16 %v1651_v60, %v1649_v59  ;;  %v1652_v16 = vld [vmem:[%s10170_s4 + $0x80] sm:$0xff]  ;;  %v1674_v60 = vld [vmem:[%s10170_s4 + $0x130] sm:$0xff] }
 0x21c   : > { %v1631_v45 = vpop.f32.mrb[14].mxu0  ;;  %v1758_v46 = vsel %vm642_vm3, %v1753_v57, %v1757_v32  ;;  %6145 = vmatprep.subr.bf16.mxu1 %v6144_v22  ;;  %v8023_v53 = vsel %vm1065_vm5, %v2002_v54, %v2006_v34  ;;  %v1653_v57 = vld [vmem:[%s10170_s4 + $0x88] sm:$0xff]  ;;  %v1655_v54 = vld [vmem:[%s10170_s4 + $0x98] sm:$0xff]  ;;  %v1658_v22 = vld [vmem:[%s10170_s4 + $0xb0] sm:$0xff] }
 0x21d   : > { %v1759_v55 = vrot.slane %v1631_v45, 1  ;;  %v2008_v56 = vrot.slane %v1631_v45, 2  ;;  %v1633_v58 = vpop.f32.mrb[15].mxu0  ;;  %5037 = vmatprep.mubr.msk.f32.mxu1 %vm1766_vm7, %v1758_v46  ;;  %v6156_v14 = vpack.c.bf16 %v1655_v54, %v1653_v57  ;;  %v6172_v46 = vpack.c.bf16 %v1671_v44, %v1669_v42  ;;  %v1672_v59 = vld [vmem:[%s10170_s4 + $0x120] sm:$0xff] }
 0x21e   : > { %v1761_v62 = vrot.slane %v1633_v58, 1  ;;  %v2010_v12 = vrot.slane %v1633_v58, 2  ;;  %1844 = vmatmul.mubr.f32.gmra.mrb[10].mxu1 %v1756_v39  ;;  %v1664_v39 = vld [vmem:[%s10170_s4 + $0xe0] sm:$0xff]  ;;  %v6178_v63 = vpack.c.bf16 %v1674_v60, %v1672_v59  ;;  %v5060_v59 = vld [vmem:[%s10170_s4 + $0x3d0] sm:$0xff]  ;;  %v5063_v60 = vld [vmem:[%s10170_s4 + $0x3e8] sm:$0xff] }
 0x21f   : > { %6147 = vmatpush1.bf16.msra.mxu1 %v6146_v35  ;;  %v1760_v0 = vsel %vm642_vm3, %v1755_v27, %v1759_v55  ;;  %v8034_v2 = vsel %vm1065_vm5, %v2004_v28, %v2008_v56  ;;  %v6162_v27 = vpack.c.bf16 %v1658_v22, %v1656_v21  ;;  %v6164_v28 = vpack.c.bf16 %v1663_v26, %v1661_v25  ;;  %v1675_v55 = vld [vmem:[%s10170_s4 + $0x138] sm:$0xff]  ;;  %v1680_v54 = vld [vmem:[%s10170_s4 + $0x160] sm:$0xff] }
 0x220   : > { %v1762_v3 = vsel %vm642_vm3, %v1757_v32, %v1761_v62  ;;  %6149 = vmatprep.subr.bf16.mxu1 %v6148_v38  ;;  %v8044_v6 = vsel %vm1065_vm5, %v2006_v34, %v2010_v12  ;;  %v1665_v32 = vld [vmem:[%s10170_s4 + $0xe8] sm:$0xff]  ;;  %v1667_v34 = vld [vmem:[%s10170_s4 + $0xf8] sm:$0xff]  ;;  %v6166_v35 = vpack.c.bf16 %v1662_v31, %v1660_v30  ;;  %v6170_v45 = vpack.c.bf16 %v1666_v41, %v1664_v39  ;;  %v1668_v38 = vld [vmem:[%s10170_s4 + $0x100] sm:$0xff] }
 0x221   : > { %5038 = vmatprep.mubr.msk.f32.mxu1 %vm1766_vm7, %v1762_v3  ;;  %v6168_v36 = vpack.c.bf16 %v1667_v34, %v1665_v32  ;;  %v6174_v56 = vpack.c.bf16 %v1670_v49, %v1668_v38  ;;  %v6176_v58 = vpack.c.bf16 %v1675_v55, %v1673_v51  ;;  %v1677_v62 = vld [vmem:[%s10170_s4 + $0x148] sm:$0xff]  ;;  %v1679_v12 = vld [vmem:[%s10170_s4 + $0x158] sm:$0xff]  ;;  %v1678_v3 = vld [vmem:[%s10170_s4 + $0x150] sm:$0xff] }
 0x222   : > { %1850 = vmatmul.mubr.f32.gmra.mrb[12].mxu1 %v1760_v0  ;;  %v6180_v0 = vpack.c.bf16 %v1679_v12, %v1677_v62  ;;  %v5045_v21 = vld [vmem:[%s10170_s4 + $0x358] sm:$0xff]  ;;  %v5042_v26 = vld [vmem:[%s10170_s4 + $0x340] sm:$0xff]  ;;  %v5056_v51 = vld [vmem:[%s10170_s4 + $0x3b0] sm:$0xff] }
 0x223   : > { %6151 = vmatpush1.bf16.msra.mxu1 %v6150_v1  ;;  %5039 = vmatprep.mubr.msk.f32.mxu1 %vm1766_vm7, %v7926_v52  ;;  %v6158_v52 = vpack.c.bf16 %v1654_v5, %v1652_v16  ;;  %v1676_v1 = vld [vmem:[%s10170_s4 + $0x140] sm:$0xff]  ;;  %v1687_v16 = vld [vmem:[%s10170_s4 + $0x198] sm:$0xff]  ;;  %v5059_v55 = vld [vmem:[%s10170_s4 + $0x3c8] sm:$0xff] }
 0x224   : > { %6153 = vmatprep.subr.bf16.mxu1 %v6152_v4  ;;  %v1681_v4 = vld [vmem:[%s10170_s4 + $0x168] sm:$0xff]  ;;  %v6182_v33 = vpack.c.bf16 %v1678_v3, %v1676_v1  ;;  %v5049_v30 = vld [vmem:[%s10170_s4 + $0x378] sm:$0xff]  ;;  %v5046_v34 = vld [vmem:[%s10170_s4 + $0x360] sm:$0xff] }
 0x225   : > { %v6184_v57 = vpack.c.bf16 %v1683_v43, %v1681_v4  ;;  %v5053_v39 = vld [vmem:[%s10170_s4 + $0x398] sm:$0xff]  ;;  %v5050_v44 = vld [vmem:[%s10170_s4 + $0x380] sm:$0xff] }
 0x226   : > { %v5054_v49 = vld [vmem:[%s10170_s4 + $0x3a0] sm:$0xff]  ;;  %v5069_v1 = vld [vmem:[%s10170_s4 + $0x418] sm:$0xff] }
 0x227   : > { %6155 = vmatpush1.bf16.msra.mxu1 %v6154_v50  ;;  %v1682_v50 = vld [vmem:[%s10170_s4 + $0x170] sm:$0xff]  ;;  %v5062_v12 = vld [vmem:[%s10170_s4 + $0x3e0] sm:$0xff] }
 0x228   : > { %6157 = vmatprep.subr.bf16.mxu1 %v6156_v14  ;;  %v1685_v14 = vld [vmem:[%s10170_s4 + $0x188] sm:$0xff]  ;;  %v6186_v5 = vpack.c.bf16 %v1682_v50, %v1680_v54  ;;  %v5066_v43 = vld [vmem:[%s10170_s4 + $0x400] sm:$0xff]  ;;  %v5073_v54 = vld [vmem:[%s10170_s4 + $0x438] sm:$0xff] }
 0x229   : > { %v6188_v15 = vpack.c.bf16 %v1687_v16, %v1685_v14  ;;  %v5070_v16 = vld [vmem:[%s10170_s4 + $0x420] sm:$0xff] }
 0x22b   : > { %6159 = vmatpush1.bf16.msra.mxu1 %v6158_v52  ;;  %v1686_v52 = vld [vmem:[%s10170_s4 + $0x190] sm:$0xff] }
 0x22c   : > { %6161 = vmatprep.subr.bf16.mxu1 %v6160_v19  ;;  %v5043_v19 = vld [vmem:[%s10170_s4 + $0x348] sm:$0xff]  ;;  %v6190_v22 = vpack.c.bf16 %v1686_v52, %v1684_v18  ;;  %v5077_v18 = vld [vmem:[%s10170_s4 + $0x458] sm:$0xff] }
 0x22d   : > { %v6192_v25 = vpack.c.bf16 %v5045_v21, %v5043_v19  ;;  %v5074_v21 = vld [vmem:[%s10170_s4 + $0x440] sm:$0xff] }
 0x22f   : > { %6163 = vmatpush1.bf16.msra.mxu1 %v6162_v27  ;;  %v5044_v27 = vld [vmem:[%s10170_s4 + $0x350] sm:$0xff] }
 0x230   : > { %6165 = vmatprep.subr.bf16.mxu1 %v6164_v28  ;;  %v5047_v28 = vld [vmem:[%s10170_s4 + $0x368] sm:$0xff]  ;;  %v6194_v31 = vpack.c.bf16 %v5044_v27, %v5042_v26  ;;  %v5081_v26 = vld [vmem:[%s10170_s4 + $0x478] sm:$0xff] }
 0x231   : > { %v6196_v32 = vpack.c.bf16 %v5049_v30, %v5047_v28  ;;  %v5078_v30 = vld [vmem:[%s10170_s4 + $0x460] sm:$0xff] }
 0x233   : > { %6167 = vmatpush1.bf16.msra.mxu1 %v6166_v35  ;;  %v5048_v35 = vld [vmem:[%s10170_s4 + $0x370] sm:$0xff] }
 0x234   : > { %6169 = vmatprep.subr.bf16.mxu1 %v6168_v36  ;;  %v5051_v36 = vld [vmem:[%s10170_s4 + $0x388] sm:$0xff]  ;;  %v6198_v41 = vpack.c.bf16 %v5048_v35, %v5046_v34  ;;  %v5085_v34 = vld [vmem:[%s10170_s4 + $0x498] sm:$0xff] }
 0x235   : > { %v6200_v42 = vpack.c.bf16 %v5053_v39, %v5051_v36  ;;  %v5082_v39 = vld [vmem:[%s10170_s4 + $0x480] sm:$0xff] }
 0x237   : > { %6171 = vmatpush1.bf16.msra.mxu1 %v6170_v45  ;;  %v5052_v45 = vld [vmem:[%s10170_s4 + $0x390] sm:$0xff] }
 0x238   : > { %6173 = vmatprep.subr.bf16.mxu1 %v6172_v46  ;;  %v5055_v46 = vld [vmem:[%s10170_s4 + $0x3a8] sm:$0xff] }
 0x23b   : > { %6175 = vmatpush1.bf16.msra.mxu1 %v6174_v56 }
 0x23c   : > { %6177 = vmatprep.subr.bf16.mxu1 %v6176_v58  ;;  %v5058_v58 = vld [vmem:[%s10170_s4 + $0x3c0] sm:$0xff] }
 0x23f   : > { %6179 = vmatpush1.bf16.msra.mxu1 %v6178_v63  ;;  %v5064_v63 = vld [vmem:[%s10170_s4 + $0x3f0] sm:$0xff] }
 0x240   : > { %6181 = vmatprep.subr.bf16.mxu1 %v6180_v0  ;;  %v5067_v0 = vld [vmem:[%s10170_s4 + $0x408] sm:$0xff]  ;;  %v6214_v3 = vpack.c.bf16 %v5064_v63, %v5062_v12 }
 0x241   : > { %v6216_v4 = vpack.c.bf16 %v5069_v1, %v5067_v0  ;;  %v5162_v63 = vld [vmem:[%s10172_s6 + $0x508] sm:$0xff] }
 0x242   : > { %v5166_v0 = vld [vmem:[%s10172_s6 + $0x528] sm:$0xff] }
 0x243   : > { %6183 = vmatpush1.bf16.msra.mxu1 %v6182_v33  ;;  %v5068_v33 = vld [vmem:[%s10170_s4 + $0x410] sm:$0xff]  ;;  %v6276_v1 = vpack.c.bf16 %v5166_v0, %v5162_v63 }
 0x244   : > { %6185 = vmatprep.subr.bf16.mxu1 %v6184_v57  ;;  %v5071_v57 = vld [vmem:[%s10170_s4 + $0x428] sm:$0xff]  ;;  %v6218_v50 = vpack.c.bf16 %v5068_v33, %v5066_v43 }
 0x245   : > { %v6220_v14 = vpack.c.bf16 %v5073_v54, %v5071_v57  ;;  %v5170_v33 = vld [vmem:[%s10172_s6 + $0x548] sm:$0xff] }
 0x246   : > { %v5174_v57 = vld [vmem:[%s10172_s6 + $0x568] sm:$0xff] }
 0x247   : > { %6187 = vmatpush1.bf16.msra.mxu1 %v6186_v5  ;;  %v5072_v5 = vld [vmem:[%s10170_s4 + $0x430] sm:$0xff]  ;;  %v6280_v54 = vpack.c.bf16 %v5174_v57, %v5170_v33 }
 0x248   : > { %6189 = vmatprep.subr.bf16.mxu1 %v6188_v15  ;;  %v5075_v15 = vld [vmem:[%s10170_s4 + $0x448] sm:$0xff]  ;;  %v6222_v52 = vpack.c.bf16 %v5072_v5, %v5070_v16 }
 0x249   : > { %v6224_v19 = vpack.c.bf16 %v5077_v18, %v5075_v15  ;;  %v5178_v5 = vld [vmem:[%s10172_s6 + $0x588] sm:$0xff] }
 0x24a   : > { %v5182_v15 = vld [vmem:[%s10172_s6 + $0x5a8] sm:$0xff] }
 0x24b   : > { %6191 = vmatpush1.bf16.msra.mxu1 %v6190_v22  ;;  %v5076_v22 = vld [vmem:[%s10170_s4 + $0x450] sm:$0xff]  ;;  %v6284_v18 = vpack.c.bf16 %v5182_v15, %v5178_v5 }
 0x24c   : > { %6193 = vmatprep.subr.bf16.mxu1 %v6192_v25  ;;  %v5079_v25 = vld [vmem:[%s10170_s4 + $0x468] sm:$0xff]  ;;  %v6226_v27 = vpack.c.bf16 %v5076_v22, %v5074_v21 }
 0x24d   : > { %v6228_v28 = vpack.c.bf16 %v5081_v26, %v5079_v25  ;;  %v5186_v22 = vld [vmem:[%s10172_s6 + $0x5c8] sm:$0xff]  ;;  %v5185_v26 = vld [vmem:[%s10172_s6 + $0x5c0] sm:$0xff] }
 0x24e   : > { %1927 = vmatmul.mubr.f32.vlgmr.msra.gmra.mrb[8].mxu1 %v7918_v48  ;;  %v5057_v48 = vld [vmem:[%s10170_s4 + $0x3b8] sm:$0xff]  ;;  %v5190_v25 = vld [vmem:[%s10172_s6 + $0x5e8] sm:$0xff] }
 0x24f   : > { %5040 = vmatprep.mubr.msk.f32.mxu1 %vm1766_vm7, %v7955_v24  ;;  %6195 = vmatpush1.bf16.msra.mxu1 %v6194_v31  ;;  %v6202_v24 = vpack.c.bf16 %v5052_v45, %v5050_v44  ;;  %v6204_v38 = vpack.c.bf16 %v5057_v48, %v5055_v46  ;;  %v5080_v31 = vld [vmem:[%s10170_s4 + $0x470] sm:$0xff]  ;;  %v5089_v44 = vld [vmem:[%s10170_s4 + $0x4b8] sm:$0xff]  ;;  %v5086_v48 = vld [vmem:[%s10170_s4 + $0x4a0] sm:$0xff] }
 0x250   : > { %6197 = vmatprep.subr.bf16.mxu1 %v6196_v32  ;;  %v5083_v32 = vld [vmem:[%s10170_s4 + $0x488] sm:$0xff]  ;;  %v6230_v35 = vpack.c.bf16 %v5080_v31, %v5078_v30  ;;  %v5100_v31 = vld [vmem:[%s10172_s6 + $0x318] sm:$0xff] }
 0x251   : > { %v6232_v36 = vpack.c.bf16 %v5085_v34, %v5083_v32  ;;  %v5104_v32 = vld [vmem:[%s10172_s6 + $0x338] sm:$0xff] }
 0x252   : > { %1933 = vmatmul.mubr.f32.gmra.mrb[10].mxu1 %v7940_v61  ;;  %v5061_v61 = vld [vmem:[%s10170_s4 + $0x3d8] sm:$0xff]  ;;  %v6292_v34 = vpack.c.bf16 %v5104_v32, %v5100_v31 }
 0x253   : > { %5041 = vmatprep.mubr.msk.f32.mxu1 %vm1766_vm7, %v7994_v29  ;;  %6199 = vmatpush1.bf16.msra.mxu1 %v6198_v41  ;;  %v6206_v29 = vpack.c.bf16 %v5056_v51, %v5054_v49  ;;  %v6208_v56 = vpack.c.bf16 %v5061_v61, %v5059_v55  ;;  %v5084_v41 = vld [vmem:[%s10170_s4 + $0x490] sm:$0xff]  ;;  %v5093_v49 = vld [vmem:[%s10170_s4 + $0x4d8] sm:$0xff]  ;;  %v5090_v61 = vld [vmem:[%s10170_s4 + $0x4c0] sm:$0xff] }
 0x254   : > { %6201 = vmatprep.subr.bf16.mxu1 %v6200_v42  ;;  %v5087_v42 = vld [vmem:[%s10170_s4 + $0x4a8] sm:$0xff]  ;;  %v6234_v45 = vpack.c.bf16 %v5084_v41, %v5082_v39 }
 0x255   : > { %v6236_v46 = vpack.c.bf16 %v5089_v44, %v5087_v42 }
 0x256   : > { %1939 = vmatmul.mubr.f32.gmra.mrb[12].mxu1 %v7980_v20  ;;  %v5065_v20 = vld [vmem:[%s10170_s4 + $0x3f8] sm:$0xff] }
 0x257   : > { %6203 = vmatpush1.bf16.msra.mxu1 %v6202_v24  ;;  %5094 = vmatprep.mubr.msk.f32.mxu1 %vm1766_vm7, %v7984_v23  ;;  %v6210_v23 = vpack.c.bf16 %v5060_v59, %v5058_v58  ;;  %v6212_v62 = vpack.c.bf16 %v5065_v20, %v5063_v60  ;;  %v5088_v24 = vld [vmem:[%s10170_s4 + $0x4b0] sm:$0xff]  ;;  %v5146_v58 = vld [vmem:[%s10172_s6 + $0x488] sm:$0xff] }
 0x258   : > { %6205 = vmatprep.subr.bf16.mxu1 %v6204_v38  ;;  %v5091_v38 = vld [vmem:[%s10170_s4 + $0x4c8] sm:$0xff]  ;;  %v6238_v51 = vpack.c.bf16 %v5088_v24, %v5086_v48 }
 0x259   : > { %v6240_v55 = vpack.c.bf16 %v5093_v49, %v5091_v38  ;;  %v5158_v60 = vld [vmem:[%s10172_s6 + $0x4e8] sm:$0xff] }
 0x25b   : > { %6207 = vmatpush1.bf16.msra.mxu1 %v6206_v29  ;;  %v5092_v29 = vld [vmem:[%s10170_s4 + $0x4d0] sm:$0xff] }
 0x25c   : > { %6209 = vmatprep.subr.bf16.mxu1 %v6208_v56  ;;  %v6242_v56 = vpack.c.bf16 %v5092_v29, %v5090_v61 }
 0x25f   : > { %6211 = vmatpush1.bf16.msra.mxu1 %v6210_v23  ;;  %v5153_v23 = vld [vmem:[%s10172_s6 + $0x4c0] sm:$0xff] }
 0x260   : > { %6213 = vmatprep.subr.bf16.mxu1 %v6212_v62  ;;  %v5157_v62 = vld [vmem:[%s10172_s6 + $0x4e0] sm:$0xff] }
 0x261   : > { %v6274_v12 = vpack.c.bf16 %v5157_v62, %v5153_v23 }
 0x263   : > { %6215 = vmatpush1.bf16.msra.mxu1 %v6214_v3  ;;  %v5161_v3 = vld [vmem:[%s10172_s6 + $0x500] sm:$0xff] }
 0x264   : > { %6217 = vmatprep.subr.bf16.mxu1 %v6216_v4  ;;  %v5165_v4 = vld [vmem:[%s10172_s6 + $0x520] sm:$0xff] }
 0x265   : > { %v6278_v43 = vpack.c.bf16 %v5165_v4, %v5161_v3  ;;  %v5099_v4 = vld [vmem:[%s10172_s6 + $0x310] sm:$0xff] }
 0x267   : > { %6219 = vmatpush1.bf16.msra.mxu1 %v6218_v50  ;;  %v5169_v50 = vld [vmem:[%s10172_s6 + $0x540] sm:$0xff] }
 0x268   : > { %6221 = vmatprep.subr.bf16.mxu1 %v6220_v14  ;;  %v5173_v14 = vld [vmem:[%s10172_s6 + $0x560] sm:$0xff] }
 0x269   : > { %v6282_v16 = vpack.c.bf16 %v5173_v14, %v5169_v50  ;;  %v5112_v50 = vld [vmem:[%s10172_s6 + $0x378] sm:$0xff] }
 0x26b   : > { %6223 = vmatpush1.bf16.msra.mxu1 %v6222_v52  ;;  %v5177_v52 = vld [vmem:[%s10172_s6 + $0x580] sm:$0xff] }
 0x26c   : > { %6225 = vmatprep.subr.bf16.mxu1 %v6224_v19  ;;  %v5181_v19 = vld [vmem:[%s10172_s6 + $0x5a0] sm:$0xff] }
 0x26d   : > { %v6286_v21 = vpack.c.bf16 %v5181_v19, %v5177_v52  ;;  %v5107_v19 = vld [vmem:[%s10172_s6 + $0x350] sm:$0xff] }
 0x26f   : > { %6227 = vmatpush1.bf16.msra.mxu1 %v6226_v27  ;;  %v6288_v27 = vpack.c.bf16 %v5190_v25, %v5186_v22 }
 0x270   : > { %6229 = vmatprep.subr.bf16.mxu1 %v6228_v28  ;;  %v5189_v28 = vld [vmem:[%s10172_s6 + $0x5e0] sm:$0xff] }
 0x271   : > { %v6290_v30 = vpack.c.bf16 %v5189_v28, %v5185_v26  ;;  %v5116_v28 = vld [vmem:[%s10172_s6 + $0x398] sm:$0xff] }
 0x273   : > { %6231 = vmatpush1.bf16.msra.mxu1 %v6230_v35  ;;  %v2110_v35 = vld [vmem:[%s10171_s5] sm:$0x3] }
 0x274   : > { %6233 = vmatprep.subr.bf16.mxu1 %v6232_v36  ;;  %v2115_v36 = vrot.slane %v2110_v35, %v7685_v11  ;;  %v2119_v39 = vrot.slane %v2110_v35, %v7693_v13 }
 0x277   : > { %6235 = vmatpush1.bf16.msra.mxu1 %v6234_v45 }
 0x278   : > { %6237 = vmatprep.subr.bf16.mxu1 %v6236_v46 }
 0x27b   : > { %6239 = vmatpush1.bf16.msra.mxu1 %v6238_v51 }
 0x27c   : > { %6241 = vmatprep.subr.bf16.mxu1 %v6240_v55 }
 0x27f   : > { %6243 = vmatpush1.bf16.msra.mxu1 %v6242_v56 }
 0x282   : > { %2086 = vmatmul.mubr.f32.vlgmr.msra.gmra.mrb[8].mxu1 %v7972_v17  ;;  %v5150_v17 = vld [vmem:[%s10172_s6 + $0x4a8] sm:$0xff] }
 0x283   : > { %5095 = vmatprep.mubr.msk.f32.mxu1 %vm1766_vm7, %v8023_v53  ;;  %v6268_v59 = vpack.c.bf16 %v5150_v17, %v5146_v58  ;;  %v5149_v53 = vld [vmem:[%s10172_s6 + $0x4a0] sm:$0xff] }
 0x285   : > { %6269 = vmatprep.subr.bf16.mxu0 %v6268_v59 }
 0x286   : > { %2092 = vmatmul.mubr.f32.gmra.mrb[10].mxu1 %v8007_v40  ;;  %v5145_v40 = vld [vmem:[%s10172_s6 + $0x480] sm:$0xff] }
 0x287   : > { %5096 = vmatprep.mubr.msk.f32.mxu1 %vm1766_vm7, %v8044_v6  ;;  %v5154_v6 = vld [vmem:[%s10172_s6 + $0x4c8] sm:$0xff] }
 0x288   : > { %v6272_v20 = vpack.c.bf16 %v5158_v60, %v5154_v6 }
 0x28a   : > { %2098 = vmatmul.mubr.f32.gmra.mrb[12].mxu1 %v8034_v2  ;;  %v6270_v2 = vpack.c.bf16 %v5149_v53, %v5145_v40 }
 0x28b   : > { %3245 = vmatprep.mubr.f32.mxu1 %v6983_v7 }
 0x28c   : > { %6271 = vmatpush1.bf16.msra.mxu0 %v6270_v2 }
 0x28d   : > { %6273 = vmatprep.subr.bf16.mxu0 %v6272_v20 }
 0x290   : > { %6275 = vmatpush1.bf16.msra.mxu0 %v6274_v12 }
 0x291   : > { %6277 = vmatprep.subr.bf16.mxu0 %v6276_v1 }
 0x294   : > { %6279 = vmatpush1.bf16.msra.mxu0 %v6278_v43  ;;  %v5103_v43 = vld [vmem:[%s10172_s6 + $0x330] sm:$0xff] }
 0x295   : > { %6281 = vmatprep.subr.bf16.mxu0 %v6280_v54  ;;  %v5108_v54 = vld [vmem:[%s10172_s6 + $0x358] sm:$0xff]  ;;  %v6294_v15 = vpack.c.bf16 %v5103_v43, %v5099_v4 }
 0x296   : > { %v6296_v52 = vpack.c.bf16 %v5112_v50, %v5108_v54  ;;  %v5151_v54 = vld [vmem:[%s10172_s6 + $0x4b0] sm:$0xff]  ;;  %v5156_v50 = vld [vmem:[%s10172_s6 + $0x4d8] sm:$0xff] }
 0x298   : > { %6283 = vmatpush1.bf16.msra.mxu0 %v6282_v16 }
 0x299   : > { %6285 = vmatprep.subr.bf16.mxu0 %v6284_v18 }
 0x29c   : > { %6287 = vmatpush1.bf16.msra.mxu0 %v6286_v21  ;;  %v5111_v21 = vld [vmem:[%s10172_s6 + $0x370] sm:$0xff] }
 0x29d   : > { %6289 = vmatprep.subr.bf16.mxu0 %v6288_v27  ;;  %v6298_v35 = vpack.c.bf16 %v5111_v21, %v5107_v19  ;;  %v5168_v19 = vld [vmem:[%s10172_s6 + $0x538] sm:$0xff] }
 0x2a0   : > { %6291 = vmatpush1.bf16.msra.mxu0 %v6290_v30  ;;  %v5120_v30 = vld [vmem:[%s10172_s6 + $0x3b8] sm:$0xff] }
 0x2a1   : > { %6293 = vmatprep.subr.bf16.mxu0 %v6292_v34 }
 0x355   : > { %v2087_v41 = vpop.f32.mrb[8].mxu1 }
 0x356   : > { %v2122_v42 = vadd.f32 %v2115_v36, %v2087_v41  ;;  %v2089_v44 = vpop.f32.mrb[9].mxu1  ;;  %v5115_v41 = vld [vmem:[%s10172_s6 + $0x390] sm:$0xff] }
 0x357   : > { %v2123_v45 = vadd.f32 %v2119_v39, %v2089_v44 }
 0x358   : > { %v2128_v46 = vmax.f32 %v2122_v42, 0.0  ;;  %v5119_v42 = vld [vmem:[%s10172_s6 + $0x3b0] sm:$0xff] }
 0x359   : > { %v2129_v48 = vmax.f32 %v2123_v45, 0.0  ;;  %v2093_v24 = vpop.f32.mrb[10].mxu1 }
 0x35a   : > { %v2150_v38 = vrot.slane %v2128_v46, 7  ;;  %v2124_v49 = vadd.f32 %v2115_v36, %v2093_v24  ;;  %v2095_v51 = vpop.f32.mrb[11].mxu1  ;;  %v5124_v46 = vld [vmem:[%s10172_s6 + $0x3d8] sm:$0xff] }
 0x35b   : > { %v2151_v55 = vrot.slane %v2129_v48, 7  ;;  %v2125_v61 = vadd.f32 %v2119_v39, %v2095_v51  ;;  %v5128_v48 = vld [vmem:[%s10172_s6 + $0x3f8] sm:$0xff]  ;;  %v5123_v51 = vld [vmem:[%s10172_s6 + $0x3d0] sm:$0xff] }
 0x35c   : > { %2168 = vst [vmem:[#allocation2] sm:$0xfe] %v2150_v38  ;;  %v2130_v29 = vmax.f32 %v2124_v49, 0.0  ;;  %v6304_v49 = vpack.c.bf16 %v5128_v48, %v5124_v46  ;;  %v5184_v46 = vld [vmem:[%s10172_s6 + $0x5b8] sm:$0xff] }
 0x35d   : > { %2170 = vst.msk [vmem:[#allocation2 + $0x8] sm:$0xfe] %vm2169_vm9, %v2151_v55  ;;  %v2131_v56 = vmax.f32 %v2125_v61, 0.0  ;;  %v2099_v58 = vpop.f32.mrb[12].mxu1 }
 0x35e   : > { %v2152_v17 = vrot.slane %v2130_v29, 7  ;;  %v2126_v59 = vadd.f32 %v2115_v36, %v2099_v58  ;;  %v2101_v40 = vpop.f32.mrb[13].mxu1  ;;  %v5132_v29 = vld [vmem:[%s10172_s6 + $0x418] sm:$0xff] }
 0x35f   : > { %v2154_v53 = vrot.slane %v2131_v56, 7  ;;  %v2127_v2 = vadd.f32 %v2119_v39, %v2101_v40  ;;  %v6300_v39 = vpack.c.bf16 %v5120_v30, %v5116_v28  ;;  %v5136_v56 = vld [vmem:[%s10172_s6 + $0x438] sm:$0xff]  ;;  %v5135_v40 = vld [vmem:[%s10172_s6 + $0x430] sm:$0xff] }
 0x360   : > { %v8417_v6 = vsel %vm2149_vm10, %v2150_v38, %v2152_v17  ;;  %v2132_v60 = vmax.f32 %v2126_v59, 0.0  ;;  %v6302_v38 = vpack.c.bf16 %v5119_v42, %v5115_v41  ;;  %v5131_v59 = vld [vmem:[%s10172_s6 + $0x410] sm:$0xff] }
 0x361   : > { %v2155_v20 = vsel %vm2149_vm10, %v2151_v55, %v2154_v53  ;;  %v2133_v23 = vmax.f32 %v2127_v2, 0.0  ;;  %v2389_v5 = vrot.slane %v8417_v6, 1  ;;  %v5127_v55 = vld [vmem:[%s10172_s6 + $0x3f0] sm:$0xff]  ;;  %v5144_v2 = vld [vmem:[%s10172_s6 + $0x478] sm:$0xff] }
 0x362   : > { %2173 = vst.msk [vmem:[#allocation2 + $0x18] sm:$0xff] %vm2172_vm11, %v2155_v20  ;;  %v2156_v62 = vrot.slane %v2132_v60, 7  ;;  %v6306_v58 = vpack.c.bf16 %v5127_v55, %v5123_v51  ;;  %v6310_v60 = vpack.c.bf16 %v5135_v40, %v5131_v59  ;;  %v5163_v28 = vld [vmem:[%s10172_s6 + $0x510] sm:$0xff]  ;;  %v5188_v55 = vld [vmem:[%s10172_s6 + $0x5d8] sm:$0xff]  ;;  %v2188_v40 = vld [vmem:[%s10172_s6 + $0x8] sm:$0xff] }
 0x363   : > { %v2158_v12 = vrot.slane %v2133_v23, 7  ;;  %v8426_v1 = vld [vmem:[#allocation2] sm:$0xff]  ;;  %v5139_v23 = vld [vmem:[%s10172_s6 + $0x450] sm:$0xff] }
 0x364   : > { %v8422_v63 = vsel %vm2149_vm10, %v2152_v17, %v2156_v62  ;;  %2176 = vst [vmem:[#allocation2 + $0x30] sm:$0x1] %v2156_v62  ;;  %v8428_v3 = vld [vmem:[#allocation2 + $0x8] sm:$0xff]  ;;  %v2388_v57 = vrot.slane %v8426_v1, 1  ;;  %v6308_v17 = vpack.c.bf16 %v5136_v56, %v5132_v29  ;;  %v5143_v62 = vld [vmem:[%s10172_s6 + $0x470] sm:$0xff]  ;;  %v5192_v29 = vld [vmem:[%s10172_s6 + $0x5f8] sm:$0xff] }
 0x365   : > { %v2159_v0 = vsel %vm2149_vm10, %v2154_v53, %v2158_v12  ;;  %2178 = vst.msk [vmem:[#allocation2 + $0x38] sm:$0x1] %vm2177_vm12, %v2158_v12  ;;  %v2391_v14 = vrot.slane %v8428_v3, 1  ;;  %v2394_v27 = vrot.slane %v8422_v63, 1  ;;  %v5140_v53 = vld [vmem:[%s10172_s6 + $0x458] sm:$0xff]  ;;  %v6314_v4 = vpack.c.bf16 %v5143_v62, %v5139_v23  ;;  %v5167_v30 = vld [vmem:[%s10172_s6 + $0x530] sm:$0xff] }
 0x366   : > { %2175 = vst.msk [vmem:[#allocation2 + $0x28] sm:$0xff] %vm2172_vm11, %v2159_v0  ;;  %v8459_v25 = vsel %vm642_vm3, %v2388_v57, %v2389_v5  ;;  %v6312_v20 = vpack.c.bf16 %v5144_v2, %v5140_v53  ;;  %v5148_v12 = vld [vmem:[%s10172_s6 + $0x498] sm:$0xff]  ;;  %v5147_v57 = vld [vmem:[%s10172_s6 + $0x490] sm:$0xff]  ;;  %v2192_v53 = vld [vmem:[%s10172_s6 + $0x28] sm:$0xff] }
 0x367   : > { %v8487_v44 = vsel %vm642_vm3, %v2389_v5, %v2394_v27  ;;  %v5152_v0 = vld [vmem:[%s10172_s6 + $0x4b8] sm:$0xff]  ;;  %v5171_v41 = vld [vmem:[%s10172_s6 + $0x550] sm:$0xff]  ;;  %v2191_v23 = vld [vmem:[%s10172_s6 + $0x20] sm:$0xff] }
 0x368   : > { %v6316_v43 = vpack.c.bf16 %v5152_v0, %v5148_v12  ;;  %v5175_v42 = vld [vmem:[%s10172_s6 + $0x570] sm:$0xff]  ;;  %v2196_v62 = vld [vmem:[%s10172_s6 + $0x48] sm:$0xff] }
 0x369   : > { %v8436_v33 = vld [vmem:[#allocation2 + $0x18] sm:$0xff]  ;;  %v6330_v48 = vpack.c.bf16 %v5175_v42, %v5171_v41  ;;  %v5183_v51 = vld [vmem:[%s10172_s6 + $0x5b0] sm:$0xff]  ;;  %v2200_v12 = vld [vmem:[%s10172_s6 + $0x68] sm:$0xff] }
 0x36a   : > { %v2392_v16 = vrot.slane %v8436_v33, 1  ;;  %v5191_v59 = vld [vmem:[%s10172_s6 + $0x5f0] sm:$0xff]  ;;  %v2227_v41 = vld [vmem:[%s10172_s6 + $0x140] sm:$0xff] }
 0x36b   : > { %v8473_v34 = vld [vmem:[#allocation2 + $0x30] sm:$0x3]  ;;  %v2231_v42 = vld [vmem:[%s10172_s6 + $0x160] sm:$0xff] }
 0x36c   : > { %v2393_v18 = vsel %vm642_vm3, %v2391_v14, %v2392_v16  ;;  %v8455_v22 = vld [vmem:[#allocation2 + $0x38] sm:$0x3]  ;;  %v2398_v45 = vrot.slane %v8473_v34, 1 }
 0x36d   : > { %5193 = vmatprep.mubr.msk.f32.mxu0 %vm2172_vm11, %v2393_v18  ;;  %v8461_v26 = vld [vmem:[#allocation2 + $0x28] sm:$0xff]  ;;  %v2400_v32 = vrot.slane %v8455_v22, 1  ;;  %v5160_v14 = vld [vmem:[%s10172_s6 + $0x4f8] sm:$0xff] }
 0x36e   : > { %2476 = vmatmul.mubr.f32.vlgmr.msra.gmra.mrb[16].mxu0 %v8459_v25  ;;  %v2396_v31 = vrot.slane %v8461_v26, 1  ;;  %v8509_v61 = vsel %vm642_vm3, %v2394_v27, %v2398_v45  ;;  %v6320_v5 = vpack.c.bf16 %v5160_v14, %v5156_v50  ;;  %v5180_v45 = vld [vmem:[%s10172_s6 + $0x598] sm:$0xff]  ;;  %v2208_v50 = vld [vmem:[%s10172_s6 + $0xa8] sm:$0xff] }
 0x36f   : > { %6295 = vmatpush1.bf16.msra.mxu0 %v6294_v15  ;;  %v5155_v15 = vld [vmem:[%s10172_s6 + $0x4d0] sm:$0xff] }
 0x370   : > { %v8476_v36 = vsel %vm642_vm3, %v2392_v16, %v2396_v31  ;;  %6297 = vmatprep.subr.bf16.mxu0 %v6296_v52  ;;  %v8498_v24 = vsel %vm642_vm3, %v2396_v31, %v2400_v32  ;;  %v6318_v16 = vpack.c.bf16 %v5151_v54, %v5147_v57  ;;  %v5164_v52 = vld [vmem:[%s10172_s6 + $0x518] sm:$0xff]  ;;  %v2199_v57 = vld [vmem:[%s10172_s6 + $0x60] sm:$0xff]  ;;  %v2204_v54 = vld [vmem:[%s10172_s6 + $0x88] sm:$0xff] }
 0x371   : > { %5194 = vmatprep.mubr.msk.f32.mxu0 %vm2172_vm11, %v8476_v36  ;;  %v6324_v27 = vpack.c.bf16 %v5168_v19, %v5164_v52  ;;  %v5172_v31 = vld [vmem:[%s10172_s6 + $0x558] sm:$0xff]  ;;  %v2211_v19 = vld [vmem:[%s10172_s6 + $0xc0] sm:$0xff] }
 0x372   : > { %2482 = vmatmul.mubr.f32.gmra.mrb[18].mxu0 %v8487_v44  ;;  %v5176_v32 = vld [vmem:[%s10172_s6 + $0x578] sm:$0xff] }
 0x373   : > { %6299 = vmatpush1.bf16.msra.mxu0 %v6298_v35  ;;  %5195 = vmatprep.mubr.msk.f32.mxu0 %vm2172_vm11, %v8498_v24  ;;  %v6326_v35 = vpack.c.bf16 %v5167_v30, %v5163_v28  ;;  %v2219_v30 = vld [vmem:[%s10172_s6 + $0x100] sm:$0xff] }
 0x374   : > { %6301 = vmatprep.subr.bf16.mxu0 %v6300_v39  ;;  %v6328_v39 = vpack.c.bf16 %v5176_v32, %v5172_v31  ;;  %v2223_v31 = vld [vmem:[%s10172_s6 + $0x120] sm:$0xff]  ;;  %v2228_v32 = vld [vmem:[%s10172_s6 + $0x148] sm:$0xff] }
 0x376   : > { %2488 = vmatmul.mubr.f32.gmra.mrb[20].mxu0 %v8509_v61 }
 0x377   : > { %6303 = vmatpush1.bf16.msra.mxu0 %v6302_v38  ;;  %5196 = vmatprep.mubr.msk.f32.mxu0 %vm2172_vm11, %v2393_v18  ;;  %v5159_v18 = vld [vmem:[%s10172_s6 + $0x4f0] sm:$0xff]  ;;  %v6332_v38 = vpack.c.bf16 %v5184_v46, %v5180_v45  ;;  %v2236_v45 = vld [vmem:[%s10172_s6 + $0x188] sm:$0xff] }
 0x378   : > { %6305 = vmatprep.subr.bf16.mxu0 %v6304_v49  ;;  %v6322_v21 = vpack.c.bf16 %v5159_v18, %v5155_v15  ;;  %v5179_v49 = vld [vmem:[%s10172_s6 + $0x590] sm:$0xff]  ;;  %v2207_v15 = vld [vmem:[%s10172_s6 + $0xa0] sm:$0xff]  ;;  %v2212_v18 = vld [vmem:[%s10172_s6 + $0xc8] sm:$0xff] }
 0x379   : > { %v6334_v56 = vpack.c.bf16 %v5183_v51, %v5179_v49  ;;  %v2240_v46 = vld [vmem:[%s10172_s6 + $0x1a8] sm:$0xff]  ;;  %v2235_v49 = vld [vmem:[%s10172_s6 + $0x180] sm:$0xff] }
 0x37a   : > { %v2239_v51 = vld [vmem:[%s10172_s6 + $0x1a0] sm:$0xff] }
 0x37b   : > { %6307 = vmatpush1.bf16.msra.mxu0 %v6306_v58  ;;  %v6336_v58 = vpack.c.bf16 %v5192_v29, %v5188_v55  ;;  %v2244_v55 = vld [vmem:[%s10172_s6 + $0x1c8] sm:$0xff] }
 0x37c   : > { %6309 = vmatprep.subr.bf16.mxu0 %v6308_v17  ;;  %v5187_v17 = vld [vmem:[%s10172_s6 + $0x5d0] sm:$0xff]  ;;  %v2248_v29 = vld [vmem:[%s10172_s6 + $0x1e8] sm:$0xff] }
 0x37d   : > { %v6338_v2 = vpack.c.bf16 %v5191_v59, %v5187_v17  ;;  %v2243_v17 = vld [vmem:[%s10172_s6 + $0x1c0] sm:$0xff] }
 0x37e   : > { %v2247_v59 = vld [vmem:[%s10172_s6 + $0x1e0] sm:$0xff] }
 0x37f   : > { %6311 = vmatpush1.bf16.msra.mxu0 %v6310_v60  ;;  %v6340_v60 = vpack.c.bf16 %v2192_v53, %v2188_v40  ;;  %v2252_v40 = vld [vmem:[%s10172_s6 + $0x208] sm:$0xff] }
 0x380   : > { %6313 = vmatprep.subr.bf16.mxu0 %v6312_v20  ;;  %v2187_v20 = vld [vmem:[%s10172_s6] sm:$0xff]  ;;  %v2256_v53 = vld [vmem:[%s10172_s6 + $0x228] sm:$0xff] }
 0x381   : > { %v6342_v0 = vpack.c.bf16 %v2191_v23, %v2187_v20  ;;  %v2251_v20 = vld [vmem:[%s10172_s6 + $0x200] sm:$0xff] }
 0x382   : > { %v2255_v23 = vld [vmem:[%s10172_s6 + $0x220] sm:$0xff] }
 0x383   : > { %6315 = vmatpush1.bf16.msra.mxu0 %v6314_v4  ;;  %v6344_v4 = vpack.c.bf16 %v2200_v12, %v2196_v62  ;;  %v2260_v62 = vld [vmem:[%s10172_s6 + $0x248] sm:$0xff] }
 0x384   : > { %6317 = vmatprep.subr.bf16.mxu0 %v6316_v43  ;;  %v2195_v43 = vld [vmem:[%s10172_s6 + $0x40] sm:$0xff]  ;;  %v2264_v12 = vld [vmem:[%s10172_s6 + $0x268] sm:$0xff] }
 0x385   : > { %v6346_v14 = vpack.c.bf16 %v2199_v57, %v2195_v43  ;;  %v2259_v43 = vld [vmem:[%s10172_s6 + $0x240] sm:$0xff] }
 0x386   : > { %v2263_v57 = vld [vmem:[%s10172_s6 + $0x260] sm:$0xff] }
 0x387   : > { %6319 = vmatpush1.bf16.msra.mxu0 %v6318_v16  ;;  %v6348_v16 = vpack.c.bf16 %v2208_v50, %v2204_v54  ;;  %v2268_v54 = vld [vmem:[%s10172_s6 + $0x288] sm:$0xff] }
 0x388   : > { %6321 = vmatprep.subr.bf16.mxu0 %v6320_v5  ;;  %v2203_v5 = vld [vmem:[%s10172_s6 + $0x80] sm:$0xff]  ;;  %v2272_v50 = vld [vmem:[%s10172_s6 + $0x2a8] sm:$0xff] }
 0x38b   : > { %6323 = vmatpush1.bf16.msra.mxu0 %v6322_v21  ;;  %v2215_v21 = vld [vmem:[%s10172_s6 + $0xe0] sm:$0xff] }
 0x38c   : > { %6325 = vmatprep.subr.bf16.mxu0 %v6324_v27  ;;  %v2220_v27 = vld [vmem:[%s10172_s6 + $0x108] sm:$0xff] }
 0x38f   : > { %6327 = vmatpush1.bf16.msra.mxu0 %v6326_v35  ;;  %v6358_v35 = vpack.c.bf16 %v2223_v31, %v2219_v30  ;;  %v2189_v30 = vld [vmem:[%s10172_s6 + $0x10] sm:$0xff] }
 0x390   : > { %6329 = vmatprep.subr.bf16.mxu0 %v6328_v39  ;;  %v2193_v31 = vld [vmem:[%s10172_s6 + $0x30] sm:$0xff] }
 0x393   : > { %6331 = vmatpush1.bf16.msra.mxu0 %v6330_v48  ;;  %v6362_v48 = vpack.c.bf16 %v2231_v42, %v2227_v41  ;;  %v2197_v41 = vld [vmem:[%s10172_s6 + $0x50] sm:$0xff] }
 0x394   : > { %6333 = vmatprep.subr.bf16.mxu0 %v6332_v38  ;;  %v6364_v38 = vpack.c.bf16 %v2240_v46, %v2236_v45  ;;  %v2201_v42 = vld [vmem:[%s10172_s6 + $0x70] sm:$0xff]  ;;  %v2206_v45 = vld [vmem:[%s10172_s6 + $0x98] sm:$0xff] }
 0x395   : > { %v2210_v46 = vld [vmem:[%s10172_s6 + $0xb8] sm:$0xff] }
 0x397   : > { %6335 = vmatpush1.bf16.msra.mxu0 %v6334_v56  ;;  %v6366_v56 = vpack.c.bf16 %v2239_v51, %v2235_v49  ;;  %v2205_v49 = vld [vmem:[%s10172_s6 + $0x90] sm:$0xff] }
 0x398   : > { %6337 = vmatprep.subr.bf16.mxu0 %v6336_v58  ;;  %v6368_v58 = vpack.c.bf16 %v2248_v29, %v2244_v55  ;;  %v2209_v51 = vld [vmem:[%s10172_s6 + $0xb0] sm:$0xff]  ;;  %v2214_v55 = vld [vmem:[%s10172_s6 + $0xd8] sm:$0xff] }
 0x399   : > { %v2218_v29 = vld [vmem:[%s10172_s6 + $0xf8] sm:$0xff] }
 0x39b   : > { %6339 = vmatpush1.bf16.msra.mxu0 %v6338_v2  ;;  %v6370_v2 = vpack.c.bf16 %v2247_v59, %v2243_v17  ;;  %v2213_v17 = vld [vmem:[%s10172_s6 + $0xd0] sm:$0xff] }
 0x39c   : > { %6341 = vmatprep.subr.bf16.mxu0 %v6340_v60  ;;  %v6372_v60 = vpack.c.bf16 %v2256_v53, %v2252_v40  ;;  %v2217_v59 = vld [vmem:[%s10172_s6 + $0xf0] sm:$0xff]  ;;  %v2222_v40 = vld [vmem:[%s10172_s6 + $0x118] sm:$0xff] }
 0x39d   : > { %v2226_v53 = vld [vmem:[%s10172_s6 + $0x138] sm:$0xff] }
 0x39e   : > { %2559 = vmatmul.mubr.f32.vlgmr.msra.gmra.mrb[22].mxu0 %v8459_v25  ;;  %v2216_v25 = vld [vmem:[%s10172_s6 + $0xe8] sm:$0xff] }
 0x39f   : > { %5197 = vmatprep.mubr.msk.f32.mxu0 %vm2172_vm11, %v8476_v36  ;;  %6343 = vmatpush1.bf16.msra.mxu0 %v6342_v0  ;;  %v6350_v36 = vpack.c.bf16 %v2207_v15, %v2203_v5  ;;  %v6352_v52 = vpack.c.bf16 %v2216_v25, %v2212_v18  ;;  %v6374_v0 = vpack.c.bf16 %v2255_v23, %v2251_v20  ;;  %v2267_v5 = vld [vmem:[%s10172_s6 + $0x280] sm:$0xff]  ;;  %v2276_v18 = vld [vmem:[%s10172_s6 + $0x2c8] sm:$0xff]  ;;  %v2221_v20 = vld [vmem:[%s10172_s6 + $0x110] sm:$0xff] }
 0x3a0   : > { %6345 = vmatprep.subr.bf16.mxu0 %v6344_v4  ;;  %v6376_v4 = vpack.c.bf16 %v2264_v12, %v2260_v62  ;;  %v2271_v15 = vld [vmem:[%s10172_s6 + $0x2a0] sm:$0xff]  ;;  %v2280_v25 = vld [vmem:[%s10172_s6 + $0x2e8] sm:$0xff]  ;;  %v2225_v23 = vld [vmem:[%s10172_s6 + $0x130] sm:$0xff] }
 0x3a1   : > { %v2230_v62 = vld [vmem:[%s10172_s6 + $0x158] sm:$0xff] }
 0x3a2   : > { %2565 = vmatmul.mubr.f32.gmra.mrb[24].mxu0 %v8487_v44  ;;  %v2224_v44 = vld [vmem:[%s10172_s6 + $0x128] sm:$0xff]  ;;  %v2234_v12 = vld [vmem:[%s10172_s6 + $0x178] sm:$0xff] }
 0x3a3   : > { %5198 = vmatprep.mubr.msk.f32.mxu0 %vm2172_vm11, %v8498_v24  ;;  %6347 = vmatpush1.bf16.msra.mxu0 %v6346_v14  ;;  %v6354_v24 = vpack.c.bf16 %v2215_v21, %v2211_v19  ;;  %v6356_v28 = vpack.c.bf16 %v2224_v44, %v2220_v27  ;;  %v6378_v14 = vpack.c.bf16 %v2263_v57, %v2259_v43  ;;  %v2275_v19 = vld [vmem:[%s10172_s6 + $0x2c0] sm:$0xff]  ;;  %v2190_v27 = vld [vmem:[%s10172_s6 + $0x18] sm:$0xff]  ;;  %v2229_v43 = vld [vmem:[%s10172_s6 + $0x150] sm:$0xff] }
 0x3a4   : > { %6349 = vmatprep.subr.bf16.mxu0 %v6348_v16  ;;  %v6380_v16 = vpack.c.bf16 %v2272_v50, %v2268_v54  ;;  %v2279_v21 = vld [vmem:[%s10172_s6 + $0x2e0] sm:$0xff]  ;;  %v2194_v44 = vld [vmem:[%s10172_s6 + $0x38] sm:$0xff]  ;;  %v2233_v57 = vld [vmem:[%s10172_s6 + $0x170] sm:$0xff] }
 0x3a5   : > { %v2238_v54 = vld [vmem:[%s10172_s6 + $0x198] sm:$0xff] }
 0x3a6   : > { %2571 = vmatmul.mubr.f32.gmra.mrb[26].mxu0 %v8509_v61  ;;  %v2232_v61 = vld [vmem:[%s10172_s6 + $0x168] sm:$0xff]  ;;  %v2242_v50 = vld [vmem:[%s10172_s6 + $0x1b8] sm:$0xff] }
 0x3a7   : > { %6351 = vmatpush1.bf16.msra.mxu0 %v6350_v36  ;;  %5199 = vmatprep.mubr.msk.f32.mxu0 %vm2172_vm11, %v8428_v3  ;;  %v6360_v39 = vpack.c.bf16 %v2232_v61, %v2228_v32  ;;  %v6382_v36 = vpack.c.bf16 %v2271_v15, %v2267_v5  ;;  %v2198_v32 = vld [vmem:[%s10172_s6 + $0x58] sm:$0xff]  ;;  %v2237_v5 = vld [vmem:[%s10172_s6 + $0x190] sm:$0xff] }
 0x3a8   : > { %6353 = vmatprep.subr.bf16.mxu0 %v6352_v52  ;;  %v6384_v52 = vpack.c.bf16 %v2280_v25, %v2276_v18  ;;  %v2202_v61 = vld [vmem:[%s10172_s6 + $0x78] sm:$0xff]  ;;  %v2241_v15 = vld [vmem:[%s10172_s6 + $0x1b0] sm:$0xff] }
 0x3a9   : > { %v2246_v18 = vld [vmem:[%s10172_s6 + $0x1d8] sm:$0xff] }
 0x3aa   : > { %v2250_v25 = vld [vmem:[%s10172_s6 + $0x1f8] sm:$0xff] }
 0x3ab   : > { %6355 = vmatpush1.bf16.msra.mxu0 %v6354_v24  ;;  %v6386_v24 = vpack.c.bf16 %v2279_v21, %v2275_v19  ;;  %v2245_v19 = vld [vmem:[%s10172_s6 + $0x1d0] sm:$0xff] }
 0x3ac   : > { %6357 = vmatprep.subr.bf16.mxu0 %v6356_v28  ;;  %v6388_v28 = vpack.c.bf16 %v2194_v44, %v2190_v27  ;;  %v2249_v21 = vld [vmem:[%s10172_s6 + $0x1f0] sm:$0xff]  ;;  %v2254_v27 = vld [vmem:[%s10172_s6 + $0x218] sm:$0xff] }
 0x3ad   : > { %v2258_v44 = vld [vmem:[%s10172_s6 + $0x238] sm:$0xff] }
 0x3af   : > { %6359 = vmatpush1.bf16.msra.mxu0 %v6358_v35  ;;  %v6390_v35 = vpack.c.bf16 %v2193_v31, %v2189_v30  ;;  %v2253_v30 = vld [vmem:[%s10172_s6 + $0x210] sm:$0xff] }
 0x3b0   : > { %6361 = vmatprep.subr.bf16.mxu0 %v6360_v39  ;;  %v6392_v39 = vpack.c.bf16 %v2202_v61, %v2198_v32  ;;  %v2257_v31 = vld [vmem:[%s10172_s6 + $0x230] sm:$0xff]  ;;  %v2262_v32 = vld [vmem:[%s10172_s6 + $0x258] sm:$0xff] }
 0x3b1   : > { %v2266_v61 = vld [vmem:[%s10172_s6 + $0x278] sm:$0xff] }
 0x3b3   : > { %6363 = vmatpush1.bf16.msra.mxu0 %v6362_v48  ;;  %v6394_v48 = vpack.c.bf16 %v2201_v42, %v2197_v41  ;;  %v2261_v41 = vld [vmem:[%s10172_s6 + $0x250] sm:$0xff] }
 0x3b4   : > { %6365 = vmatprep.subr.bf16.mxu0 %v6364_v38  ;;  %v6396_v38 = vpack.c.bf16 %v2210_v46, %v2206_v45  ;;  %v2265_v42 = vld [vmem:[%s10172_s6 + $0x270] sm:$0xff]  ;;  %v2270_v45 = vld [vmem:[%s10172_s6 + $0x298] sm:$0xff] }
 0x3b5   : > { %v2274_v46 = vld [vmem:[%s10172_s6 + $0x2b8] sm:$0xff] }
 0x3b7   : > { %6367 = vmatpush1.bf16.msra.mxu0 %v6366_v56  ;;  %v6398_v56 = vpack.c.bf16 %v2209_v51, %v2205_v49  ;;  %v2269_v49 = vld [vmem:[%s10172_s6 + $0x290] sm:$0xff] }
 0x3b8   : > { %6369 = vmatprep.subr.bf16.mxu0 %v6368_v58  ;;  %v6400_v58 = vpack.c.bf16 %v2218_v29, %v2214_v55  ;;  %v2273_v51 = vld [vmem:[%s10172_s6 + $0x2b0] sm:$0xff]  ;;  %v2278_v55 = vld [vmem:[%s10172_s6 + $0x2d8] sm:$0xff] }
 0x3b9   : > { %v2282_v29 = vld [vmem:[%s10172_s6 + $0x2f8] sm:$0xff] }
 0x3bb   : > { %6371 = vmatpush1.bf16.msra.mxu0 %v6370_v2  ;;  %v6402_v2 = vpack.c.bf16 %v2217_v59, %v2213_v17  ;;  %v2277_v17 = vld [vmem:[%s10172_s6 + $0x2d0] sm:$0xff] }
 0x3bc   : > { %6373 = vmatprep.subr.bf16.mxu0 %v6372_v60  ;;  %v6404_v60 = vpack.c.bf16 %v2226_v53, %v2222_v40  ;;  %v2281_v59 = vld [vmem:[%s10172_s6 + $0x2f0] sm:$0xff]  ;;  %v5206_v40 = vld [vmem:[%s10172_s6 + $0x608] sm:$0xff] }
 0x3bd   : > { %v5210_v53 = vld [vmem:[%s10172_s6 + $0x628] sm:$0xff] }
 0x3bf   : > { %6375 = vmatpush1.bf16.msra.mxu0 %v6374_v0  ;;  %v6406_v0 = vpack.c.bf16 %v2225_v23, %v2221_v20  ;;  %v5205_v20 = vld [vmem:[%s10172_s6 + $0x600] sm:$0xff] }
 0x3c0   : > { %6377 = vmatprep.subr.bf16.mxu0 %v6376_v4  ;;  %v6408_v4 = vpack.c.bf16 %v2234_v12, %v2230_v62  ;;  %v5209_v23 = vld [vmem:[%s10172_s6 + $0x620] sm:$0xff]  ;;  %v5214_v62 = vld [vmem:[%s10172_s6 + $0x648] sm:$0xff] }
 0x3c1   : > { %v5218_v12 = vld [vmem:[%s10172_s6 + $0x668] sm:$0xff] }
 0x3c3   : > { %6379 = vmatpush1.bf16.msra.mxu0 %v6378_v14  ;;  %v6410_v14 = vpack.c.bf16 %v2233_v57, %v2229_v43  ;;  %v5213_v43 = vld [vmem:[%s10172_s6 + $0x640] sm:$0xff] }
 0x3c4   : > { %6381 = vmatprep.subr.bf16.mxu0 %v6380_v16  ;;  %v6412_v16 = vpack.c.bf16 %v2242_v50, %v2238_v54  ;;  %v5217_v57 = vld [vmem:[%s10172_s6 + $0x660] sm:$0xff]  ;;  %v5222_v54 = vld [vmem:[%s10172_s6 + $0x688] sm:$0xff] }
 0x3c5   : > { %v5226_v50 = vld [vmem:[%s10172_s6 + $0x6a8] sm:$0xff] }
 0x3c7   : > { %6383 = vmatpush1.bf16.msra.mxu0 %v6382_v36  ;;  %v6414_v36 = vpack.c.bf16 %v2241_v15, %v2237_v5  ;;  %v5221_v5 = vld [vmem:[%s10172_s6 + $0x680] sm:$0xff] }
 0x3c8   : > { %6385 = vmatprep.subr.bf16.mxu0 %v6384_v52  ;;  %v6416_v52 = vpack.c.bf16 %v2250_v25, %v2246_v18  ;;  %v5225_v15 = vld [vmem:[%s10172_s6 + $0x6a0] sm:$0xff]  ;;  %v5230_v18 = vld [vmem:[%s10172_s6 + $0x6c8] sm:$0xff] }
 0x3c9   : > { %v5234_v25 = vld [vmem:[%s10172_s6 + $0x6e8] sm:$0xff] }
 0x3cb   : > { %6387 = vmatpush1.bf16.msra.mxu0 %v6386_v24  ;;  %v6418_v24 = vpack.c.bf16 %v2249_v21, %v2245_v19  ;;  %v2849_v19 = vrot.slane %v8428_v3, 2  ;;  %v6448_v21 = vpack.c.bf16 %v5234_v25, %v5230_v18  ;;  %v5285_v18 = vld [vmem:[%s10172_s6 + $0x880] sm:$0xff] }
 0x3cc   : > { %6389 = vmatprep.subr.bf16.mxu0 %v6388_v28  ;;  %v6420_v28 = vpack.c.bf16 %v2258_v44, %v2254_v27  ;;  %v5229_v27 = vld [vmem:[%s10172_s6 + $0x6c0] sm:$0xff] }
 0x3cd   : > { %v5233_v44 = vld [vmem:[%s10172_s6 + $0x6e0] sm:$0xff] }
 0x3ce   : > { %2648 = vmatmul.mubr.f32.vlgmr.msra.gmra.mrb[16].mxu0 %v8426_v1  ;;  %v5289_v25 = vld [vmem:[%s10172_s6 + $0x8a0] sm:$0xff] }
 0x3cf   : > { %5200 = vmatprep.mubr.msk.f32.mxu0 %vm2172_vm11, %v8436_v33  ;;  %6391 = vmatpush1.bf16.msra.mxu0 %v6390_v35  ;;  %v6422_v35 = vpack.c.bf16 %v2257_v31, %v2253_v30  ;;  %v6450_v30 = vpack.c.bf16 %v5233_v44, %v5229_v27  ;;  %v5293_v44 = vld [vmem:[%s10172_s6 + $0x8c0] sm:$0xff] }
 0x3d0   : > { %6393 = vmatprep.subr.bf16.mxu0 %v6392_v39  ;;  %v6424_v39 = vpack.c.bf16 %v2266_v61, %v2262_v32  ;;  %v5237_v32 = vld [vmem:[%s10172_s6 + $0x700] sm:$0xff] }
 0x3d1   : > { %v5241_v61 = vld [vmem:[%s10172_s6 + $0x720] sm:$0xff] }
 0x3d2   : > { %2654 = vmatmul.mubr.f32.gmra.mrb[18].mxu0 %v8417_v6 }
 0x3d3   : > { %5201 = vmatprep.mubr.msk.f32.mxu0 %vm2172_vm11, %v8461_v26  ;;  %6395 = vmatpush1.bf16.msra.mxu0 %v6394_v48  ;;  %v6426_v48 = vpack.c.bf16 %v2265_v42, %v2261_v41  ;;  %v6454_v41 = vpack.c.bf16 %v5241_v61, %v5237_v32  ;;  %v5207_v61 = vld [vmem:[%s10172_s6 + $0x610] sm:$0xff] }
 0x3d4   : > { %6397 = vmatprep.subr.bf16.mxu0 %v6396_v38  ;;  %v6428_v38 = vpack.c.bf16 %v2274_v46, %v2270_v45  ;;  %v5245_v45 = vld [vmem:[%s10172_s6 + $0x740] sm:$0xff] }
 0x3d5   : > { %v5249_v46 = vld [vmem:[%s10172_s6 + $0x760] sm:$0xff] }
 0x3d6   : > { %2660 = vmatmul.mubr.f32.gmra.mrb[20].mxu0 %v8422_v63 }
 0x3d7   : > { %6399 = vmatpush1.bf16.msra.mxu0 %v6398_v56  ;;  %5202 = vmatprep.mubr.msk.f32.mxu0 %vm2172_vm11, %v8428_v3  ;;  %v6430_v56 = vpack.c.bf16 %v2273_v51, %v2269_v49  ;;  %v6458_v49 = vpack.c.bf16 %v5249_v46, %v5245_v45  ;;  %v2854_v45 = vrot.slane %v8461_v26, 2  ;;  %v2847_v46 = vrot.slane %v8417_v6, 2 }
 0x3d8   : > { %6401 = vmatprep.subr.bf16.mxu0 %v6400_v58  ;;  %v6432_v58 = vpack.c.bf16 %v2282_v29, %v2278_v55  ;;  %v5253_v55 = vld [vmem:[%s10172_s6 + $0x780] sm:$0xff] }
 0x3d9   : > { %v5257_v29 = vld [vmem:[%s10172_s6 + $0x7a0] sm:$0xff] }
 0x3db   : > { %6403 = vmatpush1.bf16.msra.mxu0 %v6402_v2  ;;  %v6434_v2 = vpack.c.bf16 %v2281_v59, %v2277_v17  ;;  %v6462_v17 = vpack.c.bf16 %v5257_v29, %v5253_v55  ;;  %v2852_v55 = vrot.slane %v8422_v63, 2 }
 0x3dc   : > { %6405 = vmatprep.subr.bf16.mxu0 %v6404_v60  ;;  %v6436_v60 = vpack.c.bf16 %v5210_v53, %v5206_v40  ;;  %v5261_v40 = vld [vmem:[%s10172_s6 + $0x7c0] sm:$0xff] }
 0x3dd   : > { %v5265_v53 = vld [vmem:[%s10172_s6 + $0x7e0] sm:$0xff] }
 0x3df   : > { %6407 = vmatpush1.bf16.msra.mxu0 %v6406_v0  ;;  %v6438_v0 = vpack.c.bf16 %v5209_v23, %v5205_v20  ;;  %v6466_v20 = vpack.c.bf16 %v5265_v53, %v5261_v40  ;;  %v5236_v40 = vld [vmem:[%s10172_s6 + $0x6f8] sm:$0xff] }
 0x3e0   : > { %6409 = vmatprep.subr.bf16.mxu0 %v6408_v4  ;;  %v6440_v4 = vpack.c.bf16 %v5218_v12, %v5214_v62  ;;  %v5269_v62 = vld [vmem:[%s10172_s6 + $0x800] sm:$0xff] }
 0x3e1   : > { %v5273_v12 = vld [vmem:[%s10172_s6 + $0x820] sm:$0xff] }
 0x3e3   : > { %6411 = vmatpush1.bf16.msra.mxu0 %v6410_v14  ;;  %v6442_v14 = vpack.c.bf16 %v5217_v57, %v5213_v43  ;;  %v6470_v43 = vpack.c.bf16 %v5273_v12, %v5269_v62  ;;  %v5240_v62 = vld [vmem:[%s10172_s6 + $0x718] sm:$0xff] }
 0x3e4   : > { %6413 = vmatprep.subr.bf16.mxu0 %v6412_v16  ;;  %v6444_v16 = vpack.c.bf16 %v5226_v50, %v5222_v54  ;;  %v5277_v54 = vld [vmem:[%s10172_s6 + $0x840] sm:$0xff]  ;;  %v5244_v12 = vld [vmem:[%s10172_s6 + $0x738] sm:$0xff] }
 0x3e5   : > { %v5281_v50 = vld [vmem:[%s10172_s6 + $0x860] sm:$0xff] }
 0x3e7   : > { %6415 = vmatpush1.bf16.msra.mxu0 %v6414_v36  ;;  %v2850_v36 = vrot.slane %v8436_v33, 2 }
 0x3e8   : > { %6417 = vmatprep.subr.bf16.mxu0 %v6416_v52  ;;  %v6446_v52 = vpack.c.bf16 %v5225_v15, %v5221_v5  ;;  %v6474_v5 = vpack.c.bf16 %v5281_v50, %v5277_v54  ;;  %v5248_v54 = vld [vmem:[%s10172_s6 + $0x758] sm:$0xff] }
 0x3e9   : > { %v8981_v3 = vsel %vm1065_vm5, %v2849_v19, %v2850_v36  ;;  %v5298_v19 = vld [vmem:[%s10172_s6 + $0x8e8] sm:$0xff]  ;;  %v9116_v29 = vsel %vm1065_vm5, %v2850_v36, %v2854_v45  ;;  %v9128_v36 = vsel %vm1065_vm5, %v2847_v46, %v2852_v55  ;;  %v5252_v50 = vld [vmem:[%s10172_s6 + $0x778] sm:$0xff] }
 0x3eb   : > { %6419 = vmatpush1.bf16.msra.mxu0 %v6418_v24  ;;  %v5238_v24 = vld [vmem:[%s10172_s6 + $0x708] sm:$0xff] }
 0x3ec   : > { %6421 = vmatprep.subr.bf16.mxu0 %v6420_v28  ;;  %v5242_v28 = vld [vmem:[%s10172_s6 + $0x728] sm:$0xff] }
 0x3ed   : > { %v6452_v31 = vpack.c.bf16 %v5242_v28, %v5238_v24  ;;  %v5297_v24 = vld [vmem:[%s10172_s6 + $0x8e0] sm:$0xff]  ;;  %v5208_v28 = vld [vmem:[%s10172_s6 + $0x618] sm:$0xff] }
 0x3ef   : > { %6423 = vmatpush1.bf16.msra.mxu0 %v6422_v35  ;;  %v5246_v35 = vld [vmem:[%s10172_s6 + $0x748] sm:$0xff] }
 0x3f0   : > { %6425 = vmatprep.subr.bf16.mxu0 %v6424_v39  ;;  %v5250_v39 = vld [vmem:[%s10172_s6 + $0x768] sm:$0xff] }
 0x3f1   : > { %v6456_v42 = vpack.c.bf16 %v5250_v39, %v5246_v35  ;;  %v5211_v35 = vld [vmem:[%s10172_s6 + $0x630] sm:$0xff]  ;;  %v2846_v39 = vrot.slane %v8426_v1, 2 }
 0x3f3   : > { %6427 = vmatpush1.bf16.msra.mxu0 %v6426_v48  ;;  %v5254_v48 = vld [vmem:[%s10172_s6 + $0x788] sm:$0xff] }
 0x3f4   : > { %6429 = vmatprep.subr.bf16.mxu0 %v6428_v38  ;;  %v5258_v38 = vld [vmem:[%s10172_s6 + $0x7a8] sm:$0xff] }
 0x3f5   : > { %v6460_v51 = vpack.c.bf16 %v5258_v38, %v5254_v48  ;;  %v6486_v48 = vpack.c.bf16 %v5211_v35, %v5207_v61  ;;  %v5276_v61 = vld [vmem:[%s10172_s6 + $0x838] sm:$0xff] }
 0x3f7   : > { %6431 = vmatpush1.bf16.msra.mxu0 %v6430_v56  ;;  %v5262_v56 = vld [vmem:[%s10172_s6 + $0x7c8] sm:$0xff] }
 0x3f8   : > { %6433 = vmatprep.subr.bf16.mxu0 %v6432_v58  ;;  %v5266_v58 = vld [vmem:[%s10172_s6 + $0x7e8] sm:$0xff] }
 0x3f9   : > { %v6464_v59 = vpack.c.bf16 %v5266_v58, %v5262_v56  ;;  %v2858_v56 = vrot.slane %v8455_v22, 2  ;;  %v2856_v22 = vrot.slane %v8473_v34, 2 }
 0x3fb   : > { %6435 = vmatpush1.bf16.msra.mxu0 %v6434_v2  ;;  %v5270_v2 = vld [vmem:[%s10172_s6 + $0x808] sm:$0xff]  ;;  %v9139_v53 = vsel %vm1065_vm5, %v2854_v45, %v2858_v56  ;;  %v5280_v45 = vld [vmem:[%s10172_s6 + $0x858] sm:$0xff] }
 0x3fc   : > { %6437 = vmatprep.subr.bf16.mxu0 %v6436_v60  ;;  %v5274_v60 = vld [vmem:[%s10172_s6 + $0x828] sm:$0xff] }
 0x3fd   : > { %v6468_v23 = vpack.c.bf16 %v5274_v60, %v5270_v2  ;;  %v5231_v60 = vld [vmem:[%s10172_s6 + $0x6d0] sm:$0xff] }
 0x3fe   : > { %2731 = vmatmul.mubr.f32.vlgmr.msra.gmra.mrb[22].mxu0 %v8426_v1  ;;  %v5215_v1 = vld [vmem:[%s10172_s6 + $0x650] sm:$0xff] }
 0x3ff   : > { %5203 = vmatprep.mubr.msk.f32.mxu0 %vm2172_vm11, %v8436_v33  ;;  %6439 = vmatpush1.bf16.msra.mxu0 %v6438_v0  ;;  %v5278_v0 = vld [vmem:[%s10172_s6 + $0x848] sm:$0xff]  ;;  %v5227_v33 = vld [vmem:[%s10172_s6 + $0x6b0] sm:$0xff] }
 0x400   : > { %6441 = vmatprep.subr.bf16.mxu0 %v6440_v4  ;;  %v5282_v4 = vld [vmem:[%s10172_s6 + $0x868] sm:$0xff] }
 0x401   : > { %v6472_v57 = vpack.c.bf16 %v5282_v4, %v5278_v0  ;;  %v6500_v4 = vpack.c.bf16 %v5244_v12, %v5240_v62 }
 0x402   : > { %2737 = vmatmul.mubr.f32.gmra.mrb[24].mxu0 %v8417_v6  ;;  %v5224_v6 = vld [vmem:[%s10172_s6 + $0x698] sm:$0xff] }
 0x403   : > { %5204 = vmatprep.mubr.msk.f32.mxu0 %vm2172_vm11, %v8461_v26  ;;  %6443 = vmatpush1.bf16.msra.mxu0 %v6442_v14  ;;  %v5286_v14 = vld [vmem:[%s10172_s6 + $0x888] sm:$0xff]  ;;  %v5228_v26 = vld [vmem:[%s10172_s6 + $0x6b8] sm:$0xff] }
 0x404   : > { %6445 = vmatprep.subr.bf16.mxu0 %v6444_v16  ;;  %v5290_v16 = vld [vmem:[%s10172_s6 + $0x8a8] sm:$0xff]  ;;  %v6492_v58 = vpack.c.bf16 %v5228_v26, %v5224_v6  ;;  %v5292_v6 = vld [vmem:[%s10172_s6 + $0x8b8] sm:$0xff] }
 0x405   : > { %v6476_v15 = vpack.c.bf16 %v5290_v16, %v5286_v14  ;;  %v6504_v14 = vpack.c.bf16 %v5252_v50, %v5248_v54  ;;  %v5247_v16 = vld [vmem:[%s10172_s6 + $0x750] sm:$0xff] }
 0x406   : > { %2743 = vmatmul.mubr.f32.gmra.mrb[26].mxu0 %v8422_v63 }
 0x407   : > { %6447 = vmatpush1.bf16.msra.mxu0 %v6446_v52  ;;  %5301 = vmatprep.mubr.msk.f32.mxu0 %vm2172_vm11, %v8981_v3  ;;  %v5294_v52 = vld [vmem:[%s10172_s6 + $0x8c8] sm:$0xff] }
 0x408   : > { %6449 = vmatprep.subr.bf16.mxu0 %v6448_v21  ;;  %v6478_v21 = vpack.c.bf16 %v5289_v25, %v5285_v18  ;;  %v6480_v27 = vpack.c.bf16 %v5298_v19, %v5294_v52  ;;  %v5260_v18 = vld [vmem:[%s10172_s6 + $0x7b8] sm:$0xff]  ;;  %v5255_v19 = vld [vmem:[%s10172_s6 + $0x790] sm:$0xff] }
 0x40b   : > { %6451 = vmatpush1.bf16.msra.mxu0 %v6450_v30  ;;  %v5212_v30 = vld [vmem:[%s10172_s6 + $0x638] sm:$0xff] }
 0x40c   : > { %6453 = vmatprep.subr.bf16.mxu0 %v6452_v31  ;;  %v6482_v31 = vpack.c.bf16 %v5297_v24, %v5293_v44  ;;  %v6484_v32 = vpack.c.bf16 %v5212_v30, %v5208_v28  ;;  %v5268_v44 = vld [vmem:[%s10172_s6 + $0x7f8] sm:$0xff]  ;;  %v5263_v30 = vld [vmem:[%s10172_s6 + $0x7d0] sm:$0xff] }
 0x40f   : > { %6455 = vmatpush1.bf16.msra.mxu0 %v6454_v41  ;;  %v5216_v41 = vld [vmem:[%s10172_s6 + $0x658] sm:$0xff] }
 0x410   : > { %6457 = vmatprep.subr.bf16.mxu0 %v6456_v42  ;;  %v5220_v42 = vld [vmem:[%s10172_s6 + $0x678] sm:$0xff] }
 0x411   : > { %v6488_v38 = vpack.c.bf16 %v5220_v42, %v5216_v41  ;;  %v5271_v41 = vld [vmem:[%s10172_s6 + $0x810] sm:$0xff] }
 0x412   : > { %v5275_v42 = vld [vmem:[%s10172_s6 + $0x830] sm:$0xff] }
 0x413   : > { %6459 = vmatpush1.bf16.msra.mxu0 %v6458_v49  ;;  %v5219_v49 = vld [vmem:[%s10172_s6 + $0x670] sm:$0xff] }
 0x414   : > { %6461 = vmatprep.subr.bf16.mxu0 %v6460_v51  ;;  %v9103_v51 = vsel %vm1065_vm5, %v2846_v39, %v2847_v46  ;;  %v6490_v63 = vpack.c.bf16 %v5219_v49, %v5215_v1  ;;  %v5284_v46 = vld [vmem:[%s10172_s6 + $0x878] sm:$0xff]  ;;  %v5279_v1 = vld [vmem:[%s10172_s6 + $0x850] sm:$0xff] }
 0x415   : > { %v5283_v49 = vld [vmem:[%s10172_s6 + $0x870] sm:$0xff] }
 0x416   : > { %v6522_v26 = vpack.c.bf16 %v5283_v49, %v5279_v1 }
 0x417   : > { %6463 = vmatpush1.bf16.msra.mxu0 %v6462_v17  ;;  %v5223_v17 = vld [vmem:[%s10172_s6 + $0x690] sm:$0xff] }
 0x418   : > { %6465 = vmatprep.subr.bf16.mxu0 %v6464_v59  ;;  %v5232_v59 = vld [vmem:[%s10172_s6 + $0x6d8] sm:$0xff]  ;;  %v6494_v2 = vpack.c.bf16 %v5227_v33, %v5223_v17 }
 0x419   : > { %v6496_v34 = vpack.c.bf16 %v5236_v40, %v5232_v59  ;;  %v5296_v17 = vld [vmem:[%s10172_s6 + $0x8d8] sm:$0xff]  ;;  %v5295_v40 = vld [vmem:[%s10172_s6 + $0x8d0] sm:$0xff] }
 0x41a   : > { %v5300_v33 = vld [vmem:[%s10172_s6 + $0x8f8] sm:$0xff] }
 0x41b   : > { %6467 = vmatpush1.bf16.msra.mxu0 %v6466_v20  ;;  %v5235_v20 = vld [vmem:[%s10172_s6 + $0x6f0] sm:$0xff]  ;;  %v6528_v59 = vpack.c.bf16 %v5300_v33, %v5296_v17 }
 0x41c   : > { %6469 = vmatprep.subr.bf16.mxu0 %v6468_v23  ;;  %v9150_v23 = vsel %vm1065_vm5, %v2852_v55, %v2856_v22  ;;  %v6498_v0 = vpack.c.bf16 %v5235_v20, %v5231_v60  ;;  %v5288_v55 = vld [vmem:[%s10172_s6 + $0x898] sm:$0xff]  ;;  %v3047_v60 = vld [vmem:[%s10173_s7] sm:$0xf] }
 0x41d   : > { %v6524_v56 = vpack.c.bf16 %v5292_v6, %v5288_v55  ;;  %v3052_v20 = vrot.slane %v3047_v60, %v7685_v11  ;;  %v3056_v62 = vrot.slane %v3047_v60, %v7693_v13  ;;  %v3060_v6 = vrot.slane %v3047_v60, %v1299_v47 }
 0x41f   : > { %6471 = vmatpush1.bf16.msra.mxu0 %v6470_v43  ;;  %v5239_v43 = vld [vmem:[%s10172_s6 + $0x710] sm:$0xff] }
 0x420   : > { %6473 = vmatprep.subr.bf16.mxu0 %v6472_v57  ;;  %v5243_v57 = vld [vmem:[%s10172_s6 + $0x730] sm:$0xff] }
 0x423   : > { %6475 = vmatpush1.bf16.msra.mxu0 %v6474_v5  ;;  %v5251_v5 = vld [vmem:[%s10172_s6 + $0x770] sm:$0xff] }
 0x424   : > { %6477 = vmatprep.subr.bf16.mxu0 %v6476_v15  ;;  %v5256_v15 = vld [vmem:[%s10172_s6 + $0x798] sm:$0xff]  ;;  %v6506_v25 = vpack.c.bf16 %v5251_v5, %v5247_v16 }
 0x425   : > { %v6508_v52 = vpack.c.bf16 %v5260_v18, %v5256_v15 }
 0x427   : > { %6479 = vmatpush1.bf16.msra.mxu0 %v6478_v21  ;;  %v5259_v21 = vld [vmem:[%s10172_s6 + $0x7b0] sm:$0xff] }
 0x428   : > { %6481 = vmatprep.subr.bf16.mxu0 %v6480_v27  ;;  %v5264_v27 = vld [vmem:[%s10172_s6 + $0x7d8] sm:$0xff]  ;;  %v6510_v24 = vpack.c.bf16 %v5259_v21, %v5255_v19 }
 0x429   : > { %v6512_v28 = vpack.c.bf16 %v5268_v44, %v5264_v27 }
 0x42b   : > { %6483 = vmatpush1.bf16.msra.mxu0 %v6482_v31  ;;  %v5267_v31 = vld [vmem:[%s10172_s6 + $0x7f0] sm:$0xff] }
 0x42c   : > { %6485 = vmatprep.subr.bf16.mxu0 %v6484_v32  ;;  %v5272_v32 = vld [vmem:[%s10172_s6 + $0x818] sm:$0xff]  ;;  %v6514_v35 = vpack.c.bf16 %v5267_v31, %v5263_v30 }
 0x42d   : > { %v6516_v39 = vpack.c.bf16 %v5276_v61, %v5272_v32 }
 0x42e   : > { %2934 = vmatmul.mubr.f32.vlgmr.msra.gmra.mrb[16].mxu0 %v9103_v51 }
 0x42f   : > { %5302 = vmatprep.mubr.msk.f32.mxu0 %vm2172_vm11, %v9116_v29  ;;  %6487 = vmatpush1.bf16.msra.mxu0 %v6486_v48  ;;  %v6518_v48 = vpack.c.bf16 %v5275_v42, %v5271_v41  ;;  %v9268_v41 = vand.u32 127, %v1289_v8  ;;  %v3154_v42 = vmul.u32 2, %v7682_v9 }
 0x430   : > { %6489 = vmatprep.subr.bf16.mxu0 %v6488_v38  ;;  %v6520_v38 = vpack.c.bf16 %v5284_v46, %v5280_v45  ;;  %v3151_v45 = vadd.s32 8, %v7682_v9 }
 0x431   : > { %vm3156_vm13 = vcmp.eq.s32.totalorder %v9268_v41, %v3154_v42  ;;  %v3360_v42 = vld [vmem:[%s10174_s8 + $0xa8] sm:$0xff] }
 0x432   : > { %2940 = vmatmul.mubr.f32.gmra.mrb[18].mxu0 %v9128_v36  ;;  %v3155_v1 = vmul.u32 2, %v3151_v45  ;;  %v9275_v55 = vsel %vm3156_vm13, 1.0, %v6983_v7 }
 0x433   : > { %5303 = vmatprep.mubr.msk.f32.mxu0 %vm2172_vm11, %v9139_v53  ;;  %6491 = vmatpush1.bf16.msra.mxu0 %v6490_v63  ;;  %v5287_v63 = vld [vmem:[%s10172_s6 + $0x890] sm:$0xff] }
 0x434   : > { %6493 = vmatprep.subr.bf16.mxu0 %v6492_v58  ;;  %v5291_v58 = vld [vmem:[%s10172_s6 + $0x8b0] sm:$0xff]  ;;  %vm3157_vm15 = vcmp.eq.s32.totalorder %v9268_v41, %v3155_v1 }
 0x435   : > { %v6526_v22 = vpack.c.bf16 %v5291_v58, %v5287_v63  ;;  %v9283_v8 = vsel %vm3157_vm15, 1.0, %v6983_v7  ;;  %v3361_v1 = vld [vmem:[%s10174_s8 + $0xb0] sm:$0xff] }
 0x436   : > { %2946 = vmatmul.mubr.f32.gmra.mrb[20].mxu0 %v9150_v23 }
 0x437   : > { %6495 = vmatpush1.bf16.msra.mxu0 %v6494_v2  ;;  %5304 = vmatprep.mubr.msk.f32.mxu0 %vm2172_vm11, %v8981_v3  ;;  %v6502_v3 = vpack.c.bf16 %v5243_v57, %v5239_v43  ;;  %v5299_v2 = vld [vmem:[%s10172_s6 + $0x8f0] sm:$0xff] }
 0x438   : > { %6497 = vmatprep.subr.bf16.mxu0 %v6496_v34  ;;  %v6530_v34 = vpack.c.bf16 %v5299_v2, %v5295_v40 }
 0x43b   : > { %6499 = vmatpush1.bf16.msra.mxu0 %v6498_v0 }
 0x43c   : > { %6501 = vmatprep.subr.bf16.mxu0 %v6500_v4 }
 0x43f   : > { %6503 = vmatpush1.bf16.msra.mxu0 %v6502_v3 }
 0x440   : > { %6505 = vmatprep.subr.bf16.mxu0 %v6504_v14 }
 0x443   : > { %6507 = vmatpush1.bf16.msra.mxu0 %v6506_v25 }
 0x444   : > { %6509 = vmatprep.subr.bf16.mxu0 %v6508_v52 }
 0x447   : > { %6511 = vmatpush1.bf16.msra.mxu0 %v6510_v24 }
 0x448   : > { %6513 = vmatprep.subr.bf16.mxu0 %v6512_v28 }
 0x44b   : > { %6515 = vmatpush1.bf16.msra.mxu0 %v6514_v35 }
 0x44c   : > { %6517 = vmatprep.subr.bf16.mxu0 %v6516_v39 }
 0x44f   : > { %6519 = vmatpush1.bf16.msra.mxu0 %v6518_v48 }
 0x450   : > { %6521 = vmatprep.subr.bf16.mxu0 %v6520_v38 }
 0x453   : > { %6523 = vmatpush1.bf16.msra.mxu0 %v6522_v26  ;;  %v3064_v26 = vrot.slane %v3047_v60, %v1303_v37 }
 0x454   : > { %6525 = vmatprep.subr.bf16.mxu0 %v6524_v56 }
 0x457   : > { %6527 = vmatpush1.bf16.msra.mxu0 %v6526_v22 }
 0x458   : > { %6529 = vmatprep.subr.bf16.mxu0 %v6528_v59 }
 0x45b   : > { %6531 = vmatpush1.bf16.msra.mxu0 %v6530_v34 }
 0x45e   : > { %3017 = vmatmul.mubr.f32.vlgmr.msra.gmra.mrb[22].mxu0 %v9103_v51 }
 0x45f   : > { %5305 = vmatprep.mubr.msk.f32.mxu0 %vm2172_vm11, %v9116_v29 }
 0x462   : > { %3023 = vmatmul.mubr.f32.gmra.mrb[24].mxu0 %v9128_v36 }
 0x463   : > { %5306 = vmatprep.mubr.msk.f32.mxu0 %vm2172_vm11, %v9139_v53 }
 0x466   : > { %3029 = vmatmul.mubr.f32.gmra.mrb[26].mxu0 %v9150_v23 }
 0x467   : > { %5762 = vmatprep.mubr.msk.f32.mxu0 %vm6986_vm8, %v6983_v7 }
 0x501   : > { %v2935_v12 = vpop.f32.mrb[16].mxu0 }
 0x502   : > { %v3069_v51 = vadd.f32 %v3052_v20, %v2935_v12  ;;  %v2937_v0 = vpop.f32.mrb[17].mxu0 }
 0x503   : > { %v3070_v4 = vadd.f32 %v3056_v62, %v2937_v0 }
 0x504   : > { %v3081_v43 = vmax.f32 %v3069_v51, 0.0 }
 0x505   : > { %v2941_v29 = vpop.f32.mrb[18].mxu0  ;;  %v3082_v54 = vmax.f32 %v3070_v4, 0.0 }
 0x506   : > { %v3073_v36 = vadd.f32 %v3052_v20, %v2941_v29  ;;  %v2943_v57 = vpop.f32.mrb[19].mxu0  ;;  %v3105_v14 = vrot.slane %v3081_v43, 1 }
 0x507   : > { %v3074_v53 = vadd.f32 %v3056_v62, %v2943_v57  ;;  %v3108_v18 = vrot.slane %v3082_v54, 1 }
 0x508   : > { %v3085_v50 = vmax.f32 %v3073_v36, 0.0 }
 0x509   : > { %v3086_v23 = vmax.f32 %v3074_v53, 0.0  ;;  %v2947_v3 = vpop.f32.mrb[20].mxu0 }
 0x50a   : > { %v3106_v16 = vrot.slane %v3085_v50, 1  ;;  %v3077_v5 = vadd.f32 %v3052_v20, %v2947_v3  ;;  %v2949_v15 = vpop.f32.mrb[21].mxu0 }
 0x50b   : > { %v3109_v25 = vrot.slane %v3086_v23, 1  ;;  %v3078_v52 = vadd.f32 %v3056_v62, %v2949_v15 }
 0x50c   : > { %v3107_v19 = vsel %vm642_vm3, %v3105_v14, %v3106_v16  ;;  %v3089_v21 = vmax.f32 %v3077_v5, 0.0 }
 0x50d   : > { %v3137_v27 = vmax.f32 %v3081_v43, %v3107_v19  ;;  %v3090_v44 = vmax.f32 %v3078_v52, 0.0  ;;  %v3110_v24 = vsel %vm642_vm3, %v3108_v18, %v3109_v25  ;;  %v3356_v52 = vld [vmem:[%s10174_s8 + $0x88] sm:$0xff] }
 0x50e   : > { %v3117_v28 = vrot.slane %v3089_v21, 1  ;;  %v3138_v30 = vmax.f32 %v3082_v54, %v3110_v24  ;;  %v3358_v24 = vld [vmem:[%s10174_s8 + $0x98] sm:$0xff] }
 0x50f   : > { %v3119_v31 = vrot.slane %v3090_v44, 1 }
 0x510   : > { %v3118_v32 = vsel %vm642_vm3, %v3106_v16, %v3117_v28  ;;  %v3145_v49 = vmax.f32 %v3089_v21, %v3117_v28  ;;  %v3339_v21 = vld [vmem:[%s10174_s8] sm:$0xff] }
 0x511   : > { %v3141_v61 = vmax.f32 %v3085_v50, %v3118_v32  ;;  %v3120_v35 = vsel %vm642_vm3, %v3109_v25, %v3119_v31  ;;  %v3146_v38 = vmax.f32 %v3090_v44, %v3119_v31  ;;  %v3355_v25 = vld [vmem:[%s10174_s8 + $0x80] sm:$0xff]  ;;  %v3357_v44 = vld [vmem:[%s10174_s8 + $0x90] sm:$0xff] }
 0x512   : > { %v3142_v39 = vmax.f32 %v3086_v23, %v3120_v35  ;;  %v6540_v28 = vpack.c.bf16 %v3356_v52, %v3355_v25  ;;  %v6544_v32 = vpack.c.bf16 %v3358_v24, %v3357_v44  ;;  %v3342_v35 = vld [vmem:[%s10174_s8 + $0x18] sm:$0xff]  ;;  %v5321_v24 = vld [vmem:[%s10175_s9 + $0x80] sm:$0xff] }
 0x513   : > { %v6534_v46 = vpack.c.bf16 %v3141_v61, %v3137_v27  ;;  %v3340_v27 = vld [vmem:[%s10174_s8 + $0x8] sm:$0xff]  ;;  %v3341_v61 = vld [vmem:[%s10174_s8 + $0x10] sm:$0xff]  ;;  %v5320_v25 = vld [vmem:[%s10175_s9 + $0x78] sm:$0xff] }
 0x514   : > { %v6532_v48 = vpack.c.bf16 %v3142_v39, %v3138_v30  ;;  %v6542_v31 = vpack.c.bf16 %v3340_v27, %v3339_v21  ;;  %v3359_v39 = vld [vmem:[%s10174_s8 + $0xa0] sm:$0xff]  ;;  %v6546_v45 = vpack.c.bf16 %v3342_v35, %v3341_v61  ;;  %v5323_v35 = vld [vmem:[%s10175_s9 + $0x90] sm:$0xff] }
 0x516   : > { %6533 = vmatprep.subr.bf16.mxu1 %v6532_v48  ;;  %v3343_v48 = vld [vmem:[%s10174_s8 + $0x20] sm:$0xff] }
 0x517   : > { %6535 = vmatpush1.bf16.msra.mxu1 %v6534_v46  ;;  %v6548_v46 = vpack.c.bf16 %v3360_v42, %v3359_v39  ;;  %v5324_v39 = vld [vmem:[%s10175_s9 + $0x98] sm:$0xff] }
 0x518   : > { %5309 = vmatprep.subr.msk.mxu1 %vm642_vm3, %v3146_v38  ;;  %v3344_v38 = vld [vmem:[%s10174_s8 + $0x28] sm:$0xff]  ;;  %v6584_v42 = vpack.c.bf16 %v5324_v39, %v5323_v35  ;;  %v5348_v39 = vld [vmem:[%s10177_s11 + $0xa0] sm:$0xff] }
 0x51b   : > { %5310 = vmatpush1.msk.msra.mxu1 %vm642_vm3, %v3145_v49  ;;  %v3362_v49 = vld [vmem:[%s10174_s8 + $0xb8] sm:$0xff] }
 0x51c   : > { %5311 = vmatmul.mubr.msk.f32.vlgmr.msra.gmra.mrb[14].mxu1 %vm3162_vm14, %v9275_v55 }
 0x51d   : > { %3251 = vmatprep.mubr.f32.mxu1 %v6983_v7 }
 0x520   : > { %5312 = vmatmul.mubr.msk.f32.gmra.mrb[16].mxu1 %vm3162_vm14, %v9283_v8 }
 0x521   : > { %3322 = vmatprep.mubr.f32.mxu1 %v6983_v7 }
 0x531   : > { %v3018_v56 = vpop.f32.mrb[22].mxu0 }
 0x532   : > { %v3071_v63 = vadd.f32 %v3060_v6, %v3018_v56  ;;  %v3020_v58 = vpop.f32.mrb[23].mxu0  ;;  %v3346_v56 = vld [vmem:[%s10174_s8 + $0x38] sm:$0xff] }
 0x533   : > { %v3072_v17 = vadd.f32 %v3064_v26, %v3020_v58 }
 0x534   : > { %v3083_v22 = vmax.f32 %v3071_v63, 0.0  ;;  %v3363_v63 = vld [vmem:[%s10174_s8 + $0xc0] sm:$0xff] }
 0x535   : > { %v3024_v33 = vpop.f32.mrb[24].mxu0  ;;  %v3084_v2 = vmax.f32 %v3072_v17, 0.0 }
 0x536   : > { %v3075_v59 = vadd.f32 %v3060_v6, %v3024_v33  ;;  %v3026_v40 = vpop.f32.mrb[25].mxu0  ;;  %v3111_v51 = vrot.slane %v3083_v22, 1  ;;  %v3347_v33 = vld [vmem:[%s10174_s8 + $0x40] sm:$0xff] }
 0x537   : > { %v3076_v34 = vadd.f32 %v3064_v26, %v3026_v40  ;;  %v3114_v29 = vrot.slane %v3084_v2, 1  ;;  %v3366_v40 = vld [vmem:[%s10174_s8 + $0xd8] sm:$0xff] }
 0x538   : > { %v3087_v20 = vmax.f32 %v3075_v59, 0.0  ;;  %v3365_v59 = vld [vmem:[%s10174_s8 + $0xd0] sm:$0xff] }
 0x539   : > { %v3088_v62 = vmax.f32 %v3076_v34, 0.0  ;;  %v3030_v12 = vpop.f32.mrb[26].mxu0  ;;  %v6560_v34 = vpack.c.bf16 %v3366_v40, %v3365_v59  ;;  %v3449_v59 = vld [vmem:[%s10175_s9 + $0x18] sm:$0xff] }
 0x53a   : > { %v3112_v0 = vrot.slane %v3087_v20, 1  ;;  %v3079_v4 = vadd.f32 %v3060_v6, %v3030_v12  ;;  %v3032_v47 = vpop.f32.mrb[27].mxu0  ;;  %v6552_v6 = vpack.c.bf16 %v3362_v49, %v3361_v1  ;;  %v5328_v1 = vld [vmem:[%s10175_s9 + $0xb8] sm:$0xff] }
 0x53b   : > { %v3115_v9 = vrot.slane %v3088_v62, 1  ;;  %v3080_v37 = vadd.f32 %v3064_v26, %v3032_v47  ;;  %v3345_v26 = vld [vmem:[%s10174_s8 + $0x30] sm:$0xff]  ;;  %v3351_v47 = vld [vmem:[%s10174_s8 + $0x60] sm:$0xff] }
 0x53c   : > { %v3113_v60 = vsel %vm642_vm3, %v3111_v51, %v3112_v0  ;;  %v3091_v43 = vmax.f32 %v3079_v4, 0.0  ;;  %v6554_v58 = vpack.c.bf16 %v3346_v56, %v3345_v26  ;;  %v3367_v51 = vld [vmem:[%s10174_s8 + $0xe0] sm:$0xff] }
 0x53d   : > { %v3139_v36 = vmax.f32 %v3083_v22, %v3113_v60  ;;  %v3092_v57 = vmax.f32 %v3080_v37, 0.0  ;;  %v3116_v54 = vsel %vm642_vm3, %v3114_v29, %v3115_v9  ;;  %v3348_v22 = vld [vmem:[%s10174_s8 + $0x48] sm:$0xff]  ;;  %v3369_v37 = vld [vmem:[%s10174_s8 + $0xf0] sm:$0xff]  ;;  %v3370_v60 = vld [vmem:[%s10174_s8 + $0xf8] sm:$0xff] }
 0x53e   : > { %v3121_v53 = vrot.slane %v3091_v43, 1  ;;  %v3140_v50 = vmax.f32 %v3084_v2, %v3116_v54  ;;  %v6558_v2 = vpack.c.bf16 %v3348_v22, %v3347_v33  ;;  %v3352_v29 = vld [vmem:[%s10174_s8 + $0x68] sm:$0xff]  ;;  %v3448_v22 = vld [vmem:[%s10175_s9 + $0x10] sm:$0xff] }
 0x53f   : > { %v3123_v23 = vrot.slane %v3092_v57, 1 }
 0x540   : > { %v3122_v3 = vsel %vm642_vm3, %v3112_v0, %v3121_v53  ;;  %v3147_v30 = vmax.f32 %v3091_v43, %v3121_v53  ;;  %v3368_v0 = vld [vmem:[%s10174_s8 + $0xe8] sm:$0xff]  ;;  %v6568_v43 = vpack.c.bf16 %v3370_v60, %v3369_v37  ;;  %v5317_v53 = vld [vmem:[%s10175_s9 + $0x60] sm:$0xff] }
 0x541   : > { %v3143_v14 = vmax.f32 %v3087_v20, %v3122_v3  ;;  %v3124_v16 = vsel %vm642_vm3, %v3115_v9, %v3123_v23  ;;  %v3148_v19 = vmax.f32 %v3092_v57, %v3123_v23  ;;  %v3349_v20 = vld [vmem:[%s10174_s8 + $0x50] sm:$0xff]  ;;  %v6564_v4 = vpack.c.bf16 %v3368_v0, %v3367_v51  ;;  %v3354_v57 = vld [vmem:[%s10174_s8 + $0x78] sm:$0xff]  ;;  %v3450_v0 = vld [vmem:[%s10175_s9 + $0x20] sm:$0xff] }
 0x542   : > { %v3144_v5 = vmax.f32 %v3088_v62, %v3124_v16  ;;  %v3350_v62 = vld [vmem:[%s10174_s8 + $0x58] sm:$0xff]  ;;  %v6566_v9 = vpack.c.bf16 %v3352_v29, %v3351_v47  ;;  %v3452_v29 = vld [vmem:[%s10175_s9 + $0x30] sm:$0xff]  ;;  %v3454_v60 = vld [vmem:[%s10175_s9 + $0x40] sm:$0xff] }
 0x543   : > { %v6538_v15 = vpack.c.bf16 %v3143_v14, %v3139_v36  ;;  %v6562_v12 = vpack.c.bf16 %v3350_v62, %v3349_v20  ;;  %v3353_v36 = vld [vmem:[%s10174_s8 + $0x70] sm:$0xff] }
 0x544   : > { %v6536_v18 = vpack.c.bf16 %v3144_v5, %v3140_v50  ;;  %v6570_v54 = vpack.c.bf16 %v3354_v57, %v3353_v36  ;;  %v5318_v50 = vld [vmem:[%s10175_s9 + $0x68] sm:$0xff]  ;;  %v3456_v57 = vld [vmem:[%s10175_s9 + $0x50] sm:$0xff] }
 0x545   : > { %v6572_v23 = vpack.c.bf16 %v5318_v50, %v5317_v53  ;;  %v5333_v50 = vld [vmem:[%s10175_s9 + $0xc0] sm:$0xff] }
 0x546   : > { %6537 = vmatprep.subr.bf16.mxu1 %v6536_v18  ;;  %v5319_v18 = vld [vmem:[%s10175_s9 + $0x70] sm:$0xff] }
 0x547   : > { %6539 = vmatpush1.bf16.msra.mxu1 %v6538_v15  ;;  %v6576_v27 = vpack.c.bf16 %v5320_v25, %v5319_v18  ;;  %v5338_v18 = vld [vmem:[%s10175_s9 + $0xe8] sm:$0xff] }
 0x548   : > { %5313 = vmatprep.subr.msk.mxu1 %vm642_vm3, %v3148_v19 }
 0x54b   : > { %5314 = vmatpush1.msk.msra.mxu1 %vm642_vm3, %v3147_v30 }
 0x54c   : > { %5315 = vmatmul.mubr.msk.f32.vlgmr.msra.gmra.mrb[18].mxu1 %vm3162_vm14, %v9275_v55  ;;  %6541 = vmatprep.subr.bf16.mxu1 %v6540_v28  ;;  %v6550_v55 = vpack.c.bf16 %v3344_v38, %v3343_v48  ;;  %v5322_v28 = vld [vmem:[%s10175_s9 + $0x88] sm:$0xff]  ;;  %v5327_v38 = vld [vmem:[%s10175_s9 + $0xb0] sm:$0xff] }
 0x54d   : > { %3328 = vmatprep.mubr.f32.mxu1 %v6983_v7  ;;  %6543 = vmatpush3.bf16.msra.mxu1 %v6542_v31  ;;  %v6580_v61 = vpack.c.bf16 %v5322_v28, %v5321_v24  ;;  %v6592_v49 = vpack.c.bf16 %v5328_v1, %v5327_v38  ;;  %v5343_v28 = vld [vmem:[%s10175_s9 + $0x110] sm:$0xff]  ;;  %v5352_v1 = vld [vmem:[%s10177_s11 + $0xc0] sm:$0xff] }
 0x54e   : > { %6545 = vmatprep.subr.bf16.mxu1 %v6544_v32 }
 0x550   : > { %5316 = vmatmul.mubr.msk.f32.gmra.mrb[20].mxu1 %vm3162_vm14, %v9283_v8  ;;  %v3364_v8 = vld [vmem:[%s10174_s8 + $0xc8] sm:$0xff] }
 0x551   : > { %6547 = vmatpush3.bf16.msra.mxu1 %v6546_v45  ;;  %v6556_v17 = vpack.c.bf16 %v3364_v8, %v3363_v63  ;;  %v5325_v45 = vld [vmem:[%s10175_s9 + $0xa0] sm:$0xff] }
 0x552   : > { %6549 = vmatprep.subr.bf16.mxu1 %v6548_v46  ;;  %v5326_v46 = vld [vmem:[%s10175_s9 + $0xa8] sm:$0xff] }
 0x553   : > { %v6588_v48 = vpack.c.bf16 %v5326_v46, %v5325_v45  ;;  %v5353_v46 = vld [vmem:[%s10177_s11 + $0xc8] sm:$0xff] }
 0x555   : > { %6551 = vmatpush3.bf16.msra.mxu1 %v6550_v55  ;;  %v3446_v55 = vld [vmem:[%s10175_s9] sm:$0xff] }
 0x556   : > { %6553 = vmatprep.subr.bf16.mxu1 %v6552_v6  ;;  %v3447_v6 = vld [vmem:[%s10175_s9 + $0x8] sm:$0xff] }
 0x557   : > { %v6596_v26 = vpack.c.bf16 %v3447_v6, %v3446_v55  ;;  %v5357_v6 = vld [vmem:[%s10177_s11 + $0xe8] sm:$0xff] }
 0x559   : > { %6555 = vmatpush3.bf16.msra.mxu1 %v6554_v58 }
 0x55a   : > { %6557 = vmatprep.subr.bf16.mxu1 %v6556_v17 }
 0x55d   : > { %6559 = vmatpush3.bf16.msra.mxu1 %v6558_v2 }
 0x55e   : > { %6561 = vmatprep.subr.bf16.mxu1 %v6560_v34 }
 0x561   : > { %6563 = vmatpush3.bf16.msra.mxu1 %v6562_v12  ;;  %v6600_v12 = vpack.c.bf16 %v3449_v59, %v3448_v22  ;;  %v5360_v59 = vld [vmem:[%s10177_s11 + $0x100] sm:$0xff] }
 0x562   : > { %6565 = vmatprep.subr.bf16.mxu1 %v6564_v4  ;;  %v3451_v4 = vld [vmem:[%s10175_s9 + $0x28] sm:$0xff] }
 0x563   : > { %v6604_v47 = vpack.c.bf16 %v3451_v4, %v3450_v0  ;;  %v3752_v0 = vld [vmem:[%s10177_s11 + $0x8] sm:$0xff]  ;;  %v3754_v4 = vld [vmem:[%s10177_s11 + $0x18] sm:$0xff] }
 0x565   : > { %6567 = vmatpush3.bf16.msra.mxu1 %v6566_v9  ;;  %v3453_v9 = vld [vmem:[%s10175_s9 + $0x38] sm:$0xff] }
 0x566   : > { %6569 = vmatprep.subr.bf16.mxu1 %v6568_v43  ;;  %v6608_v37 = vpack.c.bf16 %v3453_v9, %v3452_v29  ;;  %v3455_v43 = vld [vmem:[%s10175_s9 + $0x48] sm:$0xff]  ;;  %v6664_v29 = vpack.c.bf16 %v3754_v4, %v3752_v0  ;;  %v6985_v9 = vmov 0.0|0.0   ;;  %v5380_v0 = vld [vmem:[%s10177_s11 + $0x180] sm:$0xff]  ;;  %v5382_v4 = vld [vmem:[%s10177_s11 + $0x190] sm:$0xff] }
 0x567   : > { %v6612_v36 = vpack.c.bf16 %v3455_v43, %v3454_v60  ;;  %6747 = vmatprep.subr.bf16.mxu0 %v6985_v9 }
 0x569   : > { %6571 = vmatpush3.bf16.msra.mxu1 %v6570_v54  ;;  %v3457_v54 = vld [vmem:[%s10175_s9 + $0x58] sm:$0xff] }
 0x56a   : > { %6573 = vmatprep.subr.bf16.mxu1 %v6572_v23  ;;  %v6616_v53 = vpack.c.bf16 %v3457_v54, %v3456_v57 }
 0x5ef   : > { %v3247_v3 = vpop.f32.mrb[14].mxu1 }
 0x5f0   : > { %v3249_v14 = vpop.f32.mrb[15].mxu1 }
 0x5f3   : > { %v3253_v16 = vpop.f32.mrb[16].mxu1 }
 0x5f4   : > { %v3255_v5 = vpop.f32.mrb[17].mxu1 }
 0x61f   : > { %v3324_v15 = vpop.f32.mrb[18].mxu1 }
 0x620   : > { %v3335_v52 = vmax.f32 %v3247_v3, %v3324_v15  ;;  %v3326_v19 = vpop.f32.mrb[19].mxu1  ;;  %v5337_v15 = vld [vmem:[%s10175_s9 + $0xe0] sm:$0xff] }
 0x621   : > { %v3336_v21 = vmax.f32 %v3249_v14, %v3326_v19  ;;  %v5335_v14 = vld [vmem:[%s10175_s9 + $0xd0] sm:$0xff]  ;;  %v6628_v25 = vpack.c.bf16 %v5338_v18, %v5337_v15  ;;  %v5340_v19 = vld [vmem:[%s10175_s9 + $0xf8] sm:$0xff] }
 0x623   : > { %v3330_v44 = vpop.f32.mrb[20].mxu1  ;;  %3435 = vmatprep.mubr.f32.mxu1 %v3336_v21 }
 0x624   : > { %v3337_v30 = vmax.f32 %v3253_v16, %v3330_v44  ;;  %v3332_v31 = vpop.f32.mrb[21].mxu1  ;;  %3436 = vmatmul.mubr.f32.vlgmr.msra.gmra.mrb[22].mxu1 %v3335_v52  ;;  %v5336_v16 = vld [vmem:[%s10175_s9 + $0xd8] sm:$0xff]  ;;  %v5339_v52 = vld [vmem:[%s10175_s9 + $0xf0] sm:$0xff]  ;;  %v5342_v44 = vld [vmem:[%s10175_s9 + $0x108] sm:$0xff] }
 0x625   : > { %v3338_v32 = vmax.f32 %v3255_v5, %v3332_v31  ;;  %6575 = vmatpush3.bf16.msra.mxu1 %v6572_v23  ;;  %v5334_v23 = vld [vmem:[%s10175_s9 + $0xc8] sm:$0xff]  ;;  %v6624_v5 = vpack.c.bf16 %v5336_v16, %v5335_v14  ;;  %v6632_v21 = vpack.c.bf16 %v5340_v19, %v5339_v52  ;;  %v3758_v14 = vld [vmem:[%s10177_s11 + $0x38] sm:$0xff]  ;;  %v3755_v19 = vld [vmem:[%s10177_s11 + $0x20] sm:$0xff] }
 0x626   : > { %6577 = vmatprep.subr.bf16.mxu1 %v6576_v27  ;;  %v6620_v3 = vpack.c.bf16 %v5334_v23, %v5333_v50  ;;  %v3751_v50 = vld [vmem:[%s10177_s11] sm:$0xff]  ;;  %v3753_v23 = vld [vmem:[%s10177_s11 + $0x10] sm:$0xff] }
 0x627   : > { %3440 = vmatprep.mubr.f32.mxu1 %v3338_v32  ;;  %v5349_v32 = vld [vmem:[%s10177_s11 + $0xa8] sm:$0xff] }
 0x628   : > { %3441 = vmatmul.mubr.f32.gmra.mrb[24].mxu1 %v3337_v30  ;;  %v5344_v30 = vld [vmem:[%s10175_s9 + $0x118] sm:$0xff] }
 0x629   : > { %6579 = vmatpush3.bf16.msra.mxu1 %v6576_v27  ;;  %v5341_v27 = vld [vmem:[%s10175_s9 + $0x100] sm:$0xff]  ;;  %v6640_v31 = vpack.c.bf16 %v5344_v30, %v5343_v28 }
 0x62a   : > { %6581 = vmatprep.subr.bf16.mxu1 %v6580_v61  ;;  %v6636_v24 = vpack.c.bf16 %v5342_v44, %v5341_v27  ;;  %v3760_v44 = vld [vmem:[%s10177_s11 + $0x48] sm:$0xff] }
 0x62d   : > { %6583 = vmatpush3.bf16.msra.mxu1 %v6580_v61  ;;  %v5351_v61 = vld [vmem:[%s10177_s11 + $0xb8] sm:$0xff] }
 0x62e   : > { %6585 = vmatprep.subr.bf16.mxu1 %v6584_v42  ;;  %v6644_v35 = vpack.c.bf16 %v5351_v61, %v5349_v32  ;;  %v3761_v32 = vld [vmem:[%s10177_s11 + $0x50] sm:$0xff]  ;;  %v3764_v61 = vld [vmem:[%s10177_s11 + $0x68] sm:$0xff] }
 0x631   : > { %6587 = vmatpush3.bf16.msra.mxu1 %v6584_v42  ;;  %v5350_v42 = vld [vmem:[%s10177_s11 + $0xb0] sm:$0xff] }
 0x632   : > { %6589 = vmatprep.subr.bf16.mxu1 %v6588_v48  ;;  %v6646_v45 = vpack.c.bf16 %v5350_v42, %v5348_v39 }
 0x635   : > { %6591 = vmatpush3.bf16.msra.mxu1 %v6588_v48  ;;  %v5355_v48 = vld [vmem:[%s10177_s11 + $0xd8] sm:$0xff] }
 0x636   : > { %6593 = vmatprep.subr.bf16.mxu1 %v6592_v49  ;;  %v6648_v38 = vpack.c.bf16 %v5355_v48, %v5353_v46  ;;  %v3765_v46 = vld [vmem:[%s10177_s11 + $0x70] sm:$0xff]  ;;  %v3768_v48 = vld [vmem:[%s10177_s11 + $0x88] sm:$0xff] }
 0x639   : > { %6595 = vmatpush3.bf16.msra.mxu1 %v6592_v49  ;;  %v5354_v49 = vld [vmem:[%s10177_s11 + $0xd0] sm:$0xff] }
 0x63a   : > { %6597 = vmatprep.subr.bf16.mxu1 %v6596_v26  ;;  %v6650_v55 = vpack.c.bf16 %v5354_v49, %v5352_v1 }
 0x6f7   : > { %v5491_v56 = vpop.f32.mrb[22].mxu1 }
 0x6f8   : > { %v5492_v63 = vpop.f32.mrb[23].mxu1 }
 0x6f9   : > { %v5493_v8 = vadd.f32 %v5492_v63, %v5491_v56  ;;  %v5356_v63 = vld [vmem:[%s10177_s11 + $0xe0] sm:$0xff] }
 0x6fb   : > { %v5494_v58 = vpop.f32.mrb[24].mxu1  ;;  %v3473_v40 = vrot.slane %v5493_v8, 1  ;;  %v3648_v2 = vrot.slane %v5493_v8, 2 }
 0x6fc   : > { %v5495_v17 = vpop.f32.mrb[25].mxu1 }
 0x6fd   : > { %v9441_v33 = vadd.f32 %v5495_v17, %v5494_v58  ;;  %v5361_v17 = vld [vmem:[%s10177_s11 + $0x108] sm:$0xff] }
 0x6ff   : > { %v3474_v34 = vrot.slane %v9441_v33, 1  ;;  %v3649_v20 = vrot.slane %v9441_v33, 2 }
 0x701   : > { %v3475_v62 = vsel %vm642_vm3, %v3473_v40, %v3474_v34  ;;  %v3650_v51 = vsel %vm1065_vm5, %v3648_v2, %v3649_v20  ;;  %v5362_v40 = vld [vmem:[%s10177_s11 + $0x110] sm:$0xff]  ;;  %v5365_v2 = vld [vmem:[%s10177_s11 + $0x128] sm:$0xff] }
 0x702   : > { %5662 = vmatprep.mubr.msk.f32.mxu1 %vm3476_vm0, %v3475_v62  ;;  %v5364_v62 = vld [vmem:[%s10177_s11 + $0x120] sm:$0xff] }
 0x703   : > { %5663 = vmatmul.mubr.msk.f32.vlgmr.msra.gmra.mrb[26].mxu1 %vm3476_vm0, %v3474_v34  ;;  %v6658_v34 = vpack.c.bf16 %v5362_v40, %v5360_v59 }
 0x704   : > { %6599 = vmatpush3.bf16.msra.mxu1 %v6596_v26  ;;  %5689 = vmatprep.mubr.msk.f32.mxu1 %vm3476_vm0, %v5493_v8  ;;  %v5359_v26 = vld [vmem:[%s10177_s11 + $0xf8] sm:$0xff]  ;;  %v5358_v8 = vld [vmem:[%s10177_s11 + $0xf0] sm:$0xff] }
 0x705   : > { %6601 = vmatprep.subr.bf16.mxu1 %v6600_v12  ;;  %v6652_v56 = vpack.c.bf16 %v5359_v26, %v5357_v6  ;;  %v6654_v58 = vpack.c.bf16 %v5358_v8, %v5356_v63  ;;  %v3769_v6 = vld [vmem:[%s10177_s11 + $0x90] sm:$0xff]  ;;  %v5373_v26 = vld [vmem:[%s10177_s11 + $0x148] sm:$0xff] }
 0x708   : > { %6603 = vmatpush3.bf16.msra.mxu1 %v6600_v12  ;;  %v5366_v12 = vld [vmem:[%s10177_s11 + $0x130] sm:$0xff] }
 0x709   : > { %6605 = vmatprep.subr.bf16.mxu1 %v6604_v47 }
 0x70c   : > { %6607 = vmatpush3.bf16.msra.mxu1 %v6604_v47  ;;  %v6662_v47 = vpack.c.bf16 %v5366_v12, %v5364_v62  ;;  %v5383_v62 = vld [vmem:[%s10177_s11 + $0x198] sm:$0xff] }
 0x70d   : > { %6609 = vmatprep.subr.bf16.mxu1 %v6608_v37 }
 0x710   : > { %6611 = vmatpush3.bf16.msra.mxu1 %v6608_v37  ;;  %v5347_v37 = vld [vmem:[%s10176_s10] ss:$0 sm:$0xff] }
 0x711   : > { %6613 = vmatprep.subr.bf16.mxu1 %v6612_v36 }
 0x714   : > { %6615 = vmatpush3.bf16.msra.mxu1 %v6612_v36 }
 0x715   : > { %6617 = vmatprep.subr.bf16.mxu1 %v6616_v53 }
 0x718   : > { %6619 = vmatpush3.bf16.msra.mxu1 %v6616_v53 }
 0x719   : > { %6621 = vmatprep.subr.bf16.mxu1 %v6620_v3 }
 0x71b   : > { %5690 = vmatmul.mubr.msk.f32.vlgmr.msra.gmra.mrb[26].mxu1 %vm3476_vm0, %v9441_v33  ;;  %v5363_v33 = vld [vmem:[%s10177_s11 + $0x118] sm:$0xff] }
 0x71c   : > { %6623 = vmatpush3.bf16.msra.mxu1 %v6620_v3  ;;  %5716 = vmatprep.mubr.msk.f32.mxu1 %vm3476_vm0, %v3650_v51  ;;  %v6656_v22 = vpack.c.bf16 %v5363_v33, %v5361_v17  ;;  %v3756_v3 = vld [vmem:[%s10177_s11 + $0x28] sm:$0xff]  ;;  %v5374_v17 = vld [vmem:[%s10177_s11 + $0x150] sm:$0xff] }
 0x71d   : > { %6625 = vmatprep.subr.bf16.mxu1 %v6624_v5  ;;  %v6668_v52 = vpack.c.bf16 %v3758_v14, %v3756_v3  ;;  %v5377_v33 = vld [vmem:[%s10177_s11 + $0x168] sm:$0xff]  ;;  %v5390_v3 = vld [vmem:[%s10177_s11 + $0x1d0] sm:$0xff] }
 0x720   : > { %6627 = vmatpush3.bf16.msra.mxu1 %v6624_v5 }
 0x721   : > { %6629 = vmatprep.subr.bf16.mxu1 %v6628_v25 }
 0x724   : > { %6631 = vmatpush3.bf16.msra.mxu1 %v6628_v25  ;;  %v6666_v25 = vpack.c.bf16 %v3753_v23, %v3751_v50  ;;  %v5388_v23 = vld [vmem:[%s10177_s11 + $0x1c0] sm:$0xff] }
 0x725   : > { %6633 = vmatprep.subr.bf16.mxu1 %v6632_v21  ;;  %v6702_v14 = vpack.c.bf16 %v5390_v3, %v5388_v23 }
 0x728   : > { %6635 = vmatpush3.bf16.msra.mxu1 %v6632_v21  ;;  %v3757_v21 = vld [vmem:[%s10177_s11 + $0x30] sm:$0xff] }
 0x729   : > { %6637 = vmatprep.subr.bf16.mxu1 %v6636_v24  ;;  %v6670_v28 = vpack.c.bf16 %v3757_v21, %v3755_v19  ;;  %v4090_v21 = vld [vmem:[%s10179_s13 + $0x10] sm:$0xff] }
 0x72c   : > { %6639 = vmatpush3.bf16.msra.mxu1 %v6636_v24  ;;  %v3762_v24 = vld [vmem:[%s10177_s11 + $0x58] sm:$0xff] }
 0x72d   : > { %6641 = vmatprep.subr.bf16.mxu1 %v6640_v31  ;;  %v6672_v30 = vpack.c.bf16 %v3762_v24, %v3760_v44  ;;  %v4093_v24 = vld [vmem:[%s10179_s13 + $0x28] sm:$0xff] }
 0x730   : > { %6643 = vmatpush3.bf16.msra.mxu1 %v6640_v31  ;;  %v3759_v31 = vld [vmem:[%s10177_s11 + $0x40] sm:$0xff] }
 0x731   : > { %6645 = vmatprep.subr.bf16.mxu1 %v6644_v35  ;;  %v3766_v35 = vld [vmem:[%s10177_s11 + $0x78] sm:$0xff]  ;;  %v6674_v39 = vpack.c.bf16 %v3761_v32, %v3759_v31 }
 0x732   : > { %v6676_v42 = vpack.c.bf16 %v3766_v35, %v3764_v61  ;;  %v4095_v31 = vld [vmem:[%s10179_s13 + $0x38] sm:$0xff]  ;;  %v4096_v61 = vld [vmem:[%s10179_s13 + $0x40] sm:$0xff]  ;;  %v4097_v35 = vld [vmem:[%s10179_s13 + $0x48] sm:$0xff] }
 0x733   : > { %5717 = vmatmul.mubr.msk.f32.vlgmr.msra.gmra.mrb[26].mxu1 %vm3476_vm0, %v3649_v20  ;;  %v5367_v20 = vld [vmem:[%s10177_s11 + $0x138] sm:$0xff] }
 0x734   : > { %6647 = vmatpush1.bf16.msra.mxu1 %v6646_v45  ;;  %3865 = vmatprep.mubr.f32.mxu1 %v6983_v7  ;;  %v6660_v51 = vpack.c.bf16 %v5367_v20, %v5365_v2  ;;  %v3763_v45 = vld [vmem:[%s10177_s11 + $0x60] sm:$0xff]  ;;  %v5381_v20 = vld [vmem:[%s10177_s11 + $0x188] sm:$0xff] }
 0x735   : > { %6649 = vmatprep.subr.bf16.mxu1 %v6648_v38  ;;  %v3770_v38 = vld [vmem:[%s10177_s11 + $0x98] sm:$0xff]  ;;  %v6678_v1 = vpack.c.bf16 %v3765_v46, %v3763_v45  ;;  %v5376_v2 = vld [vmem:[%s10177_s11 + $0x160] sm:$0xff] }
 0x736   : > { %v6680_v49 = vpack.c.bf16 %v3770_v38, %v3768_v48  ;;  %v4099_v45 = vld [vmem:[%s10179_s13 + $0x58] sm:$0xff]  ;;  %v4100_v48 = vld [vmem:[%s10179_s13 + $0x60] sm:$0xff]  ;;  %v4101_v38 = vld [vmem:[%s10179_s13 + $0x68] sm:$0xff] }
 0x738   : > { %6651 = vmatpush1.bf16.msra.mxu1 %v6650_v55  ;;  %v3767_v55 = vld [vmem:[%s10177_s11 + $0x80] sm:$0xff] }
 0x739   : > { %6653 = vmatprep.subr.bf16.mxu1 %v6652_v56  ;;  %v5375_v56 = vld [vmem:[%s10177_s11 + $0x158] sm:$0xff]  ;;  %v6682_v63 = vpack.c.bf16 %v3769_v6, %v3767_v55 }
 0x73a   : > { %v6684_v8 = vpack.c.bf16 %v5375_v56, %v5373_v26  ;;  %v4103_v55 = vld [vmem:[%s10179_s13 + $0x78] sm:$0xff]  ;;  %v4104_v26 = vld [vmem:[%s10179_s13 + $0x80] sm:$0xff]  ;;  %v4105_v56 = vld [vmem:[%s10179_s13 + $0x88] sm:$0xf] }
 0x73c   : > { %6655 = vmatpush1.bf16.msra.mxu1 %v6654_v58  ;;  %v5372_v58 = vld [vmem:[%s10177_s11 + $0x140] sm:$0xff] }
 0x73d   : > { %6657 = vmatprep.subr.bf16.mxu1 %v6656_v22  ;;  %v5379_v22 = vld [vmem:[%s10177_s11 + $0x178] sm:$0xff]  ;;  %v6686_v59 = vpack.c.bf16 %v5374_v17, %v5372_v58  ;;  %v4192_v58 = vld [vmem:[%s10180_s14 + $0x8] sm:$0xff]  ;;  %v4193_v17 = vld [vmem:[%s10180_s14 + $0x10] sm:$0xff] }
 0x73e   : > { %v6688_v40 = vpack.c.bf16 %v5379_v22, %v5377_v33  ;;  %v4194_v22 = vld [vmem:[%s10180_s14 + $0x18] sm:$0xff] }
 0x740   : > { %6659 = vmatpush1.bf16.msra.mxu1 %v6658_v34  ;;  %v5378_v34 = vld [vmem:[%s10177_s11 + $0x170] sm:$0xff] }
 0x741   : > { %6661 = vmatprep.subr.bf16.mxu1 %v6660_v51  ;;  %v6690_v12 = vpack.c.bf16 %v5378_v34, %v5376_v2  ;;  %v6692_v51 = vpack.c.bf16 %v5383_v62, %v5381_v20  ;;  %v4196_v2 = vld [vmem:[%s10180_s14 + $0x28] sm:$0xff]  ;;  %v4197_v20 = vld [vmem:[%s10180_s14 + $0x30] sm:$0xff]  ;;  %v4198_v62 = vld [vmem:[%s10180_s14 + $0x38] sm:$0xff] }
 0x744   : > { %6663 = vmatpush1.bf16.msra.mxu1 %v6662_v47  ;;  %v5385_v47 = vld [vmem:[%s10177_s11 + $0x1a8] sm:$0xff] }
 0x745   : > { %6665 = vmatprep.subr.bf16.mxu1 %v6664_v29  ;;  %v5387_v29 = vld [vmem:[%s10177_s11 + $0x1b8] sm:$0xff] }
 0x806   : > { %v5718_v60 = vpop.f32.mrb[26].mxu1 }
 0x807   : > { %v3740_v43 = vadd.f32 %v5718_v60, %v5347_v37  ;;  %v3721_v36 = vpop.f32.mrb[27].mxu1  ;;  %v6696_v60 = vpack.c.bf16 %v5387_v29, %v5385_v47  ;;  %v4068_v47 = vld [vmem:[%s10178_s12] sm:$0x3] }
 0x808   : > { %v3739_v57 = vadd.f32 %v5347_v37, %v3721_v36  ;;  %v6694_v37 = vpack.c.bf16 %v5382_v4, %v5380_v0  ;;  %v5386_v36 = vld [vmem:[%s10177_s11 + $0x1b0] sm:$0xff]  ;;  %v4200_v0 = vld [vmem:[%s10180_s14 + $0x48] sm:$0xff]  ;;  %v4073_v29 = vrot.slane %v4068_v47, %v7685_v11 }
 0x809   : > { %v3742_v54 = vmax.f32 %v3740_v43, 0.0  ;;  %v5384_v43 = vld [vmem:[%s10177_s11 + $0x1a0] sm:$0xff] }
 0x80a   : > { %v3741_v53 = vmax.f32 %v3739_v57, 0.0  ;;  %v5389_v57 = vld [vmem:[%s10177_s11 + $0x1c8] sm:$0xff] }
 0x80b   : > { %3748 = vst.msk [vmem:[#allocation3 + $0x9] sm:$0x3] %vm3747_vm4, %v3742_v54  ;;  %v5391_v54 = vld [vmem:[%s10177_s11 + $0x1d8] sm:$0xff] }
 0x80c   : > { %3746 = vst.msk [vmem:[#allocation3 + $0x1] sm:$0xff] %vm1766_vm7, %v3741_v53  ;;  %v6698_v53 = vpack.c.bf16 %v5386_v36, %v5384_v43  ;;  %v6700_v50 = vpack.c.bf16 %v5391_v54, %v5389_v57  ;;  %v5397_v57 = vld [vmem:[%s10180_s14 + $0x50] sm:$0xff]  ;;  %v5398_v54 = vld [vmem:[%s10180_s14 + $0x58] sm:$0xff] }
 0x80d   : > { %v6733_v3 = vpack.c.bf16 %v5398_v54, %v5397_v57  ;;  %v5424_v57 = vld [vmem:[%s10182_s16 + $0x98] sm:$0xff] }
 0x813   : > { %v9610_v16 = vld [vmem:[#allocation3] sm:$0xff]  ;;  %v9612_v5 = vld [vmem:[#allocation3 + $0x8] sm:$0xf] }
 0x814   : > { %v3794_v15 = vrot.slane %v9610_v16, 1  ;;  %v3795_v18 = vrot.slane %v9612_v5, 1 }
 0x816   : > { %v3796_v27 = vsel %vm642_vm3, %v3794_v15, %v3795_v18  ;;  %v4088_v15 = vld [vmem:[%s10179_s13] sm:$0xff] }
 0x817   : > { %5368 = vmatmul.mubr.msk.f32.vlgmr.msra.gmra.mrb[28].mxu1 %vm1766_vm7, %v3796_v27  ;;  %v4091_v27 = vld [vmem:[%s10179_s13 + $0x18] sm:$0xff] }
 0x818   : > { %6667 = vmatpush1.bf16.msra.mxu1 %v6666_v25  ;;  %3871 = vmatprep.mubr.f32.mxu1 %v6983_v7  ;;  %v3980_v25 = vrot.slane %v9610_v16, 2 }
 0x819   : > { %6669 = vmatprep.subr.bf16.mxu1 %v6668_v52  ;;  %v3981_v52 = vrot.slane %v9612_v5, 2 }
 0x81b   : > { %5369 = vmatmul.mubr.msk.f32.gmra.mrb[30].mxu1 %vm1766_vm7, %v3795_v18  ;;  %v4089_v18 = vld [vmem:[%s10179_s13 + $0x8] sm:$0xff]  ;;  %v3982_v44 = vsel %vm1065_vm5, %v3980_v25, %v3981_v52 }
 0x81c   : > { %6671 = vmatpush1.bf16.msra.mxu1 %v6670_v28  ;;  %3946 = vmatprep.mubr.f32.mxu1 %v6983_v7  ;;  %v6705_v19 = vpack.c.bf16 %v4089_v18, %v4088_v15  ;;  %v5400_v25 = vld [vmem:[%s10180_s14 + $0x68] sm:$0xff] }
 0x81d   : > { %6673 = vmatprep.subr.bf16.mxu1 %v6672_v30  ;;  %v4094_v30 = vld [vmem:[%s10179_s13 + $0x30] sm:$0xff] }
 0x81e   : > { %v6714_v32 = vpack.c.bf16 %v4095_v31, %v4094_v30  ;;  %v5405_v31 = vld [vmem:[%s10180_s14 + $0x90] sm:$0xff] }
 0x820   : > { %6675 = vmatpush1.bf16.msra.mxu1 %v6674_v39  ;;  %v6717_v39 = vpack.c.bf16 %v4097_v35, %v4096_v61 }
 0x821   : > { %6677 = vmatprep.subr.bf16.mxu1 %v6676_v42  ;;  %v4098_v42 = vld [vmem:[%s10179_s13 + $0x50] sm:$0xff] }
 0x822   : > { %v6720_v46 = vpack.c.bf16 %v4099_v45, %v4098_v42  ;;  %v5409_v42 = vld [vmem:[%s10180_s14 + $0xa0] sm:$0xff]  ;;  %v5410_v45 = vld [vmem:[%s10180_s14 + $0xa8] sm:$0xff] }
 0x824   : > { %6679 = vmatpush1.bf16.msra.mxu1 %v6678_v1  ;;  %v6723_v1 = vpack.c.bf16 %v4101_v38, %v4100_v48  ;;  %v6763_v48 = vpack.c.bf16 %v5410_v45, %v5409_v42  ;;  %v4469_v42 = vld [vmem:[%s10182_s16 + $0x60] sm:$0xff]  ;;  %v4470_v45 = vld [vmem:[%s10182_s16 + $0x68] sm:$0xff] }
 0x825   : > { %6681 = vmatprep.subr.bf16.mxu1 %v6680_v49  ;;  %v4102_v49 = vld [vmem:[%s10179_s13 + $0x70] sm:$0xff] }
 0x826   : > { %v6726_v6 = vpack.c.bf16 %v4103_v55, %v4102_v49 }
 0x828   : > { %6683 = vmatpush1.bf16.msra.mxu1 %v6682_v63  ;;  %v6729_v63 = vpack.c.bf16 %v4105_v56, %v4104_v26  ;;  %v5411_v26 = vld [vmem:[%s10180_s14 + $0xb0] sm:$0xff]  ;;  %v5412_v56 = vld [vmem:[%s10180_s14 + $0xb8] sm:$0xff] }
 0x829   : > { %6685 = vmatprep.subr.bf16.mxu1 %v6684_v8  ;;  %v4191_v8 = vld [vmem:[%s10180_s14] sm:$0xff] }
 0x82a   : > { %v6748_v33 = vpack.c.bf16 %v4192_v58, %v4191_v8  ;;  %v6766_v58 = vpack.c.bf16 %v5412_v56, %v5411_v26  ;;  %v5435_v26 = vld [vmem:[%s10182_s16 + $0xf0] sm:$0xff]  ;;  %v5436_v56 = vld [vmem:[%s10182_s16 + $0xf8] sm:$0xff] }
 0x82b   : > { %5370 = vmatmul.mubr.msk.f32.vlgmr.msra.gmra.mrb[28].mxu1 %vm1766_vm7, %v9610_v16  ;;  %v6708_v16 = vpack.c.bf16 %v4091_v27, %v4090_v21 }
 0x82c   : > { %6687 = vmatpush1.bf16.msra.mxu1 %v6686_v59  ;;  %3952 = vmatprep.mubr.f32.mxu1 %v6983_v7  ;;  %v6751_v59 = vpack.c.bf16 %v4194_v22, %v4193_v17  ;;  %v5413_v17 = vld [vmem:[%s10180_s14 + $0xc0] sm:$0xff] }
 0x82d   : > { %6689 = vmatprep.subr.bf16.mxu1 %v6688_v40  ;;  %6749 = vmatpush3.bf16.msra.mxu0 %v6748_v33  ;;  %v4195_v40 = vld [vmem:[%s10180_s14 + $0x20] sm:$0xff]  ;;  %v5414_v33 = vld [vmem:[%s10180_s14 + $0xc8] sm:$0xff] }
 0x82e   : > { %6750 = vmatprep.subr.bf16.mxu0 %v6985_v9  ;;  %v6754_v34 = vpack.c.bf16 %v4196_v2, %v4195_v40  ;;  %v6769_v22 = vpack.c.bf16 %v5414_v33, %v5413_v17  ;;  %v5416_v40 = vld [vmem:[%s10180_s14 + $0xd8] sm:$0xff] }
 0x82f   : > { %5371 = vmatmul.mubr.msk.f32.gmra.mrb[30].mxu1 %vm1766_vm7, %v9612_v5  ;;  %v4092_v5 = vld [vmem:[%s10179_s13 + $0x20] sm:$0xff] }
 0x830   : > { %6691 = vmatpush1.bf16.msra.mxu1 %v6690_v12  ;;  %4051 = vmatprep.mubr.f32.mxu1 %v6983_v7  ;;  %v6711_v28 = vpack.c.bf16 %v4093_v24, %v4092_v5  ;;  %v6757_v12 = vpack.c.bf16 %v4198_v62, %v4197_v20  ;;  %v5403_v24 = vld [vmem:[%s10180_s14 + $0x80] sm:$0xff]  ;;  %v5418_v20 = vld [vmem:[%s10180_s14 + $0xe8] sm:$0xff] }
 0x831   : > { %6693 = vmatprep.subr.bf16.mxu1 %v6692_v51  ;;  %6752 = vmatpush3.bf16.msra.mxu0 %v6751_v59  ;;  %v4199_v51 = vld [vmem:[%s10180_s14 + $0x40] sm:$0xff]  ;;  %v5415_v59 = vld [vmem:[%s10180_s14 + $0xd0] sm:$0xff] }
 0x832   : > { %6753 = vmatprep.subr.bf16.mxu0 %v6985_v9  ;;  %v6760_v4 = vpack.c.bf16 %v4200_v0, %v4199_v51  ;;  %v6772_v2 = vpack.c.bf16 %v5416_v40, %v5415_v59  ;;  %v4458_v51 = vld [vmem:[%s10182_s16 + $0x8] sm:$0xff]  ;;  %v5420_v40 = vld [vmem:[%s10181_s15] ss:$0 sm:$0xff] }
 0x834   : > { %6695 = vmatpush1.bf16.msra.mxu1 %v6694_v37  ;;  %v4077_v37 = vrot.slane %v4068_v47, %v7693_v13  ;;  %v5399_v13 = vld [vmem:[%s10180_s14 + $0x60] sm:$0xff]  ;;  %v5422_v47 = vld [vmem:[%s10182_s16 + $0x88] sm:$0xff] }
 0x835   : > { %6697 = vmatprep.subr.bf16.mxu1 %v6696_v60  ;;  %6755 = vmatpush3.bf16.msra.mxu0 %v6754_v34  ;;  %v6736_v21 = vpack.c.bf16 %v5400_v25, %v5399_v13  ;;  %v5417_v34 = vld [vmem:[%s10180_s14 + $0xe0] sm:$0xff]  ;;  %v5427_v25 = vld [vmem:[%s10182_s16 + $0xb0] sm:$0xff] }
 0x836   : > { %6756 = vmatprep.subr.bf16.mxu0 %v6985_v9  ;;  %v6775_v62 = vpack.c.bf16 %v5418_v20, %v5417_v34 }
 0x838   : > { %6699 = vmatpush1.bf16.msra.mxu1 %v6698_v53 }
 0x839   : > { %6701 = vmatprep.subr.bf16.mxu1 %v6700_v50  ;;  %6758 = vmatpush3.bf16.msra.mxu0 %v6757_v12  ;;  %v4457_v12 = vld [vmem:[%s10182_s16] sm:$0xff] }
 0x83a   : > { %6759 = vmatprep.subr.bf16.mxu0 %v6985_v9  ;;  %v6802_v0 = vpack.c.bf16 %v4458_v51, %v4457_v12  ;;  %v5438_v12 = vld [vmem:[%s10182_s16 + $0x108] sm:$0xff] }
 0x83c   : > { %6703 = vmatpush1.bf16.msra.mxu1 %v6702_v14 }
 0x83d   : > { %6704 = vmatprep.subr.bf16.mxu1 %v6985_v9  ;;  %6761 = vmatpush3.bf16.msra.mxu0 %v6760_v4  ;;  %v5421_v4 = vld [vmem:[%s10182_s16 + $0x80] sm:$0xff] }
 0x83e   : > { %6777 = vmatprep.subr.bf16.mxu0 %v6985_v9 }
 0x83f   : > { %5392 = vmatmul.mubr.msk.f32.vlgmr.msra.gmra.mrb[28].mxu1 %vm1766_vm7, %v3982_v44  ;;  %v5401_v44 = vld [vmem:[%s10180_s14 + $0x70] sm:$0xff] }
 0x840   : > { %4057 = vmatprep.mubr.f32.mxu1 %v6983_v7  ;;  %6706 = vmatpush1.bf16.msra.mxu1 %v6705_v19 }
 0x841   : > { %6707 = vmatprep.subr.bf16.mxu1 %v6985_v9 }
 0x843   : > { %5393 = vmatmul.mubr.msk.f32.gmra.mrb[30].mxu1 %vm1766_vm7, %v3981_v52 }
 0x844   : > { %6709 = vmatpush1.bf16.msra.mxu1 %v6708_v16  ;;  %v5402_v16 = vld [vmem:[%s10180_s14 + $0x78] sm:$0xff] }
 0x845   : > { %6710 = vmatprep.subr.bf16.mxu1 %v6985_v9  ;;  %v6739_v5 = vpack.c.bf16 %v5402_v16, %v5401_v44  ;;  %v4466_v44 = vld [vmem:[%s10182_s16 + $0x48] sm:$0xff]  ;;  %v5429_v16 = vld [vmem:[%s10182_s16 + $0xc0] sm:$0xff] }
 0x848   : > { %6712 = vmatpush1.bf16.msra.mxu1 %v6711_v28  ;;  %v5404_v28 = vld [vmem:[%s10180_s14 + $0x88] sm:$0xff] }
 0x849   : > { %6713 = vmatprep.subr.bf16.mxu1 %v6985_v9  ;;  %v6742_v30 = vpack.c.bf16 %v5404_v28, %v5403_v24 }
 0x84c   : > { %6715 = vmatpush1.bf16.msra.mxu1 %v6714_v32  ;;  %v5406_v32 = vld [vmem:[%s10180_s14 + $0x98] sm:$0xff] }
 0x84d   : > { %6716 = vmatprep.subr.bf16.mxu1 %v6985_v9  ;;  %v6745_v61 = vpack.c.bf16 %v5406_v32, %v5405_v31  ;;  %v4468_v31 = vld [vmem:[%s10182_s16 + $0x58] sm:$0xff]  ;;  %v5431_v32 = vld [vmem:[%s10182_s16 + $0xd0] sm:$0xff] }
 0x850   : > { %6718 = vmatpush1.bf16.msra.mxu1 %v6717_v39 }
 0x851   : > { %6719 = vmatprep.subr.bf16.mxu1 %v6985_v9 }
 0x854   : > { %6721 = vmatpush1.bf16.msra.mxu1 %v6720_v46 }
 0x855   : > { %6722 = vmatprep.subr.bf16.mxu1 %v6985_v9 }
 0x858   : > { %6724 = vmatpush1.bf16.msra.mxu1 %v6723_v1 }
 0x859   : > { %6725 = vmatprep.subr.bf16.mxu1 %v6985_v9 }
 0x85c   : > { %6727 = vmatpush1.bf16.msra.mxu1 %v6726_v6 }
 0x85d   : > { %6728 = vmatprep.subr.bf16.mxu1 %v6985_v9 }
 0x860   : > { %6731 = vmatpush1.bf16.msk.msra.mxu1 %vm7115_vm2, %v6729_v63 }
 0x861   : > { %6732 = vmatprep.subr.bf16.mxu1 %v6985_v9 }
 0x912   : > { %v4053_v60 = vpop.f32.mrb[28].mxu1 }
 0x913   : > { %v4080_v43 = vadd.f32 %v4073_v29, %v4053_v60  ;;  %v4055_v36 = vpop.f32.mrb[29].mxu1  ;;  %v4460_v60 = vld [vmem:[%s10182_s16 + $0x18] sm:$0xff] }
 0x914   : > { %v4081_v53 = vadd.f32 %v4077_v37, %v4055_v36  ;;  %v5423_v36 = vld [vmem:[%s10182_s16 + $0x90] sm:$0xff] }
 0x915   : > { %v4084_v14 = vmax.f32 %v4080_v43, 0.0  ;;  %v6781_v54 = vpack.c.bf16 %v5424_v57, %v5423_v36  ;;  %v5443_v57 = vld [vmem:[%s10182_s16 + $0x130] sm:$0xff] }
 0x916   : > { %v4085_v50 = vmax.f32 %v4081_v53, 0.0  ;;  %v4059_v23 = vpop.f32.mrb[30].mxu1  ;;  %v4461_v53 = vld [vmem:[%s10182_s16 + $0x20] sm:$0xff] }
 0x917   : > { %v4082_v15 = vadd.f32 %v4073_v29, %v4059_v23  ;;  %v4061_v18 = vpop.f32.mrb[31].mxu1  ;;  %v4459_v29 = vld [vmem:[%s10182_s16 + $0x10] sm:$0xff]  ;;  %v5425_v23 = vld [vmem:[%s10182_s16 + $0xa0] sm:$0xff] }
 0x918   : > { %v4083_v52 = vadd.f32 %v4077_v37, %v4061_v18  ;;  %5395 = vmatprep.mubr.msk.f32.mxu1 %vm4106_vm6, %v4085_v50  ;;  %v6778_v37 = vpack.c.bf16 %v5422_v47, %v5421_v4  ;;  %v6805_v43 = vpack.c.bf16 %v4460_v60, %v4459_v29  ;;  %v4462_v50 = vld [vmem:[%s10182_s16 + $0x28] sm:$0xff]  ;;  %v4464_v18 = vld [vmem:[%s10182_s16 + $0x38] sm:$0xff]  ;;  %v5439_v47 = vld [vmem:[%s10182_s16 + $0x110] sm:$0xff] }
 0x919   : > { %4181 = vmatmul.mubr.f32.vlgmr.msra.gmra.mrb[32].mxu1 %v4084_v14  ;;  %v4086_v27 = vmax.f32 %v4082_v15, 0.0  ;;  %v5426_v14 = vld [vmem:[%s10182_s16 + $0xa8] sm:$0xff]  ;;  %v4463_v15 = vld [vmem:[%s10182_s16 + $0x30] sm:$0xff]  ;;  %v5440_v29 = vld [vmem:[%s10182_s16 + $0x118] sm:$0xff] }
 0x91a   : > { %v4087_v19 = vmax.f32 %v4083_v52, 0.0  ;;  %6734 = vmatpush3.bf16.msra.mxu1 %v6733_v3  ;;  %v6808_v3 = vpack.c.bf16 %v4462_v50, %v4461_v53  ;;  %v6784_v13 = vpack.c.bf16 %v5426_v14, %v5425_v23  ;;  %v5428_v52 = vld [vmem:[%s10182_s16 + $0xb8] sm:$0xff]  ;;  %v5441_v60 = vld [vmem:[%s10182_s16 + $0x120] sm:$0xff]  ;;  %v5446_v50 = vld [vmem:[%s10182_s16 + $0x148] sm:$0xff] }
 0x91b   : > { %6735 = vmatprep.subr.bf16.mxu1 %v6985_v9  ;;  %v5445_v53 = vld [vmem:[%s10182_s16 + $0x140] sm:$0xff]  ;;  %v5448_v14 = vld [vmem:[%s10182_s16 + $0x158] sm:$0xff] }
 0x91c   : > { %5396 = vmatprep.mubr.msk.f32.mxu1 %vm4106_vm6, %v4087_v19  ;;  %v6811_v19 = vpack.c.bf16 %v4464_v18, %v4463_v15  ;;  %v6838_v23 = vpack.c.bf16 %v5446_v50, %v5445_v53  ;;  %v5449_v18 = vld [vmem:[%s10182_s16 + $0x160] sm:$0xff] }
 0x91d   : > { %4186 = vmatmul.mubr.f32.gmra.mrb[34].mxu1 %v4086_v27  ;;  %v4465_v27 = vld [vmem:[%s10182_s16 + $0x40] sm:$0xff] }
 0x91e   : > { %6737 = vmatpush3.bf16.msra.mxu1 %v6736_v21  ;;  %5739 = vmatprep.mubr.msk.f32.mxu1 %vm6986_vm8, %v6983_v7  ;;  %v6787_v21 = vpack.c.bf16 %v5428_v52, %v5427_v25  ;;  %v6814_v24 = vpack.c.bf16 %v4466_v44, %v4465_v27  ;;  %v5451_v52 = vld [vmem:[%s10182_s16 + $0x170] sm:$0xff]  ;;  %v4740_v44 = vld [vmem:[%s10184_s18] sm:$0xff] }
 0x91f   : > { %6738 = vmatprep.subr.bf16.mxu1 %v6985_v9 }
 0x922   : > { %6740 = vmatpush3.bf16.msra.mxu1 %v6739_v5  ;;  %v5430_v5 = vld [vmem:[%s10182_s16 + $0xc8] sm:$0xff] }
 0x923   : > { %6741 = vmatprep.subr.bf16.mxu1 %v6985_v9  ;;  %v6790_v28 = vpack.c.bf16 %v5430_v5, %v5429_v16  ;;  %v4741_v16 = vld [vmem:[%s10184_s18 + $0x8] sm:$0xff]  ;;  %v4742_v5 = vld [vmem:[%s10184_s18 + $0x10] sm:$0xff] }
 0x926   : > { %6743 = vmatpush3.bf16.msra.mxu1 %v6742_v30  ;;  %v4467_v30 = vld [vmem:[%s10182_s16 + $0x50] sm:$0xff] }
 0x927   : > { %6744 = vmatprep.subr.bf16.mxu1 %v6985_v9 }
 0x92a   : > { %6746 = vmatpush3.bf16.msra.mxu1 %v6745_v61  ;;  %v5432_v61 = vld [vmem:[%s10182_s16 + $0xd8] sm:$0xff] }
 0x92b   : > { %6762 = vmatprep.subr.bf16.mxu1 %v6985_v9 }
 0x9ec   : > { %v4182_v35 = vpop.f32.mrb[32].mxu1 }
 0x9ed   : > { %v4184_v39 = vpop.f32.mrb[33].mxu1  ;;  %5763 = vmatmul.mubr.msk.f32.vlgmr.msra.gmra.mrb[28].mxu0 %vm1766_vm7, %v4182_v35  ;;  %v4214_v38 = vrot.slane %v4182_v35, 1  ;;  %v4372_v1 = vrot.slane %v4182_v35, 2  ;;  %v6817_v35 = vpack.c.bf16 %v4468_v31, %v4467_v30  ;;  %v4744_v31 = vld [vmem:[%s10184_s18 + $0x20] sm:$0xff] }
 0x9ee   : > { %5820 = vmatprep.mubr.msk.f32.mxu0 %vm6986_vm8, %v6983_v7  ;;  %6779 = vmatpush3.bf16.msra.mxu0 %v6778_v37  ;;  %v6793_v39 = vpack.c.bf16 %v5432_v61, %v5431_v32  ;;  %v6829_v37 = vpack.c.bf16 %v5440_v29, %v5439_v47  ;;  %v4745_v32 = vld [vmem:[%s10184_s18 + $0x28] sm:$0xff] }
 0x9ef   : > { %6780 = vmatprep.subr.bf16.mxu0 %v6985_v9  ;;  %v6856_v61 = vpack.c.bf16 %v4745_v32, %v4744_v31 }
 0x9f0   : > { %v4187_v46 = vpop.f32.mrb[34].mxu1 }
 0x9f1   : > { %v4215_v49 = vrot.slane %v4187_v46, 1  ;;  %v4373_v55 = vrot.slane %v4187_v46, 2  ;;  %v4189_v6 = vpop.f32.mrb[35].mxu1  ;;  %v6820_v46 = vpack.c.bf16 %v4470_v45, %v4469_v42  ;;  %v4748_v45 = vld [vmem:[%s10184_s18 + $0x40] sm:$0xff] }
 0x9f2   : > { %6782 = vmatpush3.bf16.msra.mxu0 %v6781_v54 }
 0x9f3   : > { %v4216_v63 = vsel %vm642_vm3, %v4214_v38, %v4215_v49  ;;  %v4374_v8 = vsel %vm1065_vm5, %v4372_v1, %v4373_v55  ;;  %6783 = vmatprep.subr.bf16.mxu0 %v6985_v9  ;;  %v5434_v38 = vld [vmem:[%s10182_s16 + $0xe8] sm:$0xff]  ;;  %v4471_v49 = vld [vmem:[%s10182_s16 + $0x70] sm:$0xff]  ;;  %v4472_v55 = vld [vmem:[%s10182_s16 + $0x78] sm:$0xff]  ;;  %vm4732_vm3 = vcmask 881664   ;;  %vm4831_vm5 = vcmp.lt.s32.totalorder %v9268_v41, 10 }
 0x9f4   : > { %5740 = vmatmul.mubr.msk.f32.vlgmr.msra.gmra.mrb[36].mxu1 %vm1766_vm7, %v4216_v63  ;;  %v6823_v6 = vpack.c.bf16 %v4472_v55, %v4471_v49  ;;  %v6799_v63 = vpack.c.bf16 %v5436_v56, %v5435_v26  ;;  %v4752_v55 = vld [vmem:[%s10184_s18 + $0x60] sm:$0xff] }
 0x9f5   : > { %6764 = vmatpush3.bf16.msra.mxu1 %v6763_v48  ;;  %5785 = vmatprep.mubr.msk.f32.mxu1 %vm6986_vm8, %v6983_v7  ;;  %v5433_v48 = vld [vmem:[%s10182_s16 + $0xe0] sm:$0xff] }
 0x9f6   : > { %6765 = vmatprep.subr.bf16.mxu1 %v6985_v9  ;;  %6785 = vmatpush3.bf16.msra.mxu0 %v6784_v13  ;;  %v6796_v1 = vpack.c.bf16 %v5434_v38, %v5433_v48  ;;  %v5450_v13 = vld [vmem:[%s10182_s16 + $0x168] sm:$0xff]  ;;  %v4750_v38 = vld [vmem:[%s10184_s18 + $0x50] sm:$0xff] }
 0x9f7   : > { %6786 = vmatprep.subr.bf16.mxu0 %v6985_v9  ;;  %v6844_v25 = vpack.c.bf16 %v5450_v13, %v5449_v18 }
 0x9f9   : > { %6767 = vmatpush3.bf16.msra.mxu1 %v6766_v58 }
 0x9fa   : > { %6768 = vmatprep.subr.bf16.mxu1 %v6985_v9  ;;  %6788 = vmatpush3.bf16.msra.mxu0 %v6787_v21 }
 0x9fb   : > { %6789 = vmatprep.subr.bf16.mxu0 %v6985_v9 }
 0x9fd   : > { %6770 = vmatpush3.bf16.msra.mxu1 %v6769_v22 }
 0x9fe   : > { %6771 = vmatprep.subr.bf16.mxu1 %v6985_v9  ;;  %6791 = vmatpush3.bf16.msra.mxu0 %v6790_v28  ;;  %v4743_v28 = vld [vmem:[%s10184_s18 + $0x18] sm:$0xff] }
 0x9ff   : > { %6792 = vmatprep.subr.bf16.mxu0 %v6985_v9  ;;  %v6853_v30 = vpack.c.bf16 %v4743_v28, %v4742_v5 }
 0xa01   : > { %6773 = vmatpush3.bf16.msra.mxu1 %v6772_v2 }
 0xa02   : > { %6774 = vmatprep.subr.bf16.mxu1 %v6985_v9  ;;  %6794 = vmatpush3.bf16.msra.mxu0 %v6793_v39  ;;  %v4747_v39 = vld [vmem:[%s10184_s18 + $0x38] sm:$0xff] }
 0xa03   : > { %6795 = vmatprep.subr.bf16.mxu0 %v6985_v9 }
 0xa05   : > { %6776 = vmatpush3.bf16.msra.mxu1 %v6775_v62  ;;  %v5437_v62 = vld [vmem:[%s10182_s16 + $0x100] sm:$0xff] }
 0xa06   : > { %6801 = vmatprep.subr.bf16.mxu1 %v6985_v9  ;;  %6797 = vmatpush3.bf16.msra.mxu0 %v6796_v1  ;;  %v4751_v1 = vld [vmem:[%s10184_s18 + $0x58] sm:$0xff] }
 0xa07   : > { %6798 = vmatprep.subr.bf16.mxu0 %v6985_v9  ;;  %v6865_v49 = vpack.c.bf16 %v4751_v1, %v4750_v38 }
 0xa08   : > { %5786 = vmatmul.mubr.msk.f32.vlgmr.msra.gmra.mrb[38].mxu1 %vm1766_vm7, %v4374_v8 }
 0xa09   : > { %5855 = vmatprep.mubr.msk.f32.mxu1 %vm6986_vm8, %v6983_v7  ;;  %6803 = vmatpush3.bf16.msra.mxu1 %v6802_v0  ;;  %v6826_v0 = vpack.c.bf16 %v5438_v12, %v5437_v62 }
 0xa0a   : > { %6804 = vmatprep.subr.bf16.mxu1 %v6985_v9  ;;  %6800 = vmatpush3.bf16.msra.mxu0 %v6799_v63 }
 0xa0b   : > { %6825 = vmatprep.subr.bf16.mxu0 %v6985_v9 }
 0xa0d   : > { %6806 = vmatpush3.bf16.msra.mxu1 %v6805_v43  ;;  %v5442_v43 = vld [vmem:[%s10182_s16 + $0x128] sm:$0xff] }
 0xa0e   : > { %6807 = vmatprep.subr.bf16.mxu1 %v6985_v9  ;;  %v6832_v36 = vpack.c.bf16 %v5442_v43, %v5441_v60 }
 0xa11   : > { %6809 = vmatpush3.bf16.msra.mxu1 %v6808_v3  ;;  %v5447_v3 = vld [vmem:[%s10182_s16 + $0x150] sm:$0xff] }
 0xa12   : > { %6810 = vmatprep.subr.bf16.mxu1 %v6985_v9  ;;  %v6841_v15 = vpack.c.bf16 %v5448_v14, %v5447_v3 }
 0xa15   : > { %6812 = vmatpush3.bf16.msra.mxu1 %v6811_v19  ;;  %v5452_v19 = vld [vmem:[%s10182_s16 + $0x178] sm:$0xff] }
 0xa16   : > { %6813 = vmatprep.subr.bf16.mxu1 %v6985_v9  ;;  %v6847_v21 = vpack.c.bf16 %v5452_v19, %v5451_v52 }
 0xa19   : > { %6815 = vmatpush3.bf16.msra.mxu1 %v6814_v24  ;;  %v6850_v24 = vpack.c.bf16 %v4741_v16, %v4740_v44 }
 0xa1a   : > { %6816 = vmatprep.subr.bf16.mxu1 %v6985_v9 }
 0xa1d   : > { %6818 = vmatpush3.bf16.msra.mxu1 %v6817_v35  ;;  %v4746_v35 = vld [vmem:[%s10184_s18 + $0x30] sm:$0xff] }
 0xa1e   : > { %6819 = vmatprep.subr.bf16.mxu1 %v6985_v9  ;;  %v6859_v42 = vpack.c.bf16 %v4747_v39, %v4746_v35 }
 0xa21   : > { %6821 = vmatpush3.bf16.msra.mxu1 %v6820_v46  ;;  %v4749_v46 = vld [vmem:[%s10184_s18 + $0x48] sm:$0xff] }
 0xa22   : > { %6822 = vmatprep.subr.bf16.mxu1 %v6985_v9  ;;  %v6862_v48 = vpack.c.bf16 %v4749_v46, %v4748_v45 }
 0xa25   : > { %6824 = vmatpush3.bf16.msra.mxu1 %v6823_v6  ;;  %v4753_v6 = vld [vmem:[%s10184_s18 + $0x68] sm:$0xf] }
 0xa26   : > { %6849 = vmatprep.subr.bf16.mxu1 %v6985_v9  ;;  %v6868_v26 = vpack.c.bf16 %v4753_v6, %v4752_v55 }
 0xac0   : > { %v4357_v8 = vpop.f32.mrb[28].mxu0 }
 0xac1   : > { %v5764_v58 = vpop.f32.mrb[29].mxu0 }
 0xac7   : > { %v4285_v17 = vpop.f32.mrb[36].mxu1 }
 0xac8   : > { %v4358_v33 = vadd.f32 %v4357_v8, %v4285_v17  ;;  %v5741_v22 = vpop.f32.mrb[37].mxu1 }
 0xadb   : > { %v4443_v59 = vpop.f32.mrb[38].mxu1 }
 0xadc   : > { %v4447_v2 = vadd.f32 %v4443_v59, %v4358_v33  ;;  %v5787_v34 = vpop.f32.mrb[39].mxu1 }
 0xade   : > { %v4455_v20 = vadd.f32 %v5420_v40, %v4447_v2 }
 0xae0   : > { %v4456_v51 = vmax.f32 %v4455_v20, 0.0 }
 0xae2   : > { %5856 = vmatmul.mubr.f32.vlgmr.msra.gmra.mrb[40].mxu1 %v4456_v51  ;;  %v4491_v4 = vrot.slane %v4456_v51, 1  ;;  %v4650_v27 = vrot.slane %v4456_v51, 2 }
 0xae3   : > { %5921 = vmatprep.mubr.msk.f32.mxu1 %vm6986_vm8, %v6983_v7  ;;  %6851 = vmatpush3.bf16.msra.mxu1 %v6850_v24 }
 0xae4   : > { %5821 = vmatmul.mubr.f32.vlgmr.msra.gmra.mrb[30].mxu0 %v4491_v4  ;;  %6852 = vmatprep.subr.bf16.mxu1 %v6985_v9 }
 0xae5   : > { %6827 = vmatpush3.bf16.msra.mxu0 %v6826_v0  ;;  %5890 = vmatprep.mubr.msk.f32.mxu0 %vm6986_vm8, %v6983_v7  ;;  %v5444_v7 = vld [vmem:[%s10182_s16 + $0x138] sm:$0xff] }
 0xae6   : > { %6828 = vmatprep.subr.bf16.mxu0 %v6985_v9  ;;  %v6835_v54 = vpack.c.bf16 %v5444_v7, %v5443_v57 }
 0xae7   : > { %6854 = vmatpush3.bf16.msra.mxu1 %v6853_v30 }
 0xae8   : > { %6855 = vmatprep.subr.bf16.mxu1 %v6985_v9 }
 0xae9   : > { %6830 = vmatpush3.bf16.msra.mxu0 %v6829_v37 }
 0xaea   : > { %6831 = vmatprep.subr.bf16.mxu0 %v6985_v9 }
 0xaeb   : > { %6857 = vmatpush3.bf16.msra.mxu1 %v6856_v61 }
 0xaec   : > { %6858 = vmatprep.subr.bf16.mxu1 %v6985_v9 }
 0xaed   : > { %6833 = vmatpush3.bf16.msra.mxu0 %v6832_v36 }
 0xaee   : > { %6834 = vmatprep.subr.bf16.mxu0 %v6985_v9 }
 0xaef   : > { %6860 = vmatpush3.bf16.msra.mxu1 %v6859_v42 }
 0xaf0   : > { %6861 = vmatprep.subr.bf16.mxu1 %v6985_v9 }
 0xaf1   : > { %6836 = vmatpush3.bf16.msra.mxu0 %v6835_v54 }
 0xaf2   : > { %6837 = vmatprep.subr.bf16.mxu0 %v6985_v9 }
 0xaf3   : > { %6863 = vmatpush3.bf16.msra.mxu1 %v6862_v48 }
 0xaf4   : > { %6864 = vmatprep.subr.bf16.mxu1 %v6985_v9 }
 0xaf5   : > { %6839 = vmatpush3.bf16.msra.mxu0 %v6838_v23 }
 0xaf6   : > { %6840 = vmatprep.subr.bf16.mxu0 %v6985_v9 }
 0xaf7   : > { %6866 = vmatpush3.bf16.msra.mxu1 %v6865_v49 }
 0xaf8   : > { %6867 = vmatprep.subr.bf16.mxu1 %v6985_v9 }
 0xaf9   : > { %6842 = vmatpush3.bf16.msra.mxu0 %v6841_v15 }
 0xafa   : > { %6843 = vmatprep.subr.bf16.mxu0 %v6985_v9 }
 0xafb   : > { %6870 = vmatpush3.bf16.msk.msra.mxu1 %vm7115_vm2, %v6868_v26  ;;  %vm4754_vm2 = vcmask 883712  }
 0xafd   : > { %6845 = vmatpush3.bf16.msra.mxu0 %v6844_v25 }
 0xafe   : > { %6846 = vmatprep.subr.bf16.mxu0 %v6985_v9  ;;  %v5453_v9 = vld [vmem:[%s10183_s17] ss:$0 sm:$0xff] }
 0xb01   : > { %6848 = vmatpush3.bf16.msra.mxu0 %v6847_v21 }
 0xb04   : > { %5891 = vmatmul.mubr.f32.vlgmr.msra.gmra.mrb[32].mxu0 %v4650_v27 }
 0xbb5   : > { %v4629_v56 = vpop.f32.mrb[40].mxu1 }
 0xbb6   : > { %v5857_v63 = vpop.f32.mrb[41].mxu1 }
 0xbb7   : > { %v4559_v8 = vpop.f32.mrb[30].mxu0 }
 0xbb8   : > { %v4630_v58 = vadd.f32 %v4629_v56, %v4559_v8  ;;  %v5822_v17 = vpop.f32.mrb[31].mxu0 }
 0xbd7   : > { %v4718_v33 = vpop.f32.mrb[32].mxu0 }
 0xbd8   : > { %v4722_v22 = vadd.f32 %v4718_v33, %v4630_v58  ;;  %v5892_v59 = vpop.f32.mrb[33].mxu0 }
 0xbda   : > { %v4730_v40 = vadd.f32 %v5453_v9, %v4722_v22 }
 0xbdc   : > { %v4731_v2 = vmax.f32 %v4730_v40, 0.0 }
 0xbde   : > { %v4733_v34 = vsel %vm4732_vm3, %v4731_v2, 0.0 }
 0xbdf   : > { %v4734_v20 = vrot.slane %v4733_v34, 4 }
 0xbe1   : > { %v4735_v62 = vadd.f32 %v4734_v20, %v4733_v34 }
 0xbe3   : > { %v4736_v10 = vrot.slane %v4735_v62, 2 }
 0xbe5   : > { %v4737_v12 = vadd.f32 %v4736_v10, %v4735_v62 }
 0xbe7   : > { %v4738_v51 = vrot.slane %v4737_v12, 1 }
 0xbe9   : > { %v4739_v0 = vadd.f32 %v4738_v51, %v4737_v12 }
 0xbeb   : > { %5922 = vmatmul.mubr.msk.f32.vlgmr.msra.gmra.mrb[42].mxu1 %vm4754_vm2, %v4739_v0 }
 0xcbe   : > { %v4827_v4 = vpop.f32.mrb[42].mxu1 }
 0xcbf   : > { %v4832_v47 = vsel %vm4831_vm5, %v4827_v4, -1e+30  ;;  %v5923_v29 = vpop.f32.mrb[43].mxu1 }
 0xcc0   : > { %v4833_v37 = vsel %vm2149_vm10, %v4832_v47, -inf }
 0xcc1   : > { %4834 = vmax.xlane.f32.xlu0 %v4833_v37 }
 0xd4e   : > { %v4835_v60 = vpop.xlane.xlu0 %4834 }
 0xd4f   : > { %v4836_v43 = vsub.f32 %v4832_v47, %v4835_v60 }
 0xd51   : > { %v4837_v36 = vmul.f32 1.442695, %v4836_v43 }
 0xd53   : > { %6971 = vpow2.f32 %v4837_v36 }
 0xd5d   : > { %v6972_v57 = vpop.eup %6971 }
 0xd5e   : > { %v4839_v7 = vsel %vm4831_vm5, %v6972_v57, 0.0 }
 0xd5f   : > { %v4840_v54 = vsel %vm2149_vm10, %v4839_v7, 0.0 }
 0xd60   : > { %4841 = vadd.xlane.f32.xlu0 %v4840_v54 }
 0xded   : > { %v4842_v53 = vpop.xlane.xlu0 %4841 }
 0xdee   : > { %6973 = vlog2.f32 %v4842_v53 }
 0xdf8   : > { %v6974_v50 = vpop.eup %6973 }
 0xdf9   : > { %v4844_v41 = vmul.f32 0.6931472, %v6974_v50 }
 0xdfb   : > { %v4845_v23 = vsub.f32 %v4836_v43, %v4844_v41 }
 0xdfd   : > { %v4849_v3 = vrot.slane %v4845_v23, %v7685_v11 }
 0xdff   : > { %4850 = vst [vmem:[%s600_s26] sm:$0xff] %v4849_v3 }
 0xe00 PF: > { %s10200_s0 = sld [smem:[#allocation4_spill]] }
 0xe06   : > { %s29_s0 = sadd.s32 1, %s10200_s0  }
 0xe07   : > { %p26_p4 = scmp.ge.s32.totalorder %s29_s0, 4  }
 0xe09   :  { %28 = sbr.rel (!%p26_p4) target bundleno = 5 (0x5), region = 141 }

</bundles_post_ra>
